<compile_context>
chip_gen: v5e
topology: v5e:2x2
jax: 0.10.0
libtpu: 0.0.40
codegen_flags: <defaults>
</compile_context>

<pallas_src>
import math
import functools

import jax
import jax.numpy as jnp
from jax import lax
from jax.experimental import pallas as pl
from jax.experimental.pallas import tpu as pltpu


# ----------------------------- Pallas kernel -----------------------------

def _fused_mlp_kernel(x_ref, *refs, num_layers, mxu_dtype, precision):
    """refs = (w0, b0, w1, b1, ..., w_{L-1}, b_{L-1}, out_ref). One (tm, :) row block."""
    o_ref = refs[-1]
    h = x_ref[...].astype(mxu_dtype)                               # (tm, K_pad)
    for i in range(num_layers):
        w_ref = refs[2 * i]
        b_ref = refs[2 * i + 1]
        # MXU matmul with f32 accumulation. Weights are stored in mxu_dtype
        # (bf16 by default). precision=HIGHEST only on the f32-fidelity path.
        h = jnp.dot(h, w_ref[...], preferred_element_type=jnp.float32,
                    precision=precision)
        h = h + b_ref[...]                                         # (1, N) f32 bias, broadcast
        if i < num_layers - 1:
            h = jnp.maximum(h, 0.0).astype(mxu_dtype)              # ReLU on hidden layers
    o_ref[...] = h.astype(o_ref.dtype)


# ----------------------------- hardware / tiling heuristics -----------------------------

def _hw_config():
    """Return (vmem_budget_bytes, vmem_limit_bytes, min_grid_steps) for the local TPU gen."""
    vmem_phys = None
    try:
        vmem_phys = int(pltpu.get_tpu_info().vmem_capacity_bytes)
    except Exception:
        pass
    kind = ""
    try:
        kind = jax.devices()[0].device_kind.lower()
    except Exception:
        pass
    is_v7 = ("v7" in kind) or (vmem_phys is not None and vmem_phys <= (64 << 20))
    if is_v7:
        # v7x: 64 MiB VMEM/TC, 2 TCs/chip -> modest limit, >=4 row blocks for megacore.
        vmem_limit = 48 << 20
        min_steps = 4
    else:
        # v5e/v6e: 128 MiB physical, 1 TC -> use most of it, no megacore constraint.
        vmem_limit = 96 << 20
        min_steps = 1
    if vmem_phys is not None:
        vmem_limit = min(vmem_limit, (vmem_phys * 3) // 4)
    vmem_budget = (vmem_limit * 3) // 4            # headroom for compiler scratch / spills
    return vmem_budget, vmem_limit, min_steps


def _pick_block_rows(M, k_pad, out_dims, requested, vmem_budget, min_steps,
                     row_granule, w_bpe, o_bpe):
    """Largest row block fitting the VMEM budget (lane/sublane-padded accounting),
    capped so the v7x megacore still gets >= min_steps grid steps."""
    lanes = lambda n: ((n + 127) // 128) * 128
    subl = lambda n, g: ((n + g - 1) // g) * g
    w_granule = 16 if w_bpe == 2 else 8

    # Resident weights/biases: constant index_map, but still double-buffered (2x).
    dims = [k_pad] + list(out_dims)
    static = 0
    for i in range(len(out_dims)):
        static += 2 * w_bpe * subl(dims[i], w_granule) * lanes(dims[i + 1])   # weight
        static += 2 * 4 * 8 * lanes(dims[i + 1])                              # bias (1, N)

    # Per-row bytes: lane-padded input tile + output tile (both double-buffered),
    # plus single-buffered intermediate activations (f32 accum + mxu-dtype copies).
    per_row = (2 * 4 * lanes(k_pad)
               + 2 * o_bpe * lanes(out_dims[-1])
               + 4 * sum(lanes(d) for d in out_dims)
               + w_bpe * sum(lanes(d) for d in out_dims[:-1]))

    avail = max(vmem_budget - static, row_granule * per_row)
    tm = min(int(requested), int(avail // per_row), M)
    if min_steps > 1:                              # v7x: let megacore shard the row grid
        tm = min(tm, pl.cdiv(M, min_steps))
    if tm < M:
        tm = max(row_granule, (tm // row_granule) * row_granule)
    return min(tm, M)


# ----------------------------- wrapper -----------------------------

def nn_embedding_forward(x, layers, *, block_rows=1024,
                         mxu_dtype=jnp.bfloat16, out_dtype=jnp.bfloat16):
    """NeuralNetworkEmbedding.forward.

    x: (B, S, input_dim) float; layers: list of (w, b), w: (fan_in, fan_out).
    ReLU after every layer except the last (matches the PyTorch Sequential).
    """
    B, S, F = x.shape
    M = B * S
    num_layers = len(layers)
    out_dims = [w.shape[1] for w, _ in layers]
    out_dim = out_dims[-1]

    # Layer-0 contraction is tiny (input_dim = 4): zero-pad K to the 8-sublane
    # granule and run it on the MXU (which idles during layer 0 anyway) instead
    # of per-k lane broadcasts that would saturate the XLU at large tm.
    k_pad = max(8, ((F + 7) // 8) * 8)
    x2 = x.reshape(M, F).astype(jnp.float32)
    if k_pad != F:
        x2 = jnp.pad(x2, ((0, 0), (0, k_pad - F)))

    f32_fidelity = jnp.dtype(mxu_dtype) == jnp.dtype(jnp.float32)
    precision = lax.Precision.HIGHEST if f32_fidelity else None

    vmem_budget, vmem_limit, min_steps = _hw_config()
    bf16_involved = (jnp.dtype(mxu_dtype) == jnp.dtype(jnp.bfloat16)
                     or jnp.dtype(out_dtype) == jnp.dtype(jnp.bfloat16))
    row_granule = 16 if bf16_involved else 8
    w_bpe = jnp.dtype(mxu_dtype).itemsize
    o_bpe = jnp.dtype(out_dtype).itemsize
    tm = _pick_block_rows(M, k_pad, out_dims, block_rows, vmem_budget,
                          min_steps, row_granule, w_bpe, o_bpe)
    grid = (pl.cdiv(M, tm),)

    in_specs = [pl.BlockSpec((tm, k_pad), lambda i: (i, 0))]
    flat_args = [x2]
    for li, (w, b) in enumerate(layers):
        w_a = jnp.asarray(w, jnp.float32)
        if li == 0 and k_pad != F:
            w_a = jnp.pad(w_a, ((0, k_pad - F), (0, 0)))          # zero rows -> no-op math
        w_a = w_a.astype(mxu_dtype)
        b_a = jnp.asarray(b, jnp.float32).reshape(1, -1)
        # Constant index_map => VMEM-resident across all row blocks (no re-DMA).
        in_specs.append(pl.BlockSpec(w_a.shape, lambda i: (0, 0)))
        in_specs.append(pl.BlockSpec(b_a.shape, lambda i: (0, 0)))
        flat_args.extend([w_a, b_a])

    dims = [F] + out_dims
    flops = 2 * M * sum(dims[i] * dims[i + 1] for i in range(num_layers))
    bytes_accessed = (x2.size * 4
                      + sum(int(a.size) * a.dtype.itemsize for a in flat_args[1:])
                      + M * out_dim * o_bpe)
    cost = pl.CostEstimate(flops=flops, transcendentals=0,
                           bytes_accessed=bytes_accessed)

    out = pl.pallas_call(
        functools.partial(_fused_mlp_kernel, num_layers=num_layers,
                          mxu_dtype=mxu_dtype, precision=precision),
        grid=grid,
        in_specs=in_specs,
        out_specs=pl.BlockSpec((tm, out_dim), lambda i: (i, 0)),
        out_shape=jax.ShapeDtypeStruct((M, out_dim), out_dtype),
        compiler_params=pltpu.CompilerParams(
            dimension_semantics=("parallel",),       # megacore-shard rows on v7x
            vmem_limit_bytes=vmem_limit),
        cost_estimate=cost,
    )(*flat_args)
    return out.reshape(B, S, out_dim)


# ----------------------------- init & reference -----------------------------

def init_mlp_params(key, input_dim, hidden_dims, embedding_dim):
    """Matches PyTorch nn.Linear default init: U(-1/sqrt(fan_in), 1/sqrt(fan_in))."""
    dims = [input_dim] + list(hidden_dims) + [embedding_dim]
    layers = []
    for i in range(len(dims) - 1):
        key, kw, kb = jax.random.split(key, 3)
        bound = 1.0 / math.sqrt(dims[i])
        w = jax.random.uniform(kw, (dims[i], dims[i + 1]), jnp.float32, -bound, bound)
        b = jax.random.uniform(kb, (dims[i + 1],), jnp.float32, -bound, bound)
        layers.append((w, b))
    return layers


def reference_forward(x, layers):
    B, S, F = x.shape
    h = x.reshape(B * S, F).astype(jnp.float32)
    for i, (w, b) in enumerate(layers):
        h = jnp.dot(h, w, precision=lax.Precision.HIGHEST) + b
        if i < len(layers) - 1:
            h = jnp.maximum(h, 0.0)
    return h.reshape(B, S, -1)


# ----------------------------- demo -----------------------------

if __name__ == "__main__":
    key = jax.random.PRNGKey(0)
    B, S = 25, 32                                   # module's batch_size=25; 800 token rows
    input_dim, hidden_dims, embedding_dim = 4, [128, 256], 256

    k_params, k_x = jax.random.split(key)
    layers = init_mlp_params(k_params, input_dim, hidden_dims, embedding_dim)
    x = jax.random.normal(k_x, (B, S, input_dim), jnp.float32)

    y_ref = reference_forward(x, layers)

    # Default fast path: bf16 MXU operands + bf16 output (halves HBM writeback).
    y_bf16 = nn_embedding_forward(x, layers)
    jax.block_until_ready(y_bf16)
    assert y_bf16.shape == (B, S, embedding_dim)
    assert y_bf16.dtype == jnp.bfloat16
    y_bf16_f32 = y_bf16.astype(jnp.float32)
    assert bool(jnp.all(jnp.isfinite(y_bf16_f32)))
    denom = float(jnp.max(jnp.abs(y_ref))) + 1e-9
    assert float(jnp.max(jnp.abs(y_bf16_f32 - y_ref))) / denom < 5e-2

    # f32-fidelity path: f32 operands with Precision.HIGHEST + f32 output.
    y_f32 = nn_embedding_forward(x, layers, mxu_dtype=jnp.float32,
                                 out_dtype=jnp.float32)
    jax.block_until_ready(y_f32)
    assert y_f32.shape == (B, S, embedding_dim)
    assert float(jnp.max(jnp.abs(y_f32 - y_ref))) < 1e-4

    print("KERNEL_OK")
</pallas_src>

<mosaic_0001>
module attributes {stable_mosaic.version = 11 : i64} {
  func.func @_fused_mlp_kernel(%arg0: i32, %arg1: memref<800x8xf32, #tpu.memory_space<vmem>>, %arg2: memref<8x128xbf16, #tpu.memory_space<vmem>>, %arg3: memref<1x128xf32, #tpu.memory_space<vmem>>, %arg4: memref<128x256xbf16, #tpu.memory_space<vmem>>, %arg5: memref<1x256xf32, #tpu.memory_space<vmem>>, %arg6: memref<256x256xbf16, #tpu.memory_space<vmem>>, %arg7: memref<1x256xf32, #tpu.memory_space<vmem>>, %arg8: memref<800x256xbf16, #tpu.memory_space<vmem>>) attributes {dimension_semantics = [#tpu.dimension_semantics<parallel>], iteration_bounds = array<i64: 1>, scalar_prefetch = 0 : i64, scratch_operands = 0 : i64, tpu.core_type = #tpu.core_type<tc>, window_params = [{transform_indices = @transform_0, window_bounds = array<i64: 800, 8>}, {pipeline_mode = #tpu.pipeline_mode<synchronous>, transform_indices = @transform_1, window_bounds = array<i64: 8, 128>}, {pipeline_mode = #tpu.pipeline_mode<synchronous>, transform_indices = @transform_2, window_bounds = array<i64: 1, 128>}, {pipeline_mode = #tpu.pipeline_mode<synchronous>, transform_indices = @transform_3, window_bounds = array<i64: 128, 256>}, {pipeline_mode = #tpu.pipeline_mode<synchronous>, transform_indices = @transform_4, window_bounds = array<i64: 1, 256>}, {pipeline_mode = #tpu.pipeline_mode<synchronous>, transform_indices = @transform_5, window_bounds = array<i64: 256, 256>}, {pipeline_mode = #tpu.pipeline_mode<synchronous>, transform_indices = @transform_6, window_bounds = array<i64: 1, 256>}, {transform_indices = @transform_7, window_bounds = array<i64: 800, 256>}]} {
    %c0 = arith.constant 0 : index
    %c0_0 = arith.constant 0 : index
    %0 = vector.load %arg1[%c0, %c0_0] : memref<800x8xf32, #tpu.memory_space<vmem>>, vector<800x8xf32>
    %1 = arith.truncf %0 : vector<800x8xf32> to vector<800x8xbf16>
    %c0_1 = arith.constant 0 : index
    %c0_2 = arith.constant 0 : index
    %2 = vector.load %arg2[%c0_1, %c0_2] : memref<8x128xbf16, #tpu.memory_space<vmem>>, vector<8x128xbf16>
    %cst = arith.constant dense<0.000000e+00> : vector<800x128xf32>
    %3 = tpu.matmul %1, %2, %cst {dimension_numbers = #tpu.dot_dimension_numbers<[1], [0], [0], [1], [0, 0, 1, 1], [], []>} : vector<800x8xbf16>, vector<8x128xbf16>, vector<800x128xf32> -> vector<800x128xf32>
    %c0_3 = arith.constant 0 : index
    %c0_4 = arith.constant 0 : index
    %4 = vector.load %arg3[%c0_3, %c0_4] : memref<1x128xf32, #tpu.memory_space<vmem>>, vector<1x128xf32>
    %5 = vector.broadcast %4 : vector<1x128xf32> to vector<800x128xf32>
    %6 = arith.addf %3, %5 : vector<800x128xf32>
    %cst_5 = arith.constant 0.000000e+00 : f32
    %7 = vector.broadcast %cst_5 : f32 to vector<800x128xf32>
    %8 = arith.maximumf %6, %7 : vector<800x128xf32>
    %9 = arith.truncf %8 : vector<800x128xf32> to vector<800x128xbf16>
    %c0_6 = arith.constant 0 : index
    %c0_7 = arith.constant 0 : index
    %10 = vector.load %arg4[%c0_6, %c0_7] : memref<128x256xbf16, #tpu.memory_space<vmem>>, vector<128x256xbf16>
    %cst_8 = arith.constant dense<0.000000e+00> : vector<800x256xf32>
    %11 = tpu.matmul %9, %10, %cst_8 {dimension_numbers = #tpu.dot_dimension_numbers<[1], [0], [0], [1], [0, 0, 1, 1], [], []>} : vector<800x128xbf16>, vector<128x256xbf16>, vector<800x256xf32> -> vector<800x256xf32>
    %c0_9 = arith.constant 0 : index
    %c0_10 = arith.constant 0 : index
    %12 = vector.load %arg5[%c0_9, %c0_10] : memref<1x256xf32, #tpu.memory_space<vmem>>, vector<1x256xf32>
    %13 = vector.broadcast %12 : vector<1x256xf32> to vector<800x256xf32>
    %14 = arith.addf %11, %13 : vector<800x256xf32>
    %cst_11 = arith.constant 0.000000e+00 : f32
    %15 = vector.broadcast %cst_11 : f32 to vector<800x256xf32>
    %16 = arith.maximumf %14, %15 : vector<800x256xf32>
    %17 = arith.truncf %16 : vector<800x256xf32> to vector<800x256xbf16>
    %c0_12 = arith.constant 0 : index
    %c0_13 = arith.constant 0 : index
    %18 = vector.load %arg6[%c0_12, %c0_13] : memref<256x256xbf16, #tpu.memory_space<vmem>>, vector<256x256xbf16>
    %cst_14 = arith.constant dense<0.000000e+00> : vector<800x256xf32>
    %19 = tpu.matmul %17, %18, %cst_14 {dimension_numbers = #tpu.dot_dimension_numbers<[1], [0], [0], [1], [0, 0, 1, 1], [], []>} : vector<800x256xbf16>, vector<256x256xbf16>, vector<800x256xf32> -> vector<800x256xf32>
    %c0_15 = arith.constant 0 : index
    %c0_16 = arith.constant 0 : index
    %20 = vector.load %arg7[%c0_15, %c0_16] : memref<1x256xf32, #tpu.memory_space<vmem>>, vector<1x256xf32>
    %21 = vector.broadcast %20 : vector<1x256xf32> to vector<800x256xf32>
    %22 = arith.addf %19, %21 : vector<800x256xf32>
    %23 = arith.truncf %22 : vector<800x256xf32> to vector<800x256xbf16>
    %c0_17 = arith.constant 0 : index
    %c0_18 = arith.constant 0 : index
    %24 = vector.load %arg8[%c0_17, %c0_18] : memref<800x256xbf16, #tpu.memory_space<vmem>>, vector<800x256xbf16>
    tpu.vector_store %arg8[%c0_17, %c0_18], %23 {strides = array<i32>} : memref<800x256xbf16, #tpu.memory_space<vmem>>, vector<800x256xbf16>,
    return
  }
  func.func @transform_0(%arg0: i32) -> (i32, i32) {
    %c0_i32 = arith.constant 0 : i32
    %c0_i32_0 = arith.constant 0 : i32
    return %arg0, %c0_i32 : i32, i32
  }
  func.func @transform_1(%arg0: i32) -> (i32, i32) {
    %c0_i32 = arith.constant 0 : i32
    %c0_i32_0 = arith.constant 0 : i32
    %c0_i32_1 = arith.constant 0 : i32
    return %c0_i32, %c0_i32_0 : i32, i32
  }
  func.func @transform_2(%arg0: i32) -> (i32, i32) {
    %c0_i32 = arith.constant 0 : i32
    %c0_i32_0 = arith.constant 0 : i32
    %c0_i32_1 = arith.constant 0 : i32
    return %c0_i32, %c0_i32_0 : i32, i32
  }
  func.func @transform_3(%arg0: i32) -> (i32, i32) {
    %c0_i32 = arith.constant 0 : i32
    %c0_i32_0 = arith.constant 0 : i32
    %c0_i32_1 = arith.constant 0 : i32
    return %c0_i32, %c0_i32_0 : i32, i32
  }
  func.func @transform_4(%arg0: i32) -> (i32, i32) {
    %c0_i32 = arith.constant 0 : i32
    %c0_i32_0 = arith.constant 0 : i32
    %c0_i32_1 = arith.constant 0 : i32
    return %c0_i32, %c0_i32_0 : i32, i32
  }
  func.func @transform_5(%arg0: i32) -> (i32, i32) {
    %c0_i32 = arith.constant 0 : i32
    %c0_i32_0 = arith.constant 0 : i32
    %c0_i32_1 = arith.constant 0 : i32
    return %c0_i32, %c0_i32_0 : i32, i32
  }
  func.func @transform_6(%arg0: i32) -> (i32, i32) {
    %c0_i32 = arith.constant 0 : i32
    %c0_i32_0 = arith.constant 0 : i32
    %c0_i32_1 = arith.constant 0 : i32
    return %c0_i32, %c0_i32_0 : i32, i32
  }
  func.func @transform_7(%arg0: i32) -> (i32, i32) {
    %c0_i32 = arith.constant 0 : i32
    %c0_i32_0 = arith.constant 0 : i32
    return %arg0, %c0_i32 : i32, i32
  }
}

</mosaic_0001>

<bundles_post_ra>
// kernel: tpu_custom_call.1
= control target key start
LH: loop header
LB: loop body
LE: loop exit
PB: predicated region body
PF: predicated region fallthrough
CT: control target
= control target key end

     0   :  { %vm334_vm0 = vcmask 1043456   ;;  %vm183_vm1 = vcmask 64512   ;;  %s5754_s0 = inlined_call_operand.vmem [shape: f32[800,8], index: 0, kind: input, shape index: {}]   ;;  %s5755_s1 = inlined_call_operand.vmem [shape: bf16[8,128], index: 1, kind: input, shape index: {}]   ;;  %s5756_s2 = inlined_call_operand.vmem [shape: f32[1,128], index: 2, kind: input, shape index: {}]   ;;  %s5757_s3 = inlined_call_operand.vmem [shape: bf16[128,256], index: 3, kind: input, shape index: {}]   ;;  %s5758_s4 = inlined_call_operand.vmem [shape: f32[1,256], index: 4, kind: input, shape index: {}]   ;;  %s5759_s5 = inlined_call_operand.vmem [shape: bf16[256,256], index: 5, kind: input, shape index: {}]   ;;  %s5760_s6 = inlined_call_operand.vmem [shape: f32[1,256], index: 6, kind: input, shape index: {}]   ;;  %s5761_s7 = inlined_call_operand.hbm [shape: bf16[800,256], index: 7, kind: output, shape index: {}]  }
   0x1   :  { %v178_v0 = vld [vmem:[%s5755_s1] sm:$0xf]  ;;  %v29_v2 = vld [vmem:[%s5754_s0 + $0x8] sm:$0xff] }
   0x2   :  { %v28_v1 = vld [vmem:[%s5754_s0] sm:$0xff]  ;;  %v336_v3 = vsel %vm334_vm0, %v178_v0, 0 }
   0x3   :  { %v128_v4 = vpack.c.bf16 %v29_v2, %v28_v1  ;;  %345 = vmatpush.bf16.msra.mxu0 %v336_v3  ;;  %3409 = vmatpush.bf16.msra.mxu3 %v336_v3 }
   0x4   :  { %12 = vsyncpa [#allocation3], 0  ;;  %v30_v5 = vld [vmem:[%s5754_s0 + $0x10] sm:$0xff]  ;;  %v31_v6 = vld [vmem:[%s5754_s0 + $0x18] sm:$0xff]  ;;  %s3107_s20 = sshll.u32 %s5761_s7, 4  ;;  %s3477_s21 = smov 8   ;;  %s3108_s20 = int_to_ptr.hbm [resolvable:$true] %s3107_s20 }
   0x5   :  { %v129_v7 = vpack.c.bf16 %v31_v6, %v30_v5  ;;  %v32_v8 = vld [vmem:[%s5754_s0 + $0x20] sm:$0xff]  ;;  %v33_v9 = vld [vmem:[%s5754_s0 + $0x28] sm:$0xff]  ;;  %v34_v11 = vld [vmem:[%s5754_s0 + $0x30] sm:$0xff] }
   0x6   :  { %3119 = vmatmul.msk.bf16.vlgmr.msra.gmra.mxu0 %vm183_vm1, %v128_v4  ;;  %v130_v10 = vpack.c.bf16 %v33_v9, %v32_v8  ;;  %v35_v12 = vld [vmem:[%s5754_s0 + $0x38] sm:$0xff]  ;;  %v36_v14 = vld [vmem:[%s5754_s0 + $0x40] sm:$0xff]  ;;  %v37_v15 = vld [vmem:[%s5754_s0 + $0x48] sm:$0xff] }
   0x7   :  { %v131_v13 = vpack.c.bf16 %v35_v12, %v34_v11  ;;  %v132_v16 = vpack.c.bf16 %v37_v15, %v36_v14  ;;  %v3227_v17 = vld [vmem:[%s5757_s3 + $0x70] sm:$0xf]  ;;  %v3376_v18 = vld [vmem:[%s5757_s3 + $0x74] sm:$0xf0]  ;;  %v3375_v19 = vld [vmem:[%s5757_s3 + $0x74] sm:$0xf] }
   0x8   :  { %v3228_v20 = vor.u32 %v3376_v18, %v3227_v17  ;;  %v3229_v21 = vld [vmem:[%s5757_s3 + $0x78] sm:$0xf0]  ;;  %v38_v23 = vld [vmem:[%s5754_s0 + $0x50] sm:$0xff]  ;;  %v3219_v26 = vld [vmem:[%s5757_s3 + $0x60] sm:$0xf] }
   0x9   :  { %v3568_v22 = vor.u32 %v3375_v19, %v3229_v21  ;;  %v39_v24 = vld [vmem:[%s5754_s0 + $0x58] sm:$0xff]  ;;  %v3374_v27 = vld [vmem:[%s5757_s3 + $0x64] sm:$0xf0]  ;;  %v3373_v28 = vld [vmem:[%s5757_s3 + $0x64] sm:$0xf] }
   0xa   :  { %849 = vmatpush.bf16.msra.mxu1 %v3228_v20  ;;  %3410 = vmatpush.bf16.msrb.mxu3 %v3228_v20  ;;  %v133_v25 = vpack.c.bf16 %v39_v24, %v38_v23  ;;  %v3220_v29 = vor.u32 %v3374_v27, %v3219_v26  ;;  %v3221_v30 = vld [vmem:[%s5757_s3 + $0x68] sm:$0xf0]  ;;  %v3211_v32 = vld [vmem:[%s5757_s3 + $0x50] sm:$0xf]  ;;  %v3372_v33 = vld [vmem:[%s5757_s3 + $0x54] sm:$0xf0] }
   0xb   :  { %1108 = vmatpush.bf16.msra.mxu2 %v3568_v22  ;;  %v3590_v31 = vor.u32 %v3373_v28, %v3221_v30  ;;  %v3371_v34 = vld [vmem:[%s5757_s3 + $0x54] sm:$0xf]  ;;  %v3212_v35 = vor.u32 %v3372_v33, %v3211_v32  ;;  %v3213_v36 = vld [vmem:[%s5757_s3 + $0x58] sm:$0xf0]  ;;  %v3203_v38 = vld [vmem:[%s5757_s3 + $0x40] sm:$0xf] }
   0xc   :  { %v3605_v37 = vor.u32 %v3371_v34, %v3213_v36  ;;  %v3370_v39 = vld [vmem:[%s5757_s3 + $0x44] sm:$0xf0]  ;;  %v3369_v40 = vld [vmem:[%s5757_s3 + $0x44] sm:$0xf]  ;;  %v3205_v41 = vld [vmem:[%s5757_s3 + $0x48] sm:$0xf0] }
   0xd   :  { %v3204_v42 = vor.u32 %v3370_v39, %v3203_v38  ;;  %v3620_v43 = vor.u32 %v3369_v40, %v3205_v41  ;;  %v40_v44 = vld [vmem:[%s5754_s0 + $0x60] sm:$0xff]  ;;  %v41_v45 = vld [vmem:[%s5754_s0 + $0x68] sm:$0xff]  ;;  %v3195_v46 = vld [vmem:[%s5757_s3 + $0x30] sm:$0xf] }
   0xe   :  { %850 = vmatpush.bf16.msra.mxu1 %v3220_v29  ;;  %3411 = vmatpush.bf16.msrb.mxu3 %v3220_v29  ;;  %v3368_v47 = vld [vmem:[%s5757_s3 + $0x34] sm:$0xf0]  ;;  %v3367_v48 = vld [vmem:[%s5757_s3 + $0x34] sm:$0xf]  ;;  %v3197_v50 = vld [vmem:[%s5757_s3 + $0x38] sm:$0xf0]  ;;  %v134_v51 = vpack.c.bf16 %v41_v45, %v40_v44 }
   0xf   :  { %1109 = vmatpush.bf16.msra.mxu2 %v3590_v31  ;;  %v3196_v49 = vor.u32 %v3368_v47, %v3195_v46  ;;  %v3641_v52 = vor.u32 %v3367_v48, %v3197_v50  ;;  %v3187_v53 = vld [vmem:[%s5757_s3 + $0x20] sm:$0xf]  ;;  %v3366_v54 = vld [vmem:[%s5757_s3 + $0x24] sm:$0xf0]  ;;  %v3365_v55 = vld [vmem:[%s5757_s3 + $0x24] sm:$0xf] }
  0x10   :  { %v3188_v56 = vor.u32 %v3366_v54, %v3187_v53  ;;  %v3189_v57 = vld [vmem:[%s5757_s3 + $0x28] sm:$0xf0]  ;;  %v3179_v59 = vld [vmem:[%s5757_s3 + $0x10] sm:$0xf]  ;;  %v3364_v60 = vld [vmem:[%s5757_s3 + $0x14] sm:$0xf0] }
  0x11   :  { %v3657_v58 = vor.u32 %v3365_v55, %v3189_v57  ;;  %v3363_v61 = vld [vmem:[%s5757_s3 + $0x14] sm:$0xf]  ;;  %v3180_v62 = vor.u32 %v3364_v60, %v3179_v59  ;;  %v3181_v63 = vld [vmem:[%s5757_s3 + $0x18] sm:$0xf0]  ;;  %v3171_v1 = vld [vmem:[%s5757_s3] sm:$0xf] }
  0x12   :  { %851 = vmatpush.bf16.msra.mxu1 %v3212_v35  ;;  %3412 = vmatpush.bf16.msrb.mxu3 %v3212_v35  ;;  %v3672_v0 = vor.u32 %v3363_v61, %v3181_v63  ;;  %v3362_v2 = vld [vmem:[%s5757_s3 + $0x4] sm:$0xf0]  ;;  %v3361_v3 = vld [vmem:[%s5757_s3 + $0x4] sm:$0xf]  ;;  %v3173_v5 = vld [vmem:[%s5757_s3 + $0x8] sm:$0xf0] }
  0x13   :  { %1110 = vmatpush.bf16.msra.mxu2 %v3605_v37  ;;  %v3172_v4 = vor.u32 %v3362_v2, %v3171_v1  ;;  %v3687_v6 = vor.u32 %v3361_v3, %v3173_v5  ;;  %v43_v8 = vld [vmem:[%s5754_s0 + $0x78] sm:$0xff]  ;;  %v45_v11 = vld [vmem:[%s5754_s0 + $0x88] sm:$0xff]  ;;  %v3706_v14 = vld [vmem:[%s5756_s2] ss:$0 sm:$0xff] }
  0x14   :  { %v46_v20 = vld [vmem:[%s5754_s0 + $0x90] sm:$0xff]  ;;  %v47_v21 = vld [vmem:[%s5754_s0 + $0x98] sm:$0xff]  ;;  %v48_v32 = vld [vmem:[%s5754_s0 + $0xa0] sm:$0xff] }
  0x15   :  { %v137_v24 = vpack.c.bf16 %v47_v21, %v46_v20  ;;  %v49_v33 = vld [vmem:[%s5754_s0 + $0xa8] sm:$0xff]  ;;  %v50_v44 = vld [vmem:[%s5754_s0 + $0xb0] sm:$0xff]  ;;  %v51_v45 = vld [vmem:[%s5754_s0 + $0xb8] sm:$0xff] }
  0x16   :  { %3120 = vmatmul.msk.bf16.gmra.mxu0 %vm183_vm1, %v129_v7  ;;  %852 = vmatpush.bf16.msra.mxu1 %v3204_v42  ;;  %v42_v7 = vld [vmem:[%s5754_s0 + $0x70] sm:$0xff]  ;;  %v138_v35 = vpack.c.bf16 %v49_v33, %v48_v32  ;;  %v139_v47 = vpack.c.bf16 %v51_v45, %v50_v44  ;;  %v52_v55 = vld [vmem:[%s5754_s0 + $0xc0] sm:$0xff] }
  0x17   :  { %3413 = vmatpush.bf16.msrb.mxu3 %v3204_v42  ;;  %1111 = vmatpush.bf16.msra.mxu2 %v3620_v43  ;;  %v135_v9 = vpack.c.bf16 %v43_v8, %v42_v7  ;;  %v54_v3 = vld [vmem:[%s5754_s0 + $0xd0] sm:$0xff] }
  0x1a   :  { %853 = vmatpush.bf16.msra.mxu1 %v3196_v49 }
  0x1b   :  { %3414 = vmatpush.bf16.msrb.mxu3 %v3196_v49  ;;  %1112 = vmatpush.bf16.msra.mxu2 %v3641_v52 }
  0x1e   :  { %854 = vmatpush.bf16.msra.mxu1 %v3188_v56 }
  0x1f   :  { %3415 = vmatpush.bf16.msrb.mxu3 %v3188_v56  ;;  %1113 = vmatpush.bf16.msra.mxu2 %v3657_v58  ;;  %v53_v56 = vld [vmem:[%s5754_s0 + $0xc8] sm:$0xff] }
  0x20   :  { %v140_v59 = vpack.c.bf16 %v53_v56, %v52_v55 }
  0x22   :  { %855 = vmatpush.bf16.msra.mxu1 %v3180_v62 }
  0x23   :  { %3416 = vmatpush.bf16.msrb.mxu3 %v3180_v62  ;;  %1114 = vmatpush.bf16.msra.mxu2 %v3672_v0 }
  0x26   :  { %3121 = vmatmul.msk.bf16.gmra.mxu0 %vm183_vm1, %v130_v10  ;;  %856 = vmatpush.bf16.msra.mxu1 %v3172_v4  ;;  %v44_v10 = vld [vmem:[%s5754_s0 + $0x80] sm:$0xff] }
  0x27   :  { %3417 = vmatpush.bf16.msrb.mxu3 %v3172_v4  ;;  %1115 = vmatpush.bf16.msra.mxu2 %v3687_v6  ;;  %v136_v12 = vpack.c.bf16 %v45_v11, %v44_v10  ;;  %v55_v4 = vld [vmem:[%s5754_s0 + $0xd8] sm:$0xff] }
  0x28   :  { %v141_v7 = vpack.c.bf16 %v55_v4, %v54_v3 }
  0x36   :  { %3122 = vmatmul.msk.bf16.gmra.mxu0 %vm183_vm1, %v131_v13 }
  0x46   :  { %3123 = vmatmul.msk.bf16.gmra.mxu0 %vm183_vm1, %v132_v16 }
  0x56   :  { %3124 = vmatmul.msk.bf16.gmra.mxu0 %vm183_vm1, %v133_v25 }
  0x66   :  { %3125 = vmatmul.msk.bf16.gmra.mxu0 %vm183_vm1, %v134_v51 }
  0x76   :  { %3126 = vmatmul.msk.bf16.gmra.mxu0 %vm183_vm1, %v135_v9 }
  0x83   :  { %v347_v13 = vpop.f32.mrf.mxu0 }
  0x84   :  { %v348_v15 = vadd.f32 %v3706_v14, %v347_v13 }
  0x86   :  { %3127 = vmatmul.msk.bf16.gmra.mxu0 %vm183_vm1, %v136_v12  ;;  %v597_v18 = vmax.f32 %v348_v15, 0.0  ;;  %v56_v15 = vld [vmem:[%s5754_s0 + $0xe0] sm:$0xff] }
  0x8b   :  { %v349_v16 = vpop.f32.mrf.mxu0 }
  0x8c   :  { %v350_v17 = vadd.f32 %v3706_v14, %v349_v16  ;;  %v57_v16 = vld [vmem:[%s5754_s0 + $0xe8] sm:$0xff] }
  0x8e   :  { %v598_v19 = vmax.f32 %v350_v17, 0.0 }
  0x90   :  { %v697_v23 = vpack.c.bf16 %v598_v19, %v597_v18  ;;  %v142_v18 = vpack.c.bf16 %v57_v16, %v56_v15  ;;  %v64_v15 = vld [vmem:[%s5754_s0 + $0x120] sm:$0xff]  ;;  %v65_v16 = vld [vmem:[%s5754_s0 + $0x128] sm:$0xff] }
  0x92   :  { %857 = vmatmul.bf16.vlgmr.msra.gmra.mxu1 %v697_v23  ;;  %1116 = vmatmul.bf16.vlgmr.msra.gmra.mxu2 %v697_v23 }
  0x93   :  { %v352_v25 = vpop.f32.mrf.mxu0 }
  0x94   :  { %v353_v26 = vadd.f32 %v3706_v14, %v352_v25 }
  0x96   :  { %3128 = vmatmul.msk.bf16.gmra.mxu0 %vm183_vm1, %v137_v24  ;;  %v599_v29 = vmax.f32 %v353_v26, 0.0  ;;  %v58_v26 = vld [vmem:[%s5754_s0 + $0xf0] sm:$0xff] }
  0x9b   :  { %v354_v27 = vpop.f32.mrf.mxu0 }
  0x9c   :  { %v355_v28 = vadd.f32 %v3706_v14, %v354_v27  ;;  %v59_v27 = vld [vmem:[%s5754_s0 + $0xf8] sm:$0xff] }
  0x9e   :  { %v600_v30 = vmax.f32 %v355_v28, 0.0 }
  0xa0   :  { %v698_v34 = vpack.c.bf16 %v600_v30, %v599_v29  ;;  %v143_v29 = vpack.c.bf16 %v59_v27, %v58_v26 }
  0xa2   :  { %862 = vmatmul.bf16.gmra.mxu1 %v698_v34  ;;  %1121 = vmatmul.bf16.gmra.mxu2 %v698_v34 }
  0xa3   :  { %v357_v36 = vpop.f32.mrf.mxu0 }
  0xa4   :  { %v358_v38 = vadd.f32 %v3706_v14, %v357_v36 }
  0xa6   :  { %3129 = vmatmul.msk.bf16.gmra.mxu0 %vm183_vm1, %v138_v35  ;;  %v601_v41 = vmax.f32 %v358_v38, 0.0  ;;  %v60_v38 = vld [vmem:[%s5754_s0 + $0x100] sm:$0xff] }
  0xab   :  { %v359_v39 = vpop.f32.mrf.mxu0 }
  0xac   :  { %v360_v40 = vadd.f32 %v3706_v14, %v359_v39  ;;  %v61_v39 = vld [vmem:[%s5754_s0 + $0x108] sm:$0xff] }
  0xae   :  { %v602_v42 = vmax.f32 %v360_v40, 0.0 }
  0xb0   :  { %v699_v46 = vpack.c.bf16 %v602_v42, %v601_v41  ;;  %v144_v41 = vpack.c.bf16 %v61_v39, %v60_v38 }
  0xb2   :  { %867 = vmatmul.bf16.gmra.mxu1 %v699_v46  ;;  %1126 = vmatmul.bf16.gmra.mxu2 %v699_v46 }
  0xb3   :  { %v362_v48 = vpop.f32.mrf.mxu0 }
  0xb4   :  { %v363_v49 = vadd.f32 %v3706_v14, %v362_v48 }
  0xb6   :  { %3130 = vmatmul.msk.bf16.gmra.mxu0 %vm183_vm1, %v139_v47  ;;  %v603_v53 = vmax.f32 %v363_v49, 0.0  ;;  %v763_v49 = vld [vmem:[%s5758_s4] sm:$0x3] }
  0xb7   :  { %v3792_v55 = vperm.slane %v763_v49, 0 }
  0xbb   :  { %v364_v50 = vpop.f32.mrf.mxu0 }
  0xbc   :  { %v365_v51 = vadd.f32 %v3706_v14, %v364_v50 }
  0xbe   :  { %v604_v54 = vmax.f32 %v365_v51, 0.0  ;;  %v62_v51 = vld [vmem:[%s5754_s0 + $0x110] sm:$0xff] }
  0xc0   :  { %v700_v57 = vpack.c.bf16 %v604_v54, %v603_v53  ;;  %v63_v53 = vld [vmem:[%s5754_s0 + $0x118] sm:$0xff] }
  0xc1   :  { %v145_v56 = vpack.c.bf16 %v63_v53, %v62_v51 }
  0xc2   :  { %872 = vmatmul.bf16.gmra.mxu1 %v700_v57  ;;  %1131 = vmatmul.bf16.gmra.mxu2 %v700_v57 }
  0xc3   :  { %v367_v60 = vpop.f32.mrf.mxu0 }
  0xc4   :  { %v368_v61 = vadd.f32 %v3706_v14, %v367_v60 }
  0xc6   :  { %3131 = vmatmul.msk.bf16.gmra.mxu0 %vm183_vm1, %v140_v59  ;;  %v605_v1 = vmax.f32 %v368_v61, 0.0 }
  0xcb   :  { %v369_v62 = vpop.f32.mrf.mxu0 }
  0xcc   :  { %v370_v63 = vadd.f32 %v3706_v14, %v369_v62  ;;  %v3796_v62 = vperm.slane %v763_v49, 1 }
  0xce   :  { %v606_v2 = vmax.f32 %v370_v63, 0.0 }
  0xd0   :  { %v701_v5 = vpack.c.bf16 %v606_v2, %v605_v1 }
  0xd2   :  { %877 = vmatmul.bf16.gmra.mxu1 %v701_v5  ;;  %1136 = vmatmul.bf16.gmra.mxu2 %v701_v5 }
  0xd3   :  { %v372_v8 = vpop.f32.mrf.mxu0 }
  0xd4   :  { %v373_v9 = vadd.f32 %v3706_v14, %v372_v8 }
  0xd6   :  { %3132 = vmatmul.msk.bf16.gmra.mxu0 %vm183_vm1, %v141_v7  ;;  %v607_v12 = vmax.f32 %v373_v9, 0.0 }
  0xdb   :  { %v374_v10 = vpop.f32.mrf.mxu0 }
  0xdc   :  { %v375_v11 = vadd.f32 %v3706_v14, %v374_v10 }
  0xde   :  { %v608_v13 = vmax.f32 %v375_v11, 0.0 }
  0xe0   :  { %v702_v17 = vpack.c.bf16 %v608_v13, %v607_v12 }
  0xe2   :  { %882 = vmatmul.bf16.gmra.mxu1 %v702_v17  ;;  %1141 = vmatmul.bf16.gmra.mxu2 %v702_v17 }
  0xe3   :  { %v377_v19 = vpop.f32.mrf.mxu0 }
  0xe4   :  { %v378_v20 = vadd.f32 %v3706_v14, %v377_v19 }
  0xe6   :  { %3133 = vmatmul.msk.bf16.gmra.mxu0 %vm183_vm1, %v142_v18  ;;  %v609_v24 = vmax.f32 %v378_v20, 0.0 }
  0xeb   :  { %v379_v21 = vpop.f32.mrf.mxu0 }
  0xec   :  { %v380_v23 = vadd.f32 %v3706_v14, %v379_v21  ;;  %v146_v21 = vpack.c.bf16 %v65_v16, %v64_v15 }
  0xee   :  { %v610_v25 = vmax.f32 %v380_v23, 0.0 }
  0xf0   :  { %v703_v28 = vpack.c.bf16 %v610_v25, %v609_v24 }
  0xf2   :  { %887 = vmatmul.bf16.gmra.mxu1 %v703_v28  ;;  %1146 = vmatmul.bf16.gmra.mxu2 %v703_v28 }
  0xf3   :  { %v382_v30 = vpop.f32.mrf.mxu0 }
  0xf4   :  { %v383_v32 = vadd.f32 %v3706_v14, %v382_v30 }
  0xf6   :  { %3134 = vmatmul.msk.bf16.gmra.mxu0 %vm183_vm1, %v143_v29  ;;  %v611_v35 = vmax.f32 %v383_v32, 0.0 }
  0xfb   :  { %v384_v33 = vpop.f32.mrf.mxu0 }
  0xfc   :  { %v385_v34 = vadd.f32 %v3706_v14, %v384_v33 }
  0xfe   :  { %v612_v36 = vmax.f32 %v385_v34, 0.0 }
 0x100   :  { %v704_v40 = vpack.c.bf16 %v612_v36, %v611_v35 }
 0x102   :  { %892 = vmatmul.bf16.gmra.mxu1 %v704_v40  ;;  %1151 = vmatmul.bf16.gmra.mxu2 %v704_v40 }
 0x103   :  { %v387_v42 = vpop.f32.mrf.mxu0 }
 0x104   :  { %v388_v44 = vadd.f32 %v3706_v14, %v387_v42  ;;  %v66_v42 = vld [vmem:[%s5754_s0 + $0x130] sm:$0xff] }
 0x106   :  { %3135 = vmatmul.msk.bf16.gmra.mxu0 %vm183_vm1, %v144_v41  ;;  %v613_v47 = vmax.f32 %v388_v44, 0.0  ;;  %v67_v44 = vld [vmem:[%s5754_s0 + $0x138] sm:$0xff] }
 0x10b   :  { %v389_v45 = vpop.f32.mrf.mxu0 }
 0x10c   :  { %v390_v46 = vadd.f32 %v3706_v14, %v389_v45 }
 0x10e   :  { %v614_v48 = vmax.f32 %v390_v46, 0.0 }
 0x10f   :  { %v858_v50 = vpop.f32.mrf.mxu1 }
 0x110   :  { %v705_v54 = vpack.c.bf16 %v614_v48, %v613_v47  ;;  %v859_v60 = vadd.f32 %v858_v50, %v3792_v55  ;;  %v147_v48 = vpack.c.bf16 %v67_v44, %v66_v42 }
 0x112   :  { %897 = vmatmul.bf16.gmra.mxu1 %v705_v54  ;;  %1156 = vmatmul.bf16.gmra.mxu2 %v705_v54  ;;  %v1367_v1 = vmax.f32 %v859_v60, 0.0 }
 0x113   :  { %v392_v57 = vpop.f32.mrf.mxu0 }
 0x114   :  { %v393_v2 = vadd.f32 %v3706_v14, %v392_v57 }
 0x115   :  { %v1117_v59 = vpop.f32.mrf.mxu2 }
 0x116   :  { %3136 = vmatmul.msk.bf16.gmra.mxu0 %vm183_vm1, %v145_v56  ;;  %v1118_v5 = vadd.f32 %v1117_v59, %v3796_v62  ;;  %v615_v10 = vmax.f32 %v393_v2, 0.0 }
 0x117   :  { %v860_v61 = vpop.f32.mrf.mxu1 }
 0x118   :  { %v861_v63 = vadd.f32 %v860_v61, %v3792_v55  ;;  %v1368_v17 = vmax.f32 %v1118_v5, 0.0 }
 0x11a   :  { %v1369_v3 = vmax.f32 %v861_v63, 0.0 }
 0x11b   :  { %v394_v4 = vpop.f32.mrf.mxu0 }
 0x11c   :  { %v3801_v7 = vpack.c.bf16 %v1369_v3, %v1367_v1  ;;  %v395_v8 = vadd.f32 %v3706_v14, %v394_v4 }
 0x11d   :  { %v1119_v9 = vpop.f32.mrf.mxu2 }
 0x11e   :  { %5829 = vst [vmem:[#allocation5_spill] sm:$0xff] %v3801_v7  ;;  %v616_v11 = vmax.f32 %v395_v8, 0.0  ;;  %v1120_v12 = vadd.f32 %v1119_v9, %v3796_v62 }
 0x11f   :  { %v863_v13 = vpop.f32.mrf.mxu1 }
 0x120   :  { %v1370_v18 = vmax.f32 %v1120_v12, 0.0  ;;  %v706_v19 = vpack.c.bf16 %v616_v11, %v615_v10  ;;  %v864_v25 = vadd.f32 %v863_v13, %v3792_v55  ;;  %v68_v10 = vld [vmem:[%s5754_s0 + $0x140] sm:$0xff]  ;;  %v69_v11 = vld [vmem:[%s5754_s0 + $0x148] sm:$0xff] }
 0x121   :  { %v148_v16 = vpack.c.bf16 %v69_v11, %v68_v10  ;;  %v72_v10 = vld [vmem:[%s5754_s0 + $0x160] sm:$0xff]  ;;  %v73_v11 = vld [vmem:[%s5754_s0 + $0x168] sm:$0xff] }
 0x122   :  { %v3811_v20 = vpack.c.bf16 %v1370_v18, %v1368_v17  ;;  %902 = vmatmul.bf16.gmra.mxu1 %v706_v19  ;;  %1161 = vmatmul.bf16.gmra.mxu2 %v706_v19  ;;  %v1371_v28 = vmax.f32 %v864_v25, 0.0 }
 0x123   :  { %v397_v23 = vpop.f32.mrf.mxu0 }
 0x124   :  { %v398_v29 = vadd.f32 %v3706_v14, %v397_v23 }
 0x125   :  { %v1122_v24 = vpop.f32.mrf.mxu2 }
 0x126   :  { %3137 = vmatmul.msk.bf16.gmra.mxu0 %vm183_vm1, %v146_v21  ;;  %v1123_v33 = vadd.f32 %v1122_v24, %v3796_v62  ;;  %v617_v38 = vmax.f32 %v398_v29, 0.0 }
 0x127   :  { %v865_v26 = vpop.f32.mrf.mxu1 }
 0x128   :  { %v866_v27 = vadd.f32 %v865_v26, %v3792_v55  ;;  %v1372_v45 = vmax.f32 %v1123_v33, 0.0 }
 0x12a   :  { %v1373_v30 = vmax.f32 %v866_v27, 0.0 }
 0x12b   :  { %v399_v32 = vpop.f32.mrf.mxu0 }
 0x12c   :  { %v400_v34 = vadd.f32 %v3706_v14, %v399_v32  ;;  %v3819_v35 = vpack.c.bf16 %v1373_v30, %v1371_v28 }
 0x12d   :  { %v1124_v36 = vpop.f32.mrf.mxu2 }
 0x12e   :  { %v618_v39 = vmax.f32 %v400_v34, 0.0  ;;  %v1125_v40 = vadd.f32 %v1124_v36, %v3796_v62 }
 0x12f   :  { %v868_v41 = vpop.f32.mrf.mxu1 }
 0x130   :  { %v1374_v46 = vmax.f32 %v1125_v40, 0.0  ;;  %v707_v47 = vpack.c.bf16 %v618_v39, %v617_v38  ;;  %v869_v53 = vadd.f32 %v868_v41, %v3792_v55  ;;  %v70_v40 = vld [vmem:[%s5754_s0 + $0x150] sm:$0xff]  ;;  %v71_v41 = vld [vmem:[%s5754_s0 + $0x158] sm:$0xff] }
 0x132   :  { %907 = vmatmul.bf16.gmra.mxu1 %v707_v47  ;;  %1166 = vmatmul.bf16.gmra.mxu2 %v707_v47  ;;  %v3828_v49 = vpack.c.bf16 %v1374_v46, %v1372_v45  ;;  %v1375_v57 = vmax.f32 %v869_v53, 0.0  ;;  %v149_v46 = vpack.c.bf16 %v71_v41, %v70_v40 }
 0x133   :  { %v402_v50 = vpop.f32.mrf.mxu0 }
 0x134   :  { %v403_v59 = vadd.f32 %v3706_v14, %v402_v50 }
 0x135   :  { %v1127_v51 = vpop.f32.mrf.mxu2 }
 0x136   :  { %3138 = vmatmul.msk.bf16.gmra.mxu0 %vm183_vm1, %v147_v48  ;;  %v1128_v63 = vadd.f32 %v1127_v51, %v3796_v62  ;;  %v619_v4 = vmax.f32 %v403_v59, 0.0 }
 0x137   :  { %v870_v54 = vpop.f32.mrf.mxu1 }
 0x138   :  { %v871_v56 = vadd.f32 %v870_v54, %v3792_v55  ;;  %v1376_v12 = vmax.f32 %v1128_v63, 0.0 }
 0x13a   :  { %v1377_v60 = vmax.f32 %v871_v56, 0.0 }
 0x13b   :  { %v404_v61 = vpop.f32.mrf.mxu0 }
 0x13c   :  { %v405_v1 = vadd.f32 %v3706_v14, %v404_v61  ;;  %v3836_v2 = vpack.c.bf16 %v1377_v60, %v1375_v57 }
 0x13d   :  { %v1129_v3 = vpop.f32.mrf.mxu2 }
 0x13e   :  { %5830 = vst [vmem:[#allocation6_spill] sm:$0xff] %v3836_v2  ;;  %v620_v5 = vmax.f32 %v405_v1, 0.0  ;;  %v1130_v8 = vadd.f32 %v1129_v3, %v3796_v62 }
 0x13f   :  { %v873_v9 = vpop.f32.mrf.mxu1 }
 0x140   :  { %v1378_v13 = vmax.f32 %v1130_v8, 0.0  ;;  %v708_v15 = vpack.c.bf16 %v620_v5, %v619_v4  ;;  %v874_v21 = vadd.f32 %v873_v9, %v3792_v55 }
 0x142   :  { %912 = vmatmul.bf16.gmra.mxu1 %v708_v15  ;;  %1171 = vmatmul.bf16.gmra.mxu2 %v708_v15  ;;  %v3845_v17 = vpack.c.bf16 %v1378_v13, %v1376_v12  ;;  %v1379_v25 = vmax.f32 %v874_v21, 0.0 }
 0x143   :  { %v407_v18 = vpop.f32.mrf.mxu0 }
 0x144   :  { %v408_v26 = vadd.f32 %v3706_v14, %v407_v18 }
 0x145   :  { %v1132_v19 = vpop.f32.mrf.mxu2 }
 0x146   :  { %3139 = vmatmul.msk.bf16.gmra.mxu0 %vm183_vm1, %v148_v16  ;;  %v1133_v29 = vadd.f32 %v1132_v19, %v3796_v62  ;;  %v621_v34 = vmax.f32 %v408_v26, 0.0  ;;  %v150_v16 = vpack.c.bf16 %v73_v11, %v72_v10 }
 0x147   :  { %v875_v23 = vpop.f32.mrf.mxu1 }
 0x148   :  { %v876_v24 = vadd.f32 %v875_v23, %v3792_v55  ;;  %v1380_v42 = vmax.f32 %v1133_v29, 0.0 }
 0x14a   :  { %v1381_v27 = vmax.f32 %v876_v24, 0.0 }
 0x14b   :  { %v409_v28 = vpop.f32.mrf.mxu0 }
 0x14c   :  { %v410_v30 = vadd.f32 %v3706_v14, %v409_v28  ;;  %v3853_v32 = vpack.c.bf16 %v1381_v27, %v1379_v25 }
 0x14d   :  { %v1134_v33 = vpop.f32.mrf.mxu2 }
 0x14e   :  { %5831 = vst [vmem:[#allocation7_spill] sm:$0xff] %v3853_v32  ;;  %v622_v36 = vmax.f32 %v410_v30, 0.0  ;;  %v1135_v38 = vadd.f32 %v1134_v33, %v3796_v62 }
 0x14f   :  { %v878_v39 = vpop.f32.mrf.mxu1 }
 0x150   :  { %v1382_v44 = vmax.f32 %v1135_v38, 0.0  ;;  %v709_v45 = vpack.c.bf16 %v622_v36, %v621_v34  ;;  %v879_v51 = vadd.f32 %v878_v39, %v3792_v55 }
 0x152   :  { %917 = vmatmul.bf16.gmra.mxu1 %v709_v45  ;;  %1176 = vmatmul.bf16.gmra.mxu2 %v709_v45  ;;  %v3862_v47 = vpack.c.bf16 %v1382_v44, %v1380_v42  ;;  %v1383_v56 = vmax.f32 %v879_v51, 0.0  ;;  %v74_v42 = vld [vmem:[%s5754_s0 + $0x170] sm:$0xff]  ;;  %v75_v44 = vld [vmem:[%s5754_s0 + $0x178] sm:$0xff] }
 0x153   :  { %v412_v48 = vpop.f32.mrf.mxu0 }
 0x154   :  { %v413_v57 = vadd.f32 %v3706_v14, %v412_v48 }
 0x155   :  { %v1137_v50 = vpop.f32.mrf.mxu2 }
 0x156   :  { %3140 = vmatmul.msk.bf16.gmra.mxu0 %vm183_vm1, %v149_v46  ;;  %v1138_v61 = vadd.f32 %v1137_v50, %v3796_v62  ;;  %v623_v4 = vmax.f32 %v413_v57, 0.0  ;;  %v151_v50 = vpack.c.bf16 %v75_v44, %v74_v42 }
 0x157   :  { %v880_v53 = vpop.f32.mrf.mxu1 }
 0x158   :  { %v881_v54 = vadd.f32 %v880_v53, %v3792_v55  ;;  %v1384_v12 = vmax.f32 %v1138_v61, 0.0 }
 0x15a   :  { %v1385_v59 = vmax.f32 %v881_v54, 0.0 }
 0x15b   :  { %v414_v60 = vpop.f32.mrf.mxu0 }
 0x15c   :  { %v415_v63 = vadd.f32 %v3706_v14, %v414_v60  ;;  %v3870_v1 = vpack.c.bf16 %v1385_v59, %v1383_v56 }
 0x15d   :  { %v1139_v3 = vpop.f32.mrf.mxu2 }
 0x15e   :  { %v624_v5 = vmax.f32 %v415_v63, 0.0  ;;  %v1140_v8 = vadd.f32 %v1139_v3, %v3796_v62 }
 0x15f   :  { %v883_v9 = vpop.f32.mrf.mxu1 }
 0x160   :  { %v1386_v13 = vmax.f32 %v1140_v8, 0.0  ;;  %v710_v15 = vpack.c.bf16 %v624_v5, %v623_v4  ;;  %v884_v23 = vadd.f32 %v883_v9, %v3792_v55 }
 0x162   :  { %922 = vmatmul.bf16.gmra.mxu1 %v710_v15  ;;  %1181 = vmatmul.bf16.gmra.mxu2 %v710_v15  ;;  %v3879_v18 = vpack.c.bf16 %v1386_v13, %v1384_v12  ;;  %v1387_v26 = vmax.f32 %v884_v23, 0.0  ;;  %v76_v15 = vld [vmem:[%s5754_s0 + $0x180] sm:$0xff] }
 0x163   :  { %v417_v19 = vpop.f32.mrf.mxu0 }
 0x164   :  { %v418_v27 = vadd.f32 %v3706_v14, %v417_v19 }
 0x165   :  { %v1142_v21 = vpop.f32.mrf.mxu2 }
 0x166   :  { %3141 = vmatmul.msk.bf16.gmra.mxu0 %vm183_vm1, %v150_v16  ;;  %v1143_v30 = vadd.f32 %v1142_v21, %v3796_v62  ;;  %v625_v38 = vmax.f32 %v418_v27, 0.0  ;;  %v77_v16 = vld [vmem:[%s5754_s0 + $0x188] sm:$0xff] }
 0x167   :  { %v885_v24 = vpop.f32.mrf.mxu1 }
 0x168   :  { %v886_v25 = vadd.f32 %v885_v24, %v3792_v55  ;;  %v1388_v45 = vmax.f32 %v1143_v30, 0.0  ;;  %v152_v24 = vpack.c.bf16 %v77_v16, %v76_v15 }
 0x16a   :  { %v1389_v28 = vmax.f32 %v886_v25, 0.0 }
 0x16b   :  { %v419_v29 = vpop.f32.mrf.mxu0 }
 0x16c   :  { %v420_v33 = vadd.f32 %v3706_v14, %v419_v29  ;;  %v3887_v34 = vpack.c.bf16 %v1389_v28, %v1387_v26 }
 0x16d   :  { %v1144_v36 = vpop.f32.mrf.mxu2 }
 0x16e   :  { %5832 = vst [vmem:[#allocation8_spill] sm:$0xff] %v3887_v34  ;;  %v626_v39 = vmax.f32 %v420_v33, 0.0  ;;  %v1145_v40 = vadd.f32 %v1144_v36, %v3796_v62 }
 0x16f   :  { %v888_v41 = vpop.f32.mrf.mxu1 }
 0x170   :  { %v1390_v46 = vmax.f32 %v1145_v40, 0.0  ;;  %v711_v48 = vpack.c.bf16 %v626_v39, %v625_v38  ;;  %v889_v56 = vadd.f32 %v888_v41, %v3792_v55 }
 0x172   :  { %927 = vmatmul.bf16.gmra.mxu1 %v711_v48  ;;  %1186 = vmatmul.bf16.gmra.mxu2 %v711_v48  ;;  %v3896_v51 = vpack.c.bf16 %v1390_v46, %v1388_v45  ;;  %v1391_v60 = vmax.f32 %v889_v56, 0.0 }
 0x173   :  { %v422_v53 = vpop.f32.mrf.mxu0 }
 0x174   :  { %v423_v61 = vadd.f32 %v3706_v14, %v422_v53  ;;  %v78_v53 = vld [vmem:[%s5754_s0 + $0x190] sm:$0xff] }
 0x175   :  { %v1147_v54 = vpop.f32.mrf.mxu2 }
 0x176   :  { %3142 = vmatmul.msk.bf16.gmra.mxu0 %vm183_vm1, %v151_v50  ;;  %v1148_v4 = vadd.f32 %v1147_v54, %v3796_v62  ;;  %v627_v10 = vmax.f32 %v423_v61, 0.0  ;;  %v79_v54 = vld [vmem:[%s5754_s0 + $0x198] sm:$0xff] }
 0x177   :  { %v890_v57 = vpop.f32.mrf.mxu1 }
 0x178   :  { %v891_v59 = vadd.f32 %v890_v57, %v3792_v55  ;;  %v1392_v19 = vmax.f32 %v1148_v4, 0.0 }
 0x17a   :  { %v1393_v63 = vmax.f32 %v891_v59, 0.0 }
 0x17b   :  { %v424_v3 = vpop.f32.mrf.mxu0 }
 0x17c   :  { %v425_v5 = vadd.f32 %v3706_v14, %v424_v3  ;;  %v3904_v8 = vpack.c.bf16 %v1393_v63, %v1391_v60  ;;  %v153_v60 = vpack.c.bf16 %v79_v54, %v78_v53 }
 0x17d   :  { %v1149_v9 = vpop.f32.mrf.mxu2 }
 0x17e   :  { %v628_v11 = vmax.f32 %v425_v5, 0.0  ;;  %v1150_v12 = vadd.f32 %v1149_v9, %v3796_v62 }
 0x17f   :  { %v893_v13 = vpop.f32.mrf.mxu1 }
 0x180   :  { %v1394_v21 = vmax.f32 %v1150_v12, 0.0  ;;  %v712_v23 = vpack.c.bf16 %v628_v11, %v627_v10  ;;  %v894_v28 = vadd.f32 %v893_v13, %v3792_v55 }
 0x182   :  { %932 = vmatmul.bf16.gmra.mxu1 %v712_v23  ;;  %1191 = vmatmul.bf16.gmra.mxu2 %v712_v23  ;;  %v3913_v25 = vpack.c.bf16 %v1394_v21, %v1392_v19  ;;  %v1395_v33 = vmax.f32 %v894_v28, 0.0  ;;  %v80_v28 = vld [vmem:[%s5754_s0 + $0x1a0] sm:$0xff] }
 0x183   :  { %v427_v26 = vpop.f32.mrf.mxu0 }
 0x184   :  { %v428_v36 = vadd.f32 %v3706_v14, %v427_v26 }
 0x185   :  { %v1152_v27 = vpop.f32.mrf.mxu2 }
 0x186   :  { %3143 = vmatmul.msk.bf16.gmra.mxu0 %vm183_vm1, %v152_v24  ;;  %v1153_v40 = vadd.f32 %v1152_v27, %v3796_v62  ;;  %v629_v45 = vmax.f32 %v428_v36, 0.0 }
 0x187   :  { %v895_v29 = vpop.f32.mrf.mxu1 }
 0x188   :  { %v896_v30 = vadd.f32 %v895_v29, %v3792_v55  ;;  %v1396_v56 = vmax.f32 %v1153_v40, 0.0  ;;  %v81_v29 = vld [vmem:[%s5754_s0 + $0x1a8] sm:$0xff] }
 0x18a   :  { %v1397_v38 = vmax.f32 %v896_v30, 0.0 }
 0x18b   :  { %v429_v39 = vpop.f32.mrf.mxu0 }
 0x18c   :  { %v430_v41 = vadd.f32 %v3706_v14, %v429_v39  ;;  %v3921_v42 = vpack.c.bf16 %v1397_v38, %v1395_v33  ;;  %v154_v38 = vpack.c.bf16 %v81_v29, %v80_v28 }
 0x18d   :  { %v1154_v44 = vpop.f32.mrf.mxu2 }
 0x18e   :  { %v630_v46 = vmax.f32 %v430_v41, 0.0  ;;  %v1155_v48 = vadd.f32 %v1154_v44, %v3796_v62 }
 0x18f   :  { %v898_v50 = vpop.f32.mrf.mxu1 }
 0x190   :  { %v1398_v57 = vmax.f32 %v1155_v48, 0.0  ;;  %v713_v59 = vpack.c.bf16 %v630_v46, %v629_v45  ;;  %v899_v4 = vadd.f32 %v898_v50, %v3792_v55 }
 0x192   :  { %937 = vmatmul.bf16.gmra.mxu1 %v713_v59  ;;  %1196 = vmatmul.bf16.gmra.mxu2 %v713_v59  ;;  %v3930_v61 = vpack.c.bf16 %v1398_v57, %v1396_v56  ;;  %v1399_v10 = vmax.f32 %v899_v4, 0.0 }
 0x193   :  { %v432_v63 = vpop.f32.mrf.mxu0 }
 0x194   :  { %v433_v11 = vadd.f32 %v3706_v14, %v432_v63 }
 0x195   :  { %v1157_v3 = vpop.f32.mrf.mxu2 }
 0x196   :  { %3144 = vmatmul.msk.bf16.gmra.mxu0 %vm183_vm1, %v153_v60  ;;  %v1158_v15 = vadd.f32 %v1157_v3, %v3796_v62  ;;  %v631_v23 = vmax.f32 %v433_v11, 0.0 }
 0x197   :  { %v900_v5 = vpop.f32.mrf.mxu1 }
 0x198   :  { %v901_v9 = vadd.f32 %v900_v5, %v3792_v55  ;;  %v1400_v30 = vmax.f32 %v1158_v15, 0.0 }
 0x19a   :  { %v1401_v12 = vmax.f32 %v901_v9, 0.0  ;;  %v82_v9 = vld [vmem:[%s5754_s0 + $0x1b0] sm:$0xff] }
 0x19b   :  { %v434_v13 = vpop.f32.mrf.mxu0 }
 0x19c   :  { %v435_v16 = vadd.f32 %v3706_v14, %v434_v13  ;;  %v3938_v19 = vpack.c.bf16 %v1401_v12, %v1399_v10  ;;  %v83_v10 = vld [vmem:[%s5754_s0 + $0x1b8] sm:$0xff] }
 0x19d   :  { %v1159_v21 = vpop.f32.mrf.mxu2  ;;  %v155_v15 = vpack.c.bf16 %v83_v10, %v82_v9 }
 0x19e   :  { %v632_v24 = vmax.f32 %v435_v16, 0.0  ;;  %v1160_v26 = vadd.f32 %v1159_v21, %v3796_v62 }
 0x19f   :  { %v903_v27 = vpop.f32.mrf.mxu1 }
 0x1a0   :  { %v1402_v33 = vmax.f32 %v1160_v26, 0.0  ;;  %v714_v36 = vpack.c.bf16 %v632_v24, %v631_v23  ;;  %v904_v44 = vadd.f32 %v903_v27, %v3792_v55 }
 0x1a2   :  { %942 = vmatmul.bf16.gmra.mxu1 %v714_v36  ;;  %1201 = vmatmul.bf16.gmra.mxu2 %v714_v36  ;;  %v3947_v39 = vpack.c.bf16 %v1402_v33, %v1400_v30  ;;  %v1403_v48 = vmax.f32 %v904_v44, 0.0 }
 0x1a3   :  { %v437_v40 = vpop.f32.mrf.mxu0 }
 0x1a4   :  { %v438_v50 = vadd.f32 %v3706_v14, %v437_v40 }
 0x1a5   :  { %v1162_v41 = vpop.f32.mrf.mxu2 }
 0x1a6   :  { %3145 = vmatmul.msk.bf16.gmra.mxu0 %vm183_vm1, %v154_v38  ;;  %v1163_v56 = vadd.f32 %v1162_v41, %v3796_v62  ;;  %v633_v63 = vmax.f32 %v438_v50, 0.0  ;;  %v84_v50 = vld [vmem:[%s5754_s0 + $0x1c0] sm:$0xff] }
 0x1a7   :  { %v905_v45 = vpop.f32.mrf.mxu1 }
 0x1a8   :  { %v906_v46 = vadd.f32 %v905_v45, %v3792_v55  ;;  %v1404_v11 = vmax.f32 %v1163_v56, 0.0 }
 0x1aa   :  { %v1405_v53 = vmax.f32 %v906_v46, 0.0 }
 0x1ab   :  { %v439_v54 = vpop.f32.mrf.mxu0 }
 0x1ac   :  { %v440_v57 = vadd.f32 %v3706_v14, %v439_v54  ;;  %v3955_v59 = vpack.c.bf16 %v1405_v53, %v1403_v48  ;;  %v85_v53 = vld [vmem:[%s5754_s0 + $0x1c8] sm:$0xff] }
 0x1ad   :  { %v1164_v60 = vpop.f32.mrf.mxu2 }
 0x1ae   :  { %v634_v3 = vmax.f32 %v440_v57, 0.0  ;;  %v1165_v4 = vadd.f32 %v1164_v60, %v3796_v62  ;;  %v156_v60 = vpack.c.bf16 %v85_v53, %v84_v50 }
 0x1af   :  { %v908_v5 = vpop.f32.mrf.mxu1 }
 0x1b0   :  { %v1406_v12 = vmax.f32 %v1165_v4, 0.0  ;;  %v715_v13 = vpack.c.bf16 %v634_v3, %v633_v63  ;;  %v909_v24 = vadd.f32 %v908_v5, %v3792_v55 }
 0x1b2   :  { %947 = vmatmul.bf16.gmra.mxu1 %v715_v13  ;;  %1206 = vmatmul.bf16.gmra.mxu2 %v715_v13  ;;  %v3964_v16 = vpack.c.bf16 %v1406_v12, %v1404_v11  ;;  %v1407_v28 = vmax.f32 %v909_v24, 0.0 }
 0x1b3   :  { %v442_v21 = vpop.f32.mrf.mxu0 }
 0x1b4   :  { %v443_v29 = vadd.f32 %v3706_v14, %v442_v21 }
 0x1b5   :  { %v1167_v23 = vpop.f32.mrf.mxu2 }
 0x1b6   :  { %3146 = vmatmul.msk.bf16.gmra.mxu0 %vm183_vm1, %v155_v15  ;;  %v1168_v36 = vadd.f32 %v1167_v23, %v3796_v62  ;;  %v635_v44 = vmax.f32 %v443_v29, 0.0 }
 0x1b7   :  { %v910_v26 = vpop.f32.mrf.mxu1 }
 0x1b8   :  { %v911_v27 = vadd.f32 %v910_v26, %v3792_v55  ;;  %v1408_v54 = vmax.f32 %v1168_v36, 0.0  ;;  %v87_v36 = vld [vmem:[%s5754_s0 + $0x1d8] sm:$0xff] }
 0x1ba   :  { %v1409_v30 = vmax.f32 %v911_v27, 0.0 }
 0x1bb   :  { %v444_v33 = vpop.f32.mrf.mxu0 }
 0x1bc   :  { %v445_v38 = vadd.f32 %v3706_v14, %v444_v33  ;;  %v3972_v40 = vpack.c.bf16 %v1409_v30, %v1407_v28  ;;  %v86_v33 = vld [vmem:[%s5754_s0 + $0x1d0] sm:$0xff] }
 0x1bd   :  { %v1169_v41 = vpop.f32.mrf.mxu2 }
 0x1be   :  { %v636_v45 = vmax.f32 %v445_v38, 0.0  ;;  %v1170_v46 = vadd.f32 %v1169_v41, %v3796_v62 }
 0x1bf   :  { %v913_v48 = vpop.f32.mrf.mxu1 }
 0x1c0   :  { %v1410_v56 = vmax.f32 %v1170_v46, 0.0  ;;  %v716_v57 = vpack.c.bf16 %v636_v45, %v635_v44  ;;  %v914_v5 = vadd.f32 %v913_v48, %v3792_v55  ;;  %v157_v45 = vpack.c.bf16 %v87_v36, %v86_v33 }
 0x1c2   :  { %952 = vmatmul.bf16.gmra.mxu1 %v716_v57  ;;  %1211 = vmatmul.bf16.gmra.mxu2 %v716_v57  ;;  %v3981_v63 = vpack.c.bf16 %v1410_v56, %v1408_v54  ;;  %v1411_v11 = vmax.f32 %v914_v5, 0.0 }
 0x1c3   :  { %v447_v3 = vpop.f32.mrf.mxu0 }
 0x1c4   :  { %v448_v12 = vadd.f32 %v3706_v14, %v447_v3 }
 0x1c5   :  { %v1172_v4 = vpop.f32.mrf.mxu2 }
 0x1c6   :  { %3147 = vmatmul.msk.bf16.gmra.mxu0 %vm183_vm1, %v156_v60  ;;  %v1173_v21 = vadd.f32 %v1172_v4, %v3796_v62  ;;  %v637_v27 = vmax.f32 %v448_v12, 0.0 }
 0x1c7   :  { %v915_v9 = vpop.f32.mrf.mxu1 }
 0x1c8   :  { %v916_v10 = vadd.f32 %v915_v9, %v3792_v55  ;;  %v1412_v38 = vmax.f32 %v1173_v21, 0.0 }
 0x1ca   :  { %v1413_v13 = vmax.f32 %v916_v10, 0.0 }
 0x1cb   :  { %v449_v15 = vpop.f32.mrf.mxu0 }
 0x1cc   :  { %v450_v23 = vadd.f32 %v3706_v14, %v449_v15  ;;  %v3989_v24 = vpack.c.bf16 %v1413_v13, %v1411_v11 }
 0x1cd   :  { %v1174_v26 = vpop.f32.mrf.mxu2 }
 0x1ce   :  { %v638_v28 = vmax.f32 %v450_v23, 0.0  ;;  %v1175_v29 = vadd.f32 %v1174_v26, %v3796_v62  ;;  %v88_v23 = vld [vmem:[%s5754_s0 + $0x1e0] sm:$0xff]  ;;  %v89_v26 = vld [vmem:[%s5754_s0 + $0x1e8] sm:$0xff] }
 0x1cf   :  { %v918_v30 = vpop.f32.mrf.mxu1 }
 0x1d0   :  { %v1414_v41 = vmax.f32 %v1175_v29, 0.0  ;;  %v717_v44 = vpack.c.bf16 %v638_v28, %v637_v27  ;;  %v919_v53 = vadd.f32 %v918_v30, %v3792_v55  ;;  %v158_v30 = vpack.c.bf16 %v89_v26, %v88_v23 }
 0x1d2   :  { %957 = vmatmul.bf16.gmra.mxu1 %v717_v44  ;;  %1216 = vmatmul.bf16.gmra.mxu2 %v717_v44  ;;  %v3998_v46 = vpack.c.bf16 %v1414_v41, %v1412_v38  ;;  %v1415_v57 = vmax.f32 %v919_v53, 0.0 }
 0x1d3   :  { %v452_v48 = vpop.f32.mrf.mxu0 }
 0x1d4   :  { %v453_v60 = vadd.f32 %v3706_v14, %v452_v48 }
 0x1d5   :  { %v1177_v50 = vpop.f32.mrf.mxu2 }
 0x1d6   :  { %3148 = vmatmul.msk.bf16.gmra.mxu0 %vm183_vm1, %v157_v45  ;;  %v1178_v5 = vadd.f32 %v1177_v50, %v3796_v62  ;;  %v639_v12 = vmax.f32 %v453_v60, 0.0 }
 0x1d7   :  { %v920_v54 = vpop.f32.mrf.mxu1 }
 0x1d8   :  { %v921_v56 = vadd.f32 %v920_v54, %v3792_v55  ;;  %v1416_v27 = vmax.f32 %v1178_v5, 0.0 }
 0x1da   :  { %v1417_v3 = vmax.f32 %v921_v56, 0.0 }
 0x1db   :  { %v454_v4 = vpop.f32.mrf.mxu0 }
 0x1dc   :  { %v455_v9 = vadd.f32 %v3706_v14, %v454_v4  ;;  %v4006_v10 = vpack.c.bf16 %v1417_v3, %v1415_v57 }
 0x1dd   :  { %v1179_v11 = vpop.f32.mrf.mxu2 }
 0x1de   :  { %v640_v13 = vmax.f32 %v455_v9, 0.0  ;;  %v1180_v15 = vadd.f32 %v1179_v11, %v3796_v62 }
 0x1df   :  { %v923_v21 = vpop.f32.mrf.mxu1 }
 0x1e0   :  { %v1418_v28 = vmax.f32 %v1180_v15, 0.0  ;;  %v718_v29 = vpack.c.bf16 %v640_v13, %v639_v12  ;;  %v924_v41 = vadd.f32 %v923_v21, %v3792_v55  ;;  %v90_v12 = vld [vmem:[%s5754_s0 + $0x1f0] sm:$0xff]  ;;  %v91_v13 = vld [vmem:[%s5754_s0 + $0x1f8] sm:$0xff] }
 0x1e1   :  { %v159_v26 = vpack.c.bf16 %v91_v13, %v90_v12 }
 0x1e2   :  { %962 = vmatmul.bf16.gmra.mxu1 %v718_v29  ;;  %1221 = vmatmul.bf16.gmra.mxu2 %v718_v29  ;;  %v4015_v33 = vpack.c.bf16 %v1418_v28, %v1416_v27  ;;  %v1419_v48 = vmax.f32 %v924_v41, 0.0 }
 0x1e3   :  { %v457_v36 = vpop.f32.mrf.mxu0 }
 0x1e4   :  { %v458_v50 = vadd.f32 %v3706_v14, %v457_v36 }
 0x1e5   :  { %v1182_v38 = vpop.f32.mrf.mxu2 }
 0x1e6   :  { %3149 = vmatmul.msk.bf16.gmra.mxu0 %vm183_vm1, %v158_v30  ;;  %v1183_v56 = vadd.f32 %v1182_v38, %v3796_v62  ;;  %v641_v4 = vmax.f32 %v458_v50, 0.0 }
 0x1e7   :  { %v925_v44 = vpop.f32.mrf.mxu1 }
 0x1e8   :  { %v926_v45 = vadd.f32 %v925_v44, %v3792_v55  ;;  %v1420_v15 = vmax.f32 %v1183_v56, 0.0 }
 0x1ea   :  { %v1421_v53 = vmax.f32 %v926_v45, 0.0 }
 0x1eb   :  { %v459_v54 = vpop.f32.mrf.mxu0 }
 0x1ec   :  { %v460_v57 = vadd.f32 %v3706_v14, %v459_v54  ;;  %v4023_v60 = vpack.c.bf16 %v1421_v53, %v1419_v48 }
 0x1ed   :  { %v1184_v3 = vpop.f32.mrf.mxu2 }
 0x1ee   :  { %5833 = vst [vmem:[#allocation9_spill] sm:$0xff] %v4023_v60  ;;  %v642_v5 = vmax.f32 %v460_v57, 0.0  ;;  %v1185_v9 = vadd.f32 %v1184_v3, %v3796_v62 }
 0x1ef   :  { %v928_v11 = vpop.f32.mrf.mxu1 }
 0x1f0   :  { %v1422_v21 = vmax.f32 %v1185_v9, 0.0  ;;  %v719_v23 = vpack.c.bf16 %v642_v5, %v641_v4  ;;  %v929_v30 = vadd.f32 %v928_v11, %v3792_v55  ;;  %v92_v9 = vld [vmem:[%s5754_s0 + $0x200] sm:$0xff]  ;;  %v93_v11 = vld [vmem:[%s5754_s0 + $0x208] sm:$0xff] }
 0x1f2   :  { %967 = vmatmul.bf16.gmra.mxu1 %v719_v23  ;;  %1226 = vmatmul.bf16.gmra.mxu2 %v719_v23  ;;  %v4032_v27 = vpack.c.bf16 %v1422_v21, %v1420_v15  ;;  %v1423_v41 = vmax.f32 %v929_v30, 0.0 }
 0x1f3   :  { %v462_v28 = vpop.f32.mrf.mxu0 }
 0x1f4   :  { %v463_v44 = vadd.f32 %v3706_v14, %v462_v28 }
 0x1f5   :  { %v1187_v29 = vpop.f32.mrf.mxu2 }
 0x1f6   :  { %3150 = vmatmul.msk.bf16.gmra.mxu0 %vm183_vm1, %v159_v26  ;;  %v1188_v50 = vadd.f32 %v1187_v29, %v3796_v62  ;;  %v643_v57 = vmax.f32 %v463_v44, 0.0 }
 0x1f7   :  { %v930_v36 = vpop.f32.mrf.mxu1 }
 0x1f8   :  { %v931_v38 = vadd.f32 %v930_v36, %v3792_v55  ;;  %v1424_v12 = vmax.f32 %v1188_v50, 0.0 }
 0x1fa   :  { %v1425_v45 = vmax.f32 %v931_v38, 0.0  ;;  %v4057_v38 = vld [vmem:[%s5756_s2] ss:$0 sm:$0xff] }
 0x1fb   :  { %v464_v48 = vpop.f32.mrf.mxu0 }
 0x1fc   :  { %v465_v53 = vadd.f32 %v3706_v14, %v464_v48  ;;  %v4040_v54 = vpack.c.bf16 %v1425_v45, %v1423_v41  ;;  %v160_v14 = vpack.c.bf16 %v93_v11, %v92_v9  ;;  %v3355_v45 = vld [vmem:[%s5759_s5 + $0xf0] sm:$0xf]  ;;  %v3408_v48 = vld [vmem:[%s5759_s5 + $0xf4] sm:$0xf0] }
 0x1fd   :  { %v1189_v56 = vpop.f32.mrf.mxu2 }
 0x1fe   :  { %5834 = vst [vmem:[#allocation10_spill] sm:$0xff] %v4040_v54  ;;  %v644_v3 = vmax.f32 %v465_v53, 0.0  ;;  %v1190_v4 = vadd.f32 %v1189_v56, %v3796_v62  ;;  %v3356_v53 = vor.u32 %v3408_v48, %v3355_v45  ;;  %v106_v45 = vld [vmem:[%s5754_s0 + $0x270] sm:$0xff]  ;;  %v107_v48 = vld [vmem:[%s5754_s0 + $0x278] sm:$0xff] }
 0x1ff   :  { %v933_v5 = vpop.f32.mrf.mxu1 }
 0x200   :  { %v1426_v13 = vmax.f32 %v1190_v4, 0.0  ;;  %v720_v15 = vpack.c.bf16 %v644_v3, %v643_v57  ;;  %v934_v28 = vadd.f32 %v933_v5, %v3792_v55  ;;  %2124 = vmatpush.bf16.msrb.mxu0 %v3356_v53  ;;  %v167_v53 = vpack.c.bf16 %v107_v48, %v106_v45  ;;  %v3407_v45 = vld [vmem:[%s5759_s5 + $0xf4] sm:$0xf]  ;;  %v3357_v48 = vld [vmem:[%s5759_s5 + $0xf8] sm:$0xf0] }
 0x202   :  { %972 = vmatmul.bf16.gmra.mxu1 %v720_v15  ;;  %1231 = vmatmul.bf16.gmra.mxu2 %v720_v15  ;;  %v4049_v21 = vpack.c.bf16 %v1426_v13, %v1424_v12  ;;  %v1427_v36 = vmax.f32 %v934_v28, 0.0  ;;  %v94_v13 = vld [vmem:[%s5754_s0 + $0x210] sm:$0xff]  ;;  %v95_v15 = vld [vmem:[%s5754_s0 + $0x218] sm:$0xff] }
 0x203   :  { %v467_v23 = vpop.f32.mrf.mxu0  ;;  %v161_v28 = vpack.c.bf16 %v95_v15, %v94_v13  ;;  %3158 = vmatmul.msk.bf16.vlgmr.msra.gmra.mxu3 %vm183_vm1, %v167_v53 }
 0x204   :  { %v468_v41 = vadd.f32 %v4057_v38, %v467_v23  ;;  %3418 = vmatpush.bf16.msra.mxu3 %v3568_v22  ;;  %v97_v22 = vld [vmem:[%s5754_s0 + $0x228] sm:$0xff] }
 0x205   :  { %v1192_v26 = vpop.f32.mrf.mxu2 }
 0x206   :  { %3151 = vmatmul.msk.bf16.gmra.mxu0 %vm183_vm1, %v160_v14  ;;  %v1193_v56 = vadd.f32 %v1192_v26, %v3796_v62  ;;  %v645_v5 = vmax.f32 %v468_v41, 0.0 }
 0x207   :  { %v935_v29 = vpop.f32.mrf.mxu1 }
 0x208   :  { %v936_v30 = vadd.f32 %v935_v29, %v3792_v55  ;;  %v1428_v14 = vmax.f32 %v1193_v56, 0.0  ;;  %3419 = vmatpush.bf16.msra.mxu3 %v3590_v31 }
 0x20a   :  { %v1429_v44 = vmax.f32 %v936_v30, 0.0 }
 0x20b   :  { %v469_v50 = vpop.f32.mrf.mxu0 }
 0x20c   :  { %v470_v57 = vadd.f32 %v4057_v38, %v469_v50  ;;  %v4068_v3 = vpack.c.bf16 %v1429_v44, %v1427_v36  ;;  %3420 = vmatpush.bf16.msra.mxu3 %v3605_v37 }
 0x20d   :  { %v1194_v4 = vpop.f32.mrf.mxu2 }
 0x20e   :  { %5835 = vst [vmem:[#allocation11_spill] sm:$0xff] %v4068_v3  ;;  %v646_v9 = vmax.f32 %v470_v57, 0.0  ;;  %v1195_v11 = vadd.f32 %v1194_v4, %v3796_v62 }
 0x20f   :  { %v938_v12 = vpop.f32.mrf.mxu1 }
 0x210   :  { %v1430_v23 = vmax.f32 %v1195_v11, 0.0  ;;  %v721_v26 = vpack.c.bf16 %v646_v9, %v645_v5  ;;  %v939_v41 = vadd.f32 %v938_v12, %v3792_v55  ;;  %3421 = vmatpush.bf16.msra.mxu3 %v3620_v43 }
 0x212   :  { %977 = vmatmul.bf16.gmra.mxu1 %v721_v26  ;;  %1236 = vmatmul.bf16.gmra.mxu2 %v721_v26  ;;  %v4077_v29 = vpack.c.bf16 %v1430_v23, %v1428_v14  ;;  %v1431_v56 = vmax.f32 %v939_v41, 0.0 }
 0x213   :  { %v472_v30 = vpop.f32.mrf.mxu0 }
 0x214   :  { %v473_v57 = vadd.f32 %v4057_v38, %v472_v30  ;;  %3422 = vmatpush.bf16.msra.mxu3 %v3641_v52  ;;  %v99_v52 = vld [vmem:[%s5754_s0 + $0x238] sm:$0xff] }
 0x215   :  { %v1197_v36 = vpop.f32.mrf.mxu2 }
 0x216   :  { %3152 = vmatmul.msk.bf16.gmra.mxu0 %vm183_vm1, %v161_v28  ;;  %v1198_v9 = vadd.f32 %v1197_v36, %v3796_v62  ;;  %v647_v15 = vmax.f32 %v473_v57, 0.0  ;;  %v96_v28 = vld [vmem:[%s5754_s0 + $0x220] sm:$0xff] }
 0x217   :  { %v940_v44 = vpop.f32.mrf.mxu1 }
 0x218   :  { %v941_v50 = vadd.f32 %v940_v44, %v3792_v55  ;;  %v1432_v30 = vmax.f32 %v1198_v9, 0.0  ;;  %v162_v44 = vpack.c.bf16 %v97_v22, %v96_v28  ;;  %v109_v9 = vld [vmem:[%s5754_s0 + $0x288] sm:$0xff]  ;;  %3423 = vmatpush.bf16.msra.mxu3 %v3657_v58  ;;  %v110_v58 = vld [vmem:[%s5754_s0 + $0x290] sm:$0xff] }
 0x21a   :  { %v1433_v4 = vmax.f32 %v941_v50, 0.0 }
 0x21b   :  { %v474_v5 = vpop.f32.mrf.mxu0 }
 0x21c   :  { %v475_v11 = vadd.f32 %v4057_v38, %v474_v5  ;;  %v4093_v12 = vpack.c.bf16 %v1433_v4, %v1431_v56  ;;  %v4111_v56 = vor.u32 %v3407_v45, %v3357_v48  ;;  %v108_v5 = vld [vmem:[%s5754_s0 + $0x280] sm:$0xff]  ;;  %3424 = vmatpush.bf16.msra.mxu3 %v3672_v0 }
 0x21d   :  { %v1199_v13 = vpop.f32.mrf.mxu2  ;;  %v3347_v0 = vld [vmem:[%s5759_s5 + $0xe0] sm:$0xf] }
 0x21e   :  { %5836 = vst [vmem:[#allocation12_spill] sm:$0xff] %v4093_v12  ;;  %v648_v14 = vmax.f32 %v475_v11, 0.0  ;;  %v1200_v23 = vadd.f32 %v1199_v13, %v3796_v62  ;;  %2642 = vmatpush.bf16.msrb.mxu2 %v4111_v56  ;;  %v3391_v11 = vld [vmem:[%s5759_s5 + $0x74] sm:$0xf]  ;;  %v3293_v13 = vld [vmem:[%s5759_s5 + $0x78] sm:$0xf0] }
 0x21f   :  { %v943_v26 = vpop.f32.mrf.mxu1  ;;  %5837 = vst [vmem:[#allocation13_spill] sm:$0xff] %v4111_v56 }
 0x220   :  { %v1434_v36 = vmax.f32 %v1200_v23, 0.0  ;;  %v722_v41 = vpack.c.bf16 %v648_v14, %v647_v15  ;;  %v944_v57 = vadd.f32 %v943_v26, %v3792_v55  ;;  %v168_v15 = vpack.c.bf16 %v109_v9, %v108_v5  ;;  %3425 = vmatpush.bf16.msra.mxu3 %v3687_v6 }
 0x221   :  { %v4131_v14 = vor.u32 %v3391_v11, %v3293_v13 }
 0x222   :  { %982 = vmatmul.bf16.gmra.mxu1 %v722_v41  ;;  %1241 = vmatmul.bf16.gmra.mxu2 %v722_v41  ;;  %v4109_v50 = vpack.c.bf16 %v1434_v36, %v1432_v30  ;;  %v1435_v23 = vmax.f32 %v944_v57, 0.0  ;;  %v98_v57 = vld [vmem:[%s5754_s0 + $0x230] sm:$0xff] }
 0x223   :  { %v477_v53 = vpop.f32.mrf.mxu0  ;;  %5838 = vst [vmem:[#allocation14_spill] sm:$0xff] %v4131_v14  ;;  %3159 = vmatmul.msk.bf16.gmra.mxu3 %vm183_vm1, %v168_v15  ;;  %2383 = vmatpush.bf16.msrb.mxu1 %v4131_v14  ;;  %v163_v9 = vpack.c.bf16 %v99_v52, %v98_v57  ;;  %v3339_v57 = vld [vmem:[%s5759_s5 + $0xd0] sm:$0xf]  ;;  %v3404_v52 = vld [vmem:[%s5759_s5 + $0xd4] sm:$0xf0] }
 0x224   :  { %v478_v26 = vadd.f32 %v4057_v38, %v477_v53 }
 0x225   :  { %v1202_v31 = vpop.f32.mrf.mxu2 }
 0x226   :  { %3153 = vmatmul.msk.bf16.gmra.mxu0 %vm183_vm1, %v162_v44  ;;  %v1203_v22 = vadd.f32 %v1202_v31, %v3796_v62  ;;  %v649_v44 = vmax.f32 %v478_v26, 0.0  ;;  %v111_v26 = vld [vmem:[%s5754_s0 + $0x298] sm:$0xff] }
 0x227   :  { %v945_v4 = vpop.f32.mrf.mxu1 }
 0x228   :  { %v946_v37 = vadd.f32 %v945_v4, %v3792_v55  ;;  %v1436_v31 = vmax.f32 %v1203_v22, 0.0  ;;  %v3406_v22 = vld [vmem:[%s5759_s5 + $0xe4] sm:$0xf0] }
 0x22a   :  { %v1437_v28 = vmax.f32 %v946_v37, 0.0 }
 0x22b   :  { %v479_v43 = vpop.f32.mrf.mxu0 }
 0x22c   :  { %v480_v30 = vadd.f32 %v4057_v38, %v479_v43  ;;  %v4139_v36 = vpack.c.bf16 %v1437_v28, %v1435_v23  ;;  %v169_v43 = vpack.c.bf16 %v111_v26, %v110_v58  ;;  %v101_v58 = vld [vmem:[%s5754_s0 + $0x248] sm:$0xff] }
 0x22d   :  { %v1204_v41 = vpop.f32.mrf.mxu2 }
 0x22e   :  { %5839 = vst [vmem:[#allocation15_spill] sm:$0xff] %v4139_v36  ;;  %v650_v45 = vmax.f32 %v480_v30, 0.0  ;;  %v1205_v48 = vadd.f32 %v1204_v41, %v3796_v62  ;;  %v3348_v30 = vor.u32 %v3406_v22, %v3347_v0  ;;  %v3331_v0 = vld [vmem:[%s5759_s5 + $0xc0] sm:$0xf]  ;;  %v3402_v22 = vld [vmem:[%s5759_s5 + $0xc4] sm:$0xf0] }
 0x22f   :  { %v948_v53 = vpop.f32.mrf.mxu1 }
 0x230   :  { %v1438_v4 = vmax.f32 %v1205_v48, 0.0  ;;  %v723_v5 = vpack.c.bf16 %v650_v45, %v649_v44  ;;  %v949_v15 = vadd.f32 %v948_v53, %v3792_v55  ;;  %2125 = vmatpush.bf16.msrb.mxu0 %v3348_v30  ;;  %v3332_v30 = vor.u32 %v3402_v22, %v3331_v0 }
 0x232   :  { %987 = vmatmul.bf16.gmra.mxu1 %v723_v5  ;;  %1246 = vmatmul.bf16.gmra.mxu2 %v723_v5  ;;  %v4149_v37 = vpack.c.bf16 %v1438_v4, %v1436_v31  ;;  %v1439_v41 = vmax.f32 %v949_v15, 0.0  ;;  %v3340_v5 = vor.u32 %v3404_v52, %v3339_v57 }
 0x233   :  { %v482_v11 = vpop.f32.mrf.mxu0  ;;  %3160 = vmatmul.msk.bf16.gmra.mxu3 %vm183_vm1, %v169_v43 }
 0x234   :  { %v483_v44 = vadd.f32 %v4057_v38, %v482_v11  ;;  %2126 = vmatpush.bf16.msrb.mxu0 %v3340_v5  ;;  %v112_v5 = vld [vmem:[%s5754_s0 + $0x2a0] sm:$0xff] }
 0x235   :  { %v1207_v13 = vpop.f32.mrf.mxu2 }
 0x236   :  { %3154 = vmatmul.msk.bf16.gmra.mxu0 %vm183_vm1, %v163_v9  ;;  %v1208_v6 = vadd.f32 %v1207_v13, %v3796_v62  ;;  %v651_v9 = vmax.f32 %v483_v44, 0.0  ;;  %v100_v13 = vld [vmem:[%s5754_s0 + $0x240] sm:$0xff] }
 0x237   :  { %v950_v23 = vpop.f32.mrf.mxu1 }
 0x238   :  { %v951_v28 = vadd.f32 %v950_v23, %v3792_v55  ;;  %v1440_v26 = vmax.f32 %v1208_v6, 0.0  ;;  %2127 = vmatpush.bf16.msrb.mxu0 %v3332_v30  ;;  %v3400_v6 = vld [vmem:[%s5759_s5 + $0xb4] sm:$0xf0] }
 0x23a   :  { %v1441_v45 = vmax.f32 %v951_v28, 0.0 }
 0x23b   :  { %v484_v48 = vpop.f32.mrf.mxu0 }
 0x23c   :  { %v485_v53 = vadd.f32 %v4057_v38, %v484_v48  ;;  %v4178_v31 = vpack.c.bf16 %v1441_v45, %v1439_v41  ;;  %v164_v41 = vpack.c.bf16 %v101_v58, %v100_v13  ;;  %v3323_v48 = vld [vmem:[%s5759_s5 + $0xb0] sm:$0xf]  ;;  %v3315_v13 = vld [vmem:[%s5759_s5 + $0xa0] sm:$0xf] }
 0x23d   :  { %v1209_v4 = vpop.f32.mrf.mxu2  ;;  %v3324_v57 = vor.u32 %v3400_v6, %v3323_v48  ;;  %v3396_v48 = vld [vmem:[%s5759_s5 + $0x94] sm:$0xf0] }
 0x23e   :  { %5840 = vst [vmem:[#allocation16_spill] sm:$0xff] %v4178_v31  ;;  %v652_v11 = vmax.f32 %v485_v53, 0.0  ;;  %v1210_v15 = vadd.f32 %v1209_v4, %v3796_v62 }
 0x23f   :  { %v953_v23 = vpop.f32.mrf.mxu1  ;;  %2128 = vmatpush.bf16.msrb.mxu0 %v3324_v57 }
 0x240   :  { %v1442_v28 = vmax.f32 %v1210_v15, 0.0  ;;  %v724_v43 = vpack.c.bf16 %v652_v11, %v651_v9  ;;  %v954_v52 = vadd.f32 %v953_v23, %v3792_v55  ;;  %v113_v9 = vld [vmem:[%s5754_s0 + $0x2a8] sm:$0xff] }
 0x241   :  { %v170_v15 = vpack.c.bf16 %v113_v9, %v112_v5  ;;  %v3398_v23 = vld [vmem:[%s5759_s5 + $0xa4] sm:$0xf0] }
 0x242   :  { %992 = vmatmul.bf16.gmra.mxu1 %v724_v43  ;;  %1251 = vmatmul.bf16.gmra.mxu2 %v724_v43  ;;  %v4193_v44 = vpack.c.bf16 %v1442_v28, %v1440_v26  ;;  %v3316_v58 = vor.u32 %v3398_v23, %v3315_v13  ;;  %v1443_v26 = vmax.f32 %v954_v52, 0.0 }
 0x243   :  { %v487_v45 = vpop.f32.mrf.mxu0  ;;  %3161 = vmatmul.msk.bf16.gmra.mxu3 %vm183_vm1, %v170_v15 }
 0x244   :  { %v488_v28 = vadd.f32 %v4057_v38, %v487_v45  ;;  %2129 = vmatpush.bf16.msrb.mxu0 %v3316_v58  ;;  %v3299_v58 = vld [vmem:[%s5759_s5 + $0x80] sm:$0xf] }
 0x245   :  { %v1212_v53 = vpop.f32.mrf.mxu2 }
 0x246   :  { %3155 = vmatmul.msk.bf16.gmra.mxu0 %vm183_vm1, %v164_v41  ;;  %v1213_v22 = vadd.f32 %v1212_v53, %v3796_v62  ;;  %v3307_v41 = vld [vmem:[%s5759_s5 + $0x90] sm:$0xf]  ;;  %v653_v52 = vmax.f32 %v488_v28, 0.0 }
 0x247   :  { %v955_v4 = vpop.f32.mrf.mxu1  ;;  %v3308_v57 = vor.u32 %v3396_v48, %v3307_v41  ;;  %v102_v53 = vld [vmem:[%s5754_s0 + $0x250] sm:$0xff] }
 0x248   :  { %v956_v11 = vadd.f32 %v955_v4, %v3792_v55  ;;  %v1444_v15 = vmax.f32 %v1213_v22, 0.0 }
 0x249   :  { %2130 = vmatpush.bf16.msrb.mxu0 %v3308_v57  ;;  %v115_v57 = vld [vmem:[%s5754_s0 + $0x2b8] sm:$0xff] }
 0x24a   :  { %v1445_v43 = vmax.f32 %v956_v11, 0.0  ;;  %v103_v11 = vld [vmem:[%s5754_s0 + $0x258] sm:$0xff] }
 0x24b   :  { %v489_v0 = vpop.f32.mrf.mxu0 }
 0x24c   :  { %v490_v30 = vadd.f32 %v4057_v38, %v489_v0  ;;  %v4226_v6 = vpack.c.bf16 %v1445_v43, %v1443_v26  ;;  %v3394_v26 = vld [vmem:[%s5759_s5 + $0x84] sm:$0xf0]  ;;  %v165_v43 = vpack.c.bf16 %v103_v11, %v102_v53 }
 0x24d   :  { %v1214_v45 = vpop.f32.mrf.mxu2  ;;  %v3300_v28 = vor.u32 %v3394_v26, %v3299_v58 }
 0x24e   :  { %5841 = vst [vmem:[#allocation17_spill] sm:$0xff] %v4226_v6  ;;  %v654_v4 = vmax.f32 %v490_v30, 0.0  ;;  %v1215_v5 = vadd.f32 %v1214_v45, %v3796_v62  ;;  %v114_v45 = vld [vmem:[%s5754_s0 + $0x2b0] sm:$0xff] }
 0x24f   :  { %v958_v9 = vpop.f32.mrf.mxu1  ;;  %2131 = vmatpush.bf16.msrb.mxu0 %v3300_v28 }
 0x250   :  { %v1446_v13 = vmax.f32 %v1215_v5, 0.0  ;;  %v725_v23 = vpack.c.bf16 %v654_v4, %v653_v52  ;;  %v959_v22 = vadd.f32 %v958_v9, %v3792_v55  ;;  %v171_v4 = vpack.c.bf16 %v115_v57, %v114_v45 }
 0x252   :  { %997 = vmatmul.bf16.gmra.mxu1 %v725_v23  ;;  %1256 = vmatmul.bf16.gmra.mxu2 %v725_v23  ;;  %v4241_v0 = vpack.c.bf16 %v1446_v13, %v1444_v15  ;;  %v1447_v5 = vmax.f32 %v959_v22, 0.0  ;;  %v105_v22 = vld [vmem:[%s5754_s0 + $0x268] sm:$0xff] }
 0x253   :  { %v492_v30 = vpop.f32.mrf.mxu0  ;;  %3162 = vmatmul.msk.bf16.gmra.mxu3 %vm183_vm1, %v171_v4 }
 0x254   :  { %v493_v53 = vadd.f32 %v4057_v38, %v492_v30  ;;  %v104_v30 = vld [vmem:[%s5754_s0 + $0x260] sm:$0xff] }
 0x255   :  { %v1217_v41 = vpop.f32.mrf.mxu2 }
 0x256   :  { %3156 = vmatmul.msk.bf16.gmra.mxu0 %vm183_vm1, %v165_v43  ;;  %v1218_v15 = vadd.f32 %v1217_v41, %v3796_v62  ;;  %v655_v26 = vmax.f32 %v493_v53, 0.0 }
 0x257   :  { %v960_v48 = vpop.f32.mrf.mxu1 }
 0x258   :  { %v961_v52 = vadd.f32 %v960_v48, %v3792_v55  ;;  %v1448_v45 = vmax.f32 %v1218_v15, 0.0  ;;  %v117_v15 = vld [vmem:[%s5754_s0 + $0x2c8] sm:$0xff] }
 0x25a   :  { %v1449_v11 = vmax.f32 %v961_v52, 0.0  ;;  %v166_v52 = vpack.c.bf16 %v105_v22, %v104_v30 }
 0x25b   :  { %v494_v9 = vpop.f32.mrf.mxu0 }
 0x25c   :  { %v495_v13 = vadd.f32 %v4057_v38, %v494_v9  ;;  %v4256_v23 = vpack.c.bf16 %v1449_v11, %v1447_v5 }
 0x25d   :  { %v1219_v58 = vpop.f32.mrf.mxu2 }
 0x25e   :  { %5842 = vst [vmem:[#allocation18_spill] sm:$0xff] %v4256_v23  ;;  %v656_v28 = vmax.f32 %v495_v13, 0.0  ;;  %v1220_v43 = vadd.f32 %v1219_v58, %v3796_v62  ;;  %v116_v13 = vld [vmem:[%s5754_s0 + $0x2c0] sm:$0xff] }
 0x25f   :  { %v963_v48 = vpop.f32.mrf.mxu1 }
 0x260   :  { %v1450_v41 = vmax.f32 %v1220_v43, 0.0  ;;  %v726_v57 = vpack.c.bf16 %v656_v28, %v655_v26  ;;  %v964_v11 = vadd.f32 %v963_v48, %v3792_v55  ;;  %v172_v26 = vpack.c.bf16 %v117_v15, %v116_v13 }
 0x262   :  { %1002 = vmatmul.bf16.gmra.mxu1 %v726_v57  ;;  %1261 = vmatmul.bf16.gmra.mxu2 %v726_v57  ;;  %v4265_v4 = vpack.c.bf16 %v1450_v41, %v1448_v45  ;;  %v1451_v28 = vmax.f32 %v964_v11, 0.0 }
 0x263   :  { %v497_v5 = vpop.f32.mrf.mxu0  ;;  %3163 = vmatmul.msk.bf16.gmra.mxu3 %vm183_vm1, %v172_v26  ;;  %v3389_v26 = vld [vmem:[%s5759_s5 + $0x64] sm:$0xf] }
 0x264   :  { %v498_v43 = vadd.f32 %v4057_v38, %v497_v5  ;;  %v3405_v5 = vld [vmem:[%s5759_s5 + $0xe4] sm:$0xf] }
 0x265   :  { %v1222_v53 = vpop.f32.mrf.mxu2 }
 0x266   :  { %3157 = vmatmul.msk.bf16.gmra.mxu0 %vm183_vm1, %v166_v52  ;;  %v1223_v22 = vadd.f32 %v1222_v53, %v3796_v62  ;;  %v657_v52 = vmax.f32 %v498_v43, 0.0  ;;  %v3349_v53 = vld [vmem:[%s5759_s5 + $0xe8] sm:$0xf0] }
 0x267   :  { %v965_v9 = vpop.f32.mrf.mxu1 }
 0x268   :  { %v966_v58 = vadd.f32 %v965_v9, %v3792_v55  ;;  %v1452_v13 = vmax.f32 %v1223_v22, 0.0 }
 0x26a   :  { %v1453_v30 = vmax.f32 %v966_v58, 0.0  ;;  %v4289_v58 = vor.u32 %v3405_v5, %v3349_v53 }
 0x26b   :  { %v499_v48 = vpop.f32.mrf.mxu0 }
 0x26c   :  { %v500_v45 = vadd.f32 %v4057_v38, %v499_v48  ;;  %v4280_v41 = vpack.c.bf16 %v1453_v30, %v1451_v28  ;;  %5844 = vst [vmem:[#allocation20_spill] sm:$0xff] %v4289_v58  ;;  %2643 = vmatpush.bf16.msrb.mxu2 %v4289_v58 }
 0x26d   :  { %v1224_v57 = vpop.f32.mrf.mxu2 }
 0x26e   :  { %5843 = vst [vmem:[#allocation19_spill] sm:$0xff] %v4280_v41  ;;  %v658_v56 = vmax.f32 %v500_v45, 0.0  ;;  %v1225_v14 = vadd.f32 %v1224_v57, %v3796_v62  ;;  %v118_v45 = vld [vmem:[%s5754_s0 + $0x2d0] sm:$0xff]  ;;  %v119_v57 = vld [vmem:[%s5754_s0 + $0x2d8] sm:$0xff] }
 0x26f   :  { %v968_v9 = vpop.f32.mrf.mxu1 }
 0x270   :  { %v1454_v11 = vmax.f32 %v1225_v14, 0.0  ;;  %v727_v15 = vpack.c.bf16 %v658_v56, %v657_v52  ;;  %v3285_v56 = vld [vmem:[%s5759_s5 + $0x68] sm:$0xf0]  ;;  %v969_v48 = vadd.f32 %v968_v9, %v3792_v55 }
 0x271   :  { %v4300_v43 = vor.u32 %v3389_v26, %v3285_v56 }
 0x272   :  { %1007 = vmatmul.bf16.gmra.mxu1 %v727_v15  ;;  %1266 = vmatmul.bf16.gmra.mxu2 %v727_v15  ;;  %v4297_v14 = vpack.c.bf16 %v1454_v11, %v1452_v13  ;;  %v173_v13 = vpack.c.bf16 %v119_v57, %v118_v45  ;;  %v1455_v11 = vmax.f32 %v969_v48, 0.0 }
 0x273   :  { %v502_v28 = vpop.f32.mrf.mxu0  ;;  %5846 = vst [vmem:[#allocation22_spill] sm:$0xff] %v4300_v43  ;;  %2384 = vmatpush.bf16.msrb.mxu1 %v4300_v43 }
 0x274   :  { %5845 = vst [vmem:[#allocation21_spill] sm:$0xff] %v4297_v14  ;;  %v503_v15 = vadd.f32 %v4057_v38, %v502_v28  ;;  %3164 = vmatmul.msk.bf16.gmra.mxu3 %vm183_vm1, %v173_v13 }
 0x275   :  { %v1227_v30 = vpop.f32.mrf.mxu2 }
 0x276   :  { %2132 = vmatmul.bf16.vlgmr.msrb.gmra.mxu0 %v3811_v20  ;;  %v1228_v53 = vadd.f32 %v1227_v30, %v3796_v62  ;;  %v659_v41 = vmax.f32 %v503_v15, 0.0  ;;  %v120_v15 = vld [vmem:[%s5754_s0 + $0x2e0] sm:$0xff] }
 0x277   :  { %v970_v22 = vpop.f32.mrf.mxu1 }
 0x278   :  { %v971_v52 = vadd.f32 %v970_v22, %v3792_v55  ;;  %v1456_v45 = vmax.f32 %v1228_v53, 0.0 }
 0x27a   :  { %v1457_v5 = vmax.f32 %v971_v52, 0.0 }
 0x27b   :  { %v504_v9 = vpop.f32.mrf.mxu0 }
 0x27c   :  { %v505_v26 = vadd.f32 %v4057_v38, %v504_v9  ;;  %v4316_v56 = vpack.c.bf16 %v1457_v5, %v1455_v11 }
 0x27d   :  { %v1229_v58 = vpop.f32.mrf.mxu2 }
 0x27e   :  { %5847 = vst [vmem:[#allocation23_spill] sm:$0xff] %v4316_v56  ;;  %v660_v43 = vmax.f32 %v505_v26, 0.0  ;;  %v1230_v23 = vadd.f32 %v1229_v58, %v3796_v62 }
 0x27f   :  { %v973_v22 = vpop.f32.mrf.mxu1 }
 0x280   :  { %v1458_v48 = vmax.f32 %v1230_v23, 0.0  ;;  %v728_v57 = vpack.c.bf16 %v660_v43, %v659_v41  ;;  %v974_v30 = vadd.f32 %v973_v22, %v3792_v55  ;;  %v121_v23 = vld [vmem:[%s5754_s0 + $0x2e8] sm:$0xff] }
 0x281   :  { %v174_v58 = vpack.c.bf16 %v121_v23, %v120_v15 }
 0x282   :  { %1012 = vmatmul.bf16.gmra.mxu1 %v728_v57  ;;  %1271 = vmatmul.bf16.gmra.mxu2 %v728_v57  ;;  %v4319_v28 = vpack.c.bf16 %v1458_v48, %v1456_v45  ;;  %v1459_v43 = vmax.f32 %v974_v30, 0.0 }
 0x283   :  { %v507_v52 = vpop.f32.mrf.mxu0 }
 0x284   :  { %5848 = vst [vmem:[#allocation24_spill] sm:$0xff] %v4319_v28  ;;  %v508_v5 = vadd.f32 %v4057_v38, %v507_v52  ;;  %3165 = vmatmul.msk.bf16.gmra.mxu3 %vm183_vm1, %v174_v58 }
 0x285   :  { %v1232_v13 = vpop.f32.mrf.mxu2 }
 0x286   :  { %2137 = vmatmul.bf16.gmra.mxu0 %v3828_v49  ;;  %v1233_v26 = vadd.f32 %v1232_v13, %v3796_v62  ;;  %v661_v57 = vmax.f32 %v508_v5, 0.0  ;;  %v122_v5 = vld [vmem:[%s5754_s0 + $0x2f0] sm:$0xff] }
 0x287   :  { %v975_v11 = vpop.f32.mrf.mxu1 }
 0x288   :  { %v976_v41 = vadd.f32 %v975_v11, %v3792_v55  ;;  %v1460_v15 = vmax.f32 %v1233_v26, 0.0 }
 0x28a   :  { %v1461_v9 = vmax.f32 %v976_v41, 0.0 }
 0x28b   :  { %v509_v53 = vpop.f32.mrf.mxu0 }
 0x28c   :  { %v510_v22 = vadd.f32 %v4057_v38, %v509_v53  ;;  %v4334_v45 = vpack.c.bf16 %v1461_v9, %v1459_v43 }
 0x28d   :  { %v1234_v48 = vpop.f32.mrf.mxu2 }
 0x28e   :  { %5849 = vst [vmem:[#allocation25_spill] sm:$0xff] %v4334_v45  ;;  %v662_v56 = vmax.f32 %v510_v22, 0.0  ;;  %v1235_v6 = vadd.f32 %v1234_v48, %v3796_v62 }
 0x28f   :  { %v978_v11 = vpop.f32.mrf.mxu1 }
 0x290   :  { %v1462_v30 = vmax.f32 %v1235_v6, 0.0  ;;  %v729_v23 = vpack.c.bf16 %v662_v56, %v661_v57  ;;  %v979_v13 = vadd.f32 %v978_v11, %v3792_v55  ;;  %v123_v6 = vld [vmem:[%s5754_s0 + $0x2f8] sm:$0xff] }
 0x291   :  { %v175_v9 = vpack.c.bf16 %v123_v6, %v122_v5 }
 0x292   :  { %1017 = vmatmul.bf16.gmra.mxu1 %v729_v23  ;;  %1276 = vmatmul.bf16.gmra.mxu2 %v729_v23  ;;  %v4337_v52 = vpack.c.bf16 %v1462_v30, %v1460_v15  ;;  %v1463_v53 = vmax.f32 %v979_v13, 0.0  ;;  %v4354_v23 = vpop.f32.mrf.mxu3 }
 0x293   :  { %v512_v41 = vpop.f32.mrf.mxu0 }
 0x294   :  { %5850 = vst [vmem:[#allocation26_spill] sm:$0xff] %v4337_v52  ;;  %v513_v26 = vadd.f32 %v4057_v38, %v512_v41  ;;  %3166 = vmatmul.msk.bf16.gmra.mxu3 %vm183_vm1, %v175_v9 }
 0x295   :  { %v1237_v58 = vpop.f32.mrf.mxu2 }
 0x296   :  { %2142 = vmatmul.bf16.gmra.mxu0 %v3845_v17  ;;  %v1238_v57 = vadd.f32 %v1237_v58, %v3796_v62  ;;  %v663_v45 = vmax.f32 %v513_v26, 0.0 }
 0x297   :  { %v980_v43 = vpop.f32.mrf.mxu1 }
 0x298   :  { %v981_v56 = vadd.f32 %v980_v43, %v3792_v55  ;;  %v1464_v5 = vmax.f32 %v1238_v57, 0.0 }
 0x29a   :  { %v1465_v22 = vmax.f32 %v981_v56, 0.0 }
 0x29b   :  { %v514_v48 = vpop.f32.mrf.mxu0 }
 0x29c   :  { %v515_v11 = vadd.f32 %v4057_v38, %v514_v48  ;;  %v4352_v15 = vpack.c.bf16 %v1465_v22, %v1463_v53  ;;  %v4359_v48 = vpop.f32.mrf.mxu3  ;;  %v124_v22 = vld [vmem:[%s5754_s0 + $0x300] sm:$0xff] }
 0x29d   :  { %v1239_v30 = vpop.f32.mrf.mxu2 }
 0x29e   :  { %5851 = vst [vmem:[#allocation27_spill] sm:$0xff] %v4352_v15  ;;  %v664_v31 = vmax.f32 %v515_v11, 0.0  ;;  %v1240_v43 = vadd.f32 %v1239_v30, %v3796_v62 }
 0x29f   :  { %v983_v13 = vpop.f32.mrf.mxu1 }
 0x2a0   :  { %v1466_v41 = vmax.f32 %v1240_v43, 0.0  ;;  %v730_v6 = vpack.c.bf16 %v664_v31, %v663_v45  ;;  %v984_v53 = vadd.f32 %v983_v13, %v3792_v55  ;;  %v125_v31 = vld [vmem:[%s5754_s0 + $0x308] sm:$0xff] }
 0x2a1   :  { %v176_v57 = vpack.c.bf16 %v125_v31, %v124_v22 }
 0x2a2   :  { %1022 = vmatmul.bf16.gmra.mxu1 %v730_v6  ;;  %1281 = vmatmul.bf16.gmra.mxu2 %v730_v6  ;;  %v4357_v56 = vpack.c.bf16 %v1466_v41, %v1464_v5  ;;  %v1467_v11 = vmax.f32 %v984_v53, 0.0 }
 0x2a3   :  { %v517_v58 = vpop.f32.mrf.mxu0 }
 0x2a4   :  { %5852 = vst [vmem:[#allocation28_spill] sm:$0xff] %v4357_v56  ;;  %v518_v30 = vadd.f32 %v4057_v38, %v517_v58  ;;  %3167 = vmatmul.msk.bf16.gmra.mxu3 %vm183_vm1, %v176_v57 }
 0x2a5   :  { %v1242_v9 = vpop.f32.mrf.mxu2 }
 0x2a6   :  { %2147 = vmatmul.bf16.gmra.mxu0 %v3862_v47  ;;  %v1243_v5 = vadd.f32 %v1242_v9, %v3796_v62  ;;  %v665_v36 = vmax.f32 %v518_v30, 0.0  ;;  %v4377_v22 = vpop.f32.mrf.mxu3 }
 0x2a7   :  { %v985_v26 = vpop.f32.mrf.mxu1 }
 0x2a8   :  { %v986_v45 = vadd.f32 %v985_v26, %v3792_v55  ;;  %v1468_v53 = vmax.f32 %v1243_v5, 0.0 }
 0x2aa   :  { %v1469_v43 = vmax.f32 %v986_v45, 0.0 }
 0x2ab   :  { %v519_v13 = vpop.f32.mrf.mxu0 }
 0x2ac   :  { %v520_v41 = vadd.f32 %v4057_v38, %v519_v13  ;;  %v4374_v6 = vpack.c.bf16 %v1469_v43, %v1467_v11  ;;  %v3403_v43 = vld [vmem:[%s5759_s5 + $0xd4] sm:$0xf]  ;;  %v3341_v13 = vld [vmem:[%s5759_s5 + $0xd8] sm:$0xf0] }
 0x2ad   :  { %v1244_v15 = vpop.f32.mrf.mxu2 }
 0x2ae   :  { %5853 = vst [vmem:[#allocation29_spill] sm:$0xff] %v4374_v6  ;;  %v666_v56 = vmax.f32 %v520_v41, 0.0  ;;  %v1245_v12 = vadd.f32 %v1244_v15, %v3796_v62  ;;  %v126_v15 = vld [vmem:[%s5754_s0 + $0x310] sm:$0xff]  ;;  %v4396_v5 = vpop.f32.mrf.mxu3  ;;  %v4398_v41 = vor.u32 %v3403_v43, %v3341_v13 }
 0x2af   :  { %v988_v26 = vpop.f32.mrf.mxu1 }
 0x2b0   :  { %v1470_v58 = vmax.f32 %v1245_v12, 0.0  ;;  %v731_v31 = vpack.c.bf16 %v666_v56, %v665_v36  ;;  %v989_v11 = vadd.f32 %v988_v26, %v3792_v55  ;;  %v127_v12 = vld [vmem:[%s5754_s0 + $0x318] sm:$0xff]  ;;  %5855 = vst [vmem:[#allocation31_spill] sm:$0xff] %v4398_v41  ;;  %v3387_v26 = vld [vmem:[%s5759_s5 + $0x54] sm:$0xf]  ;;  %2644 = vmatpush.bf16.msrb.mxu2 %v4398_v41  ;;  %s3476_s0 = smov 128  }
 0x2b1   :  { %v177_v56 = vpack.c.bf16 %v127_v12, %v126_v15 }
 0x2b2   :  { %1027 = vmatmul.bf16.gmra.mxu1 %v731_v31  ;;  %1286 = vmatmul.bf16.gmra.mxu2 %v731_v31  ;;  %v4379_v45 = vpack.c.bf16 %v1470_v58, %v1468_v53  ;;  %v3277_v53 = vld [vmem:[%s5759_s5 + $0x58] sm:$0xf0]  ;;  %v1471_v58 = vmax.f32 %v989_v11, 0.0  ;;  %v3385_v11 = vld [vmem:[%s5759_s5 + $0x44] sm:$0xf] }
 0x2b3   :  { %v522_v9 = vpop.f32.mrf.mxu0  ;;  %v4408_v15 = vor.u32 %v3387_v26, %v3277_v53  ;;  %v3333_v53 = vld [vmem:[%s5759_s5 + $0xc8] sm:$0xf0] }
 0x2b4   :  { %5854 = vst [vmem:[#allocation30_spill] sm:$0xff] %v4379_v45  ;;  %v523_v31 = vadd.f32 %v4057_v38, %v522_v9  ;;  %3168 = vmatmul.msk.bf16.gmra.mxu3 %vm183_vm1, %v177_v56  ;;  %v3269_v9 = vld [vmem:[%s5759_s5 + $0x48] sm:$0xf0] }
 0x2b5   :  { %v1247_v57 = vpop.f32.mrf.mxu2  ;;  %5856 = vst [vmem:[#allocation32_spill] sm:$0xff] %v4408_v15  ;;  %2385 = vmatpush.bf16.msrb.mxu1 %v4408_v15 }
 0x2b6   :  { %2152 = vmatmul.bf16.gmra.mxu0 %v3879_v18  ;;  %v1248_v43 = vadd.f32 %v1247_v57, %v3796_v62  ;;  %v4425_v57 = vor.u32 %v3385_v11, %v3269_v9  ;;  %v4453_v9 = vpop.f32.mrf.mxu3 }
 0x2b7   :  { %v990_v30 = vpop.f32.mrf.mxu1 }
 0x2b8   :  { %v991_v36 = vadd.f32 %v990_v30, %v3792_v55  ;;  %5858 = vst [vmem:[#allocation34_spill] sm:$0xff] %v4425_v57  ;;  %v1472_v52 = vmax.f32 %v1248_v43, 0.0  ;;  %v3399_v43 = vld [vmem:[%s5759_s5 + $0xb4] sm:$0xf] }
 0x2b9   :  { %2386 = vmatpush.bf16.msrb.mxu1 %v4425_v57 }
 0x2ba   :  { %v1473_v30 = vmax.f32 %v991_v36, 0.0  ;;  %v3401_v36 = vld [vmem:[%s5759_s5 + $0xc4] sm:$0xf] }
 0x2bb   :  { %v524_v12 = vpop.f32.mrf.mxu0  ;;  %v4431_v15 = vor.u32 %v3401_v36, %v3333_v53  ;;  %v3381_v36 = vld [vmem:[%s5759_s5 + $0x24] sm:$0xf]  ;;  %v3317_v53 = vld [vmem:[%s5759_s5 + $0xa8] sm:$0xf0] }
 0x2bc   :  { %v525_v13 = vadd.f32 %v4057_v38, %v524_v12  ;;  %v4423_v56 = vpack.c.bf16 %v1473_v30, %v1471_v58  ;;  %v667_v12 = vmax.f32 %v523_v31, 0.0  ;;  %v3383_v58 = vld [vmem:[%s5759_s5 + $0x34] sm:$0xf]  ;;  %v3261_v31 = vld [vmem:[%s5759_s5 + $0x38] sm:$0xf0] }
 0x2bd   :  { %v1249_v26 = vpop.f32.mrf.mxu2  ;;  %5859 = vst [vmem:[#allocation35_spill] sm:$0xff] %v4431_v15  ;;  %2645 = vmatpush.bf16.msrb.mxu2 %v4431_v15  ;;  %v4441_v30 = vor.u32 %v3383_v58, %v3261_v31 }
 0x2be   :  { %5857 = vst [vmem:[#allocation33_spill] sm:$0xff] %v4423_v56  ;;  %v668_v6 = vmax.f32 %v525_v13, 0.0  ;;  %v1250_v41 = vadd.f32 %v1249_v26, %v3796_v62  ;;  %v3253_v26 = vld [vmem:[%s5759_s5 + $0x28] sm:$0xf0] }
 0x2bf   :  { %v993_v45 = vpop.f32.mrf.mxu1  ;;  %5860 = vst [vmem:[#allocation36_spill] sm:$0xff] %v4441_v30  ;;  %2387 = vmatpush.bf16.msrb.mxu1 %v4441_v30 }
 0x2c0   :  { %v1474_v3 = vmax.f32 %v1250_v41, 0.0  ;;  %v732_v28 = vpack.c.bf16 %v668_v6, %v667_v12  ;;  %v3325_v6 = vld [vmem:[%s5759_s5 + $0xb8] sm:$0xf0]  ;;  %v994_v12 = vadd.f32 %v993_v45, %v3792_v55 }
 0x2c1   :  { %v4449_v41 = vor.u32 %v3399_v43, %v3325_v6  ;;  %v3379_v6 = vld [vmem:[%s5759_s5 + $0x14] sm:$0xf] }
 0x2c2   :  { %1032 = vmatmul.bf16.gmra.mxu1 %v732_v28  ;;  %1291 = vmatmul.bf16.gmra.mxu2 %v732_v28  ;;  %v4451_v13 = vpack.c.bf16 %v1474_v3, %v1472_v52  ;;  %v3397_v3 = vld [vmem:[%s5759_s5 + $0xa4] sm:$0xf]  ;;  %v4466_v52 = vor.u32 %v3381_v36, %v3253_v26  ;;  %v3245_v36 = vld [vmem:[%s5759_s5 + $0x18] sm:$0xf0]  ;;  %v3395_v26 = vld [vmem:[%s5759_s5 + $0x94] sm:$0xf] }
 0x2c3   :  { %5861 = vst [vmem:[#allocation37_spill] sm:$0xff] %v4449_v41  ;;  %v527_v11 = vpop.f32.mrf.mxu0  ;;  %2646 = vmatpush.bf16.msrb.mxu2 %v4449_v41  ;;  %v4473_v58 = vor.u32 %v3397_v3, %v3317_v53  ;;  %v4484_v45 = vor.u32 %v3379_v6, %v3245_v36  ;;  %v3309_v3 = vld [vmem:[%s5759_s5 + $0x98] sm:$0xf0]  ;;  %v1475_v53 = vmax.f32 %v994_v12, 0.0  ;;  %v3377_v36 = vld [vmem:[%s5759_s5 + $0x4] sm:$0xf] }
 0x2c4   :  { %5862 = vst [vmem:[#allocation38_spill] sm:$0xff] %v4451_v13  ;;  %2388 = vmatpush.bf16.msrb.mxu1 %v4466_v52  ;;  %v3393_v12 = vld [vmem:[%s5759_s5 + $0x84] sm:$0xf] }
 0x2c5   :  { %v1252_v28 = vpop.f32.mrf.mxu2  ;;  %5863 = vst [vmem:[#allocation39_spill] sm:$0xff] %v4466_v52 }
 0x2c6   :  { %2157 = vmatmul.bf16.gmra.mxu0 %v3896_v51  ;;  %5864 = vst [vmem:[#allocation40_spill] sm:$0xff] %v4473_v58  ;;  %v1253_v15 = vadd.f32 %v1252_v28, %v3796_v62 }
 0x2c7   :  { %v995_v31 = vpop.f32.mrf.mxu1  ;;  %2647 = vmatpush.bf16.msrb.mxu2 %v4473_v58  ;;  %5865 = vst [vmem:[#allocation41_spill] sm:$0xff] %v4484_v45  ;;  %v4493_v58 = vor.u32 %v3395_v26, %v3309_v3  ;;  %v3301_v3 = vld [vmem:[%s5759_s5 + $0x88] sm:$0xf0] }
 0x2c8   :  { %v996_v43 = vadd.f32 %v995_v31, %v3792_v55  ;;  %v528_v31 = vadd.f32 %v4057_v38, %v527_v11  ;;  %2389 = vmatpush.bf16.msrb.mxu1 %v4484_v45  ;;  %v3237_v11 = vld [vmem:[%s5759_s5 + $0x8] sm:$0xf0]  ;;  %v4518_v30 = vor.u32 %v3393_v12, %v3301_v3  ;;  %v1476_v13 = vmax.f32 %v1253_v15, 0.0 }
 0x2c9   :  { %5866 = vst [vmem:[#allocation42_spill] sm:$0xff] %v4493_v58  ;;  %v4512_v26 = vor.u32 %v3377_v36, %v3237_v11 }
 0x2ca   :  { %v1477_v56 = vmax.f32 %v996_v43, 0.0  ;;  %5869 = vst [vmem:[#allocation45_spill] sm:$0xff] %v4518_v30 }
 0x2cb   :  { %v529_v41 = vpop.f32.mrf.mxu0  ;;  %2648 = vmatpush.bf16.msrb.mxu2 %v4493_v58  ;;  %5868 = vst [vmem:[#allocation44_spill] sm:$0xff] %v4512_v26  ;;  %v669_v58 = vmax.f32 %v528_v31, 0.0 }
 0x2cc   :  { %v530_v6 = vadd.f32 %v4057_v38, %v529_v41  ;;  %v4508_v43 = vpack.c.bf16 %v1477_v56, %v1475_v53  ;;  %v4510_v41 = vpop.f32.mrf.mxu3  ;;  %2390 = vmatpush.bf16.msrb.mxu1 %v4512_v26 }
 0x2cd   :  { %v1254_v28 = vpop.f32.mrf.mxu2 }
 0x2ce   :  { %5867 = vst [vmem:[#allocation43_spill] sm:$0xff] %v4508_v43  ;;  %v670_v45 = vmax.f32 %v530_v6, 0.0  ;;  %v1255_v52 = vadd.f32 %v1254_v28, %v3796_v62 }
 0x2cf   :  { %v998_v57 = vpop.f32.mrf.mxu1  ;;  %2649 = vmatpush.bf16.msrb.mxu2 %v4518_v30 }
 0x2d0   :  { %v1478_v54 = vmax.f32 %v1255_v52, 0.0  ;;  %v733_v56 = vpack.c.bf16 %v670_v45, %v669_v58  ;;  %v999_v31 = vadd.f32 %v998_v57, %v3792_v55 }
 0x2d2   :  { %1037 = vmatmul.bf16.gmra.mxu1 %v733_v56  ;;  %1296 = vmatmul.bf16.gmra.mxu2 %v733_v56  ;;  %v4522_v53 = vpack.c.bf16 %v1478_v54, %v1476_v13  ;;  %v1479_v52 = vmax.f32 %v999_v31, 0.0 }
 0x2d3   :  { %v532_v36 = vpop.f32.mrf.mxu0 }
 0x2d4   :  { %5870 = vst [vmem:[#allocation46_spill] sm:$0xff] %v4522_v53  ;;  %v4526_v12 = vpop.f32.mrf.mxu3  ;;  %v533_v58 = vadd.f32 %v4057_v38, %v532_v36 }
 0x2d5   :  { %v1257_v11 = vpop.f32.mrf.mxu2 }
 0x2d6   :  { %2162 = vmatmul.bf16.gmra.mxu0 %v3913_v25  ;;  %v1258_v3 = vadd.f32 %v1257_v11, %v3796_v62  ;;  %v671_v57 = vmax.f32 %v533_v58, 0.0 }
 0x2d7   :  { %v1000_v6 = vpop.f32.mrf.mxu1 }
 0x2d8   :  { %v1001_v15 = vadd.f32 %v1000_v6, %v3792_v55  ;;  %v1480_v53 = vmax.f32 %v1258_v3, 0.0 }
 0x2da   :  { %v1481_v45 = vmax.f32 %v1001_v15, 0.0 }
 0x2db   :  { %v534_v28 = vpop.f32.mrf.mxu0 }
 0x2dc   :  { %v535_v54 = vadd.f32 %v4057_v38, %v534_v28  ;;  %v4532_v13 = vpack.c.bf16 %v1481_v45, %v1479_v52  ;;  %v4535_v31 = vpop.f32.mrf.mxu3 }
 0x2dd   :  { %v1259_v56 = vpop.f32.mrf.mxu2 }
 0x2de   :  { %5871 = vst [vmem:[#allocation47_spill] sm:$0xff] %v4532_v13  ;;  %v672_v43 = vmax.f32 %v535_v54, 0.0  ;;  %v1260_v30 = vadd.f32 %v1259_v56, %v3796_v62 }
 0x2df   :  { %v1003_v26 = vpop.f32.mrf.mxu1 }
 0x2e0   :  { %v1482_v14 = vmax.f32 %v1260_v30, 0.0  ;;  %v734_v6 = vpack.c.bf16 %v672_v43, %v671_v57  ;;  %v1004_v52 = vadd.f32 %v1003_v26, %v3792_v55 }
 0x2e2   :  { %1042 = vmatmul.bf16.gmra.mxu1 %v734_v6  ;;  %1301 = vmatmul.bf16.gmra.mxu2 %v734_v6  ;;  %v4537_v36 = vpack.c.bf16 %v1482_v14, %v1480_v53  ;;  %v1483_v28 = vmax.f32 %v1004_v52, 0.0  ;;  %v4549_v14 = vld [vmem:[%s5756_s2] ss:$0 sm:$0xff] }
 0x2e3   :  { %v537_v11 = vpop.f32.mrf.mxu0 }
 0x2e4   :  { %5872 = vst [vmem:[#allocation48_spill] sm:$0xff] %v4537_v36  ;;  %v538_v3 = vadd.f32 %v4057_v38, %v537_v11  ;;  %v4543_v54 = vpop.f32.mrf.mxu3 }
 0x2e5   :  { %v1262_v15 = vpop.f32.mrf.mxu2 }
 0x2e6   :  { %2167 = vmatmul.bf16.gmra.mxu0 %v3930_v61  ;;  %v1263_v56 = vadd.f32 %v1262_v15, %v3796_v62  ;;  %v673_v6 = vmax.f32 %v538_v3, 0.0 }
 0x2e7   :  { %v1005_v58 = vpop.f32.mrf.mxu1 }
 0x2e8   :  { %v1006_v45 = vadd.f32 %v1005_v58, %v3792_v55  ;;  %v1484_v58 = vmax.f32 %v1263_v56, 0.0 }
 0x2ea   :  { %v1485_v30 = vmax.f32 %v1006_v45, 0.0 }
 0x2eb   :  { %v539_v43 = vpop.f32.mrf.mxu0 }
 0x2ec   :  { %v540_v26 = vadd.f32 %v4549_v14, %v539_v43  ;;  %v4552_v53 = vpack.c.bf16 %v1485_v30, %v1483_v28  ;;  %v4564_v3 = vpop.f32.mrf.mxu3 }
 0x2ed   :  { %v1264_v57 = vpop.f32.mrf.mxu2 }
 0x2ee   :  { %5873 = vst [vmem:[#allocation49_spill] sm:$0xff] %v4552_v53  ;;  %v674_v52 = vmax.f32 %v540_v26, 0.0  ;;  %v1265_v38 = vadd.f32 %v1264_v57, %v3796_v62  ;;  %v543_v26 = vadd.f32 %v4549_v14, %v4354_v23  ;;  %v545_v57 = vadd.f32 %v4549_v14, %v4359_v48 }
 0x2ef   :  { %v1008_v11 = vpop.f32.mrf.mxu1 }
 0x2f0   :  { %v1486_v45 = vmax.f32 %v1265_v38, 0.0  ;;  %v4555_v13 = vpack.c.bf16 %v674_v52, %v673_v6  ;;  %v1009_v43 = vadd.f32 %v1008_v11, %v3792_v55 }
 0x2f2   :  { %1047 = vmatmul.bf16.vlgmr.msrb.gmra.mxu3 %v4555_v13  ;;  %2391 = vmatmul.bf16.vlgmr.msrb.gmra.mxu1 %v3801_v7  ;;  %v4559_v15 = vpack.c.bf16 %v1486_v45, %v1484_v58  ;;  %v1487_v52 = vmax.f32 %v1009_v43, 0.0  ;;  %v675_v58 = vmax.f32 %v543_v26, 0.0  ;;  %v676_v45 = vmax.f32 %v545_v57, 0.0 }
 0x2f3   :  { %2650 = vmatmul.bf16.vlgmr.msrb.gmra.mxu2 %v3811_v20  ;;  %v4562_v28 = vpop.f32.mrf.mxu0 }
 0x2f4   :  { %5874 = vst [vmem:[#allocation50_spill] sm:$0xff] %v4559_v15  ;;  %v4579_v23 = vpop.f32.mrf.mxu3  ;;  %v4581_v60 = vpack.c.bf16 %v676_v45, %v675_v58 }
 0x2f5   :  { %5875 = vst [vmem:[#allocation51_spill] sm:$0xff] %v4562_v28  ;;  %v1267_v30 = vpop.f32.mrf.mxu2 }
 0x2f6   :  { %2172 = vmatmul.bf16.gmra.mxu0 %v3947_v39  ;;  %v1268_v28 = vadd.f32 %v1267_v30, %v3796_v62 }
 0x2f7   :  { %v1010_v56 = vpop.f32.mrf.mxu1 }
 0x2f8   :  { %v1011_v6 = vadd.f32 %v1010_v56, %v3792_v55  ;;  %v1488_v36 = vmax.f32 %v1268_v28, 0.0  ;;  %v550_v28 = vadd.f32 %v4549_v14, %v4396_v5 }
 0x2fa   :  { %v1489_v20 = vmax.f32 %v1011_v6, 0.0  ;;  %v678_v58 = vmax.f32 %v550_v28, 0.0 }
 0x2fb   :  { %v4573_v38 = vpop.f32.mrf.mxu0 }
 0x2fc   :  { %5876 = vst [vmem:[#allocation52_spill] sm:$0xff] %v4573_v38  ;;  %v4576_v11 = vpack.c.bf16 %v1489_v20, %v1487_v52 }
 0x2fd   :  { %v1269_v53 = vpop.f32.mrf.mxu2 }
 0x2fe   :  { %5877 = vst [vmem:[#allocation53_spill] sm:$0xff] %v4576_v11  ;;  %v1270_v7 = vadd.f32 %v1269_v53, %v3796_v62 }
 0x2ff   :  { %v1013_v15 = vpop.f32.mrf.mxu1 }
 0x300   :  { %v1490_v48 = vmax.f32 %v1270_v7, 0.0  ;;  %v1014_v53 = vadd.f32 %v1013_v15, %v3792_v55  ;;  %v548_v7 = vadd.f32 %v4549_v14, %v4377_v22 }
 0x302   :  { %1052 = vmatmul.bf16.gmra.mxu3 %v4581_v60  ;;  %2396 = vmatmul.bf16.gmra.mxu1 %v3819_v35  ;;  %v4585_v43 = vpack.c.bf16 %v1490_v48, %v1488_v36  ;;  %v4597_v36 = vpop.f32.mrf.mxu3  ;;  %v1491_v6 = vmax.f32 %v1014_v53, 0.0  ;;  %v677_v20 = vmax.f32 %v548_v7, 0.0 }
 0x303   :  { %2655 = vmatmul.bf16.gmra.mxu2 %v3828_v49  ;;  %v4588_v30 = vpop.f32.mrf.mxu0 }
 0x304   :  { %5878 = vst [vmem:[#allocation54_spill] sm:$0xff] %v4588_v30  ;;  %v4605_v11 = vpack.c.bf16 %v678_v58, %v677_v20 }
 0x305   :  { %v1272_v56 = vpop.f32.mrf.mxu2 }
 0x306   :  { %2177 = vmatmul.bf16.gmra.mxu0 %v3964_v16  ;;  %v1273_v15 = vadd.f32 %v1272_v56, %v3796_v62 }
 0x307   :  { %v1015_v26 = vpop.f32.mrf.mxu1 }
 0x308   :  { %v1016_v57 = vadd.f32 %v1015_v26, %v3792_v55  ;;  %v1492_v38 = vmax.f32 %v1273_v15, 0.0 }
 0x30a   :  { %v1493_v49 = vmax.f32 %v1016_v57, 0.0  ;;  %v4614_v56 = vpop.f32.mrf.mxu3 }
 0x30b   :  { %v4599_v52 = vpop.f32.mrf.mxu0 }
 0x30c   :  { %5879 = vst [vmem:[#allocation55_spill] sm:$0xff] %v4599_v52  ;;  %v4602_v45 = vpack.c.bf16 %v1493_v49, %v1491_v6  ;;  %v553_v6 = vadd.f32 %v4549_v14, %v4453_v9  ;;  %v555_v49 = vadd.f32 %v4549_v14, %v4510_v41 }
 0x30d   :  { %v1274_v48 = vpop.f32.mrf.mxu2 }
 0x30e   :  { %5880 = vst [vmem:[#allocation56_spill] sm:$0xff] %v4602_v45  ;;  %v1275_v22 = vadd.f32 %v1274_v48, %v3796_v62  ;;  %v679_v15 = vmax.f32 %v553_v6, 0.0  ;;  %v680_v48 = vmax.f32 %v555_v49, 0.0 }
 0x30f   :  { %v1018_v30 = vpop.f32.mrf.mxu1 }
 0x310   :  { %v1494_v5 = vmax.f32 %v1275_v22, 0.0  ;;  %v1019_v28 = vadd.f32 %v1018_v30, %v3792_v55 }
 0x312   :  { %1057 = vmatmul.bf16.gmra.mxu3 %v4605_v11  ;;  %2401 = vmatmul.bf16.gmra.mxu1 %v3836_v2  ;;  %v4609_v53 = vpack.c.bf16 %v1494_v5, %v1492_v38  ;;  %v1495_v20 = vmax.f32 %v1019_v28, 0.0  ;;  %v4631_v2 = vpack.c.bf16 %v680_v48, %v679_v15 }
 0x313   :  { %2660 = vmatmul.bf16.gmra.mxu2 %v3845_v17  ;;  %v4612_v26 = vpop.f32.mrf.mxu0 }
 0x314   :  { %5881 = vst [vmem:[#allocation57_spill] sm:$0xff] %v4612_v26  ;;  %v4628_v26 = vpop.f32.mrf.mxu3 }
 0x315   :  { %v1277_v7 = vpop.f32.mrf.mxu2 }
 0x316   :  { %2182 = vmatmul.bf16.gmra.mxu0 %v3981_v63  ;;  %v1278_v22 = vadd.f32 %v1277_v7, %v3796_v62 }
 0x317   :  { %v1020_v57 = vpop.f32.mrf.mxu1 }
 0x318   :  { %v1021_v38 = vadd.f32 %v1020_v57, %v3792_v55  ;;  %v1496_v45 = vmax.f32 %v1278_v22, 0.0 }
 0x31a   :  { %v1497_v17 = vmax.f32 %v1021_v38, 0.0 }
 0x31b   :  { %v4623_v58 = vpop.f32.mrf.mxu0 }
 0x31c   :  { %5882 = vst [vmem:[#allocation58_spill] sm:$0xff] %v4623_v58  ;;  %v4626_v30 = vpack.c.bf16 %v1497_v17, %v1495_v20  ;;  %v4642_v38 = vpop.f32.mrf.mxu3  ;;  %v558_v20 = vadd.f32 %v4549_v14, %v4526_v12  ;;  %v560_v17 = vadd.f32 %v4549_v14, %v4535_v31 }
 0x31d   :  { %v1279_v5 = vpop.f32.mrf.mxu2 }
 0x31e   :  { %5883 = vst [vmem:[#allocation59_spill] sm:$0xff] %v4626_v30  ;;  %v1280_v9 = vadd.f32 %v1279_v5, %v3796_v62  ;;  %v681_v22 = vmax.f32 %v558_v20, 0.0  ;;  %v682_v5 = vmax.f32 %v560_v17, 0.0  ;;  %v563_v17 = vadd.f32 %v4549_v14, %v4543_v54 }
 0x31f   :  { %v1023_v52 = vpop.f32.mrf.mxu1 }
 0x320   :  { %v1498_v41 = vmax.f32 %v1280_v9, 0.0  ;;  %v1024_v6 = vadd.f32 %v1023_v52, %v3792_v55 }
 0x322   :  { %1062 = vmatmul.bf16.gmra.mxu3 %v4631_v2  ;;  %2406 = vmatmul.bf16.gmra.mxu1 %v3853_v32  ;;  %v4635_v28 = vpack.c.bf16 %v1498_v41, %v1496_v45  ;;  %v1499_v15 = vmax.f32 %v1024_v6, 0.0  ;;  %v4655_v32 = vpack.c.bf16 %v682_v5, %v681_v22  ;;  %v683_v5 = vmax.f32 %v563_v17, 0.0 }
 0x323   :  { %2665 = vmatmul.bf16.gmra.mxu2 %v3862_v47  ;;  %v4638_v7 = vpop.f32.mrf.mxu0 }
 0x324   :  { %5884 = vst [vmem:[#allocation60_spill] sm:$0xff] %v4638_v7  ;;  %v4657_v31 = vpop.f32.mrf.mxu3 }
 0x325   :  { %v1282_v57 = vpop.f32.mrf.mxu2 }
 0x326   :  { %2187 = vmatmul.bf16.gmra.mxu0 %v3998_v46  ;;  %v1283_v52 = vadd.f32 %v1282_v57, %v3796_v62 }
 0x327   :  { %v1025_v49 = vpop.f32.mrf.mxu1 }
 0x328   :  { %v1026_v45 = vadd.f32 %v1025_v49, %v3792_v55  ;;  %v1500_v12 = vmax.f32 %v1283_v52, 0.0 }
 0x32a   :  { %v1501_v47 = vmax.f32 %v1026_v45, 0.0  ;;  %v565_v45 = vadd.f32 %v4549_v14, %v4564_v3 }
 0x32b   :  { %v4649_v48 = vpop.f32.mrf.mxu0 }
 0x32c   :  { %5885 = vst [vmem:[#allocation61_spill] sm:$0xff] %v4649_v48  ;;  %v4652_v9 = vpack.c.bf16 %v1501_v47, %v1499_v15  ;;  %v684_v52 = vmax.f32 %v565_v45, 0.0 }
 0x32d   :  { %v1284_v41 = vpop.f32.mrf.mxu2 }
 0x32e   :  { %5886 = vst [vmem:[#allocation62_spill] sm:$0xff] %v4652_v9  ;;  %v1285_v7 = vadd.f32 %v1284_v41, %v3796_v62  ;;  %v4681_v9 = vpack.c.bf16 %v684_v52, %v683_v5 }
 0x32f   :  { %v1028_v58 = vpop.f32.mrf.mxu1 }
 0x330   :  { %v1502_v30 = vmax.f32 %v1285_v7, 0.0  ;;  %v1029_v20 = vadd.f32 %v1028_v58, %v3792_v55 }
 0x332   :  { %1067 = vmatmul.bf16.gmra.mxu3 %v4655_v32  ;;  %2411 = vmatmul.bf16.gmra.mxu1 %v3870_v1  ;;  %v4661_v6 = vpack.c.bf16 %v1502_v30, %v1500_v12  ;;  %v1503_v30 = vmax.f32 %v1029_v20, 0.0 }
 0x333   :  { %2670 = vmatmul.bf16.gmra.mxu2 %v3879_v18  ;;  %v4664_v57 = vpop.f32.mrf.mxu0  ;;  %v4675_v18 = vpop.f32.mrf.mxu3 }
 0x334   :  { %5887 = vst [vmem:[#allocation63_spill] sm:$0xff] %v4664_v57 }
 0x335   :  { %v1287_v49 = vpop.f32.mrf.mxu2 }
 0x336   :  { %2192 = vmatmul.bf16.gmra.mxu0 %v4015_v33  ;;  %v1288_v58 = vadd.f32 %v1287_v49, %v3796_v62 }
 0x337   :  { %v1030_v7 = vpop.f32.mrf.mxu1 }
 0x338   :  { %v1031_v15 = vadd.f32 %v1030_v7, %v3792_v55  ;;  %v1504_v48 = vmax.f32 %v1288_v58, 0.0 }
 0x33a   :  { %v1505_v47 = vmax.f32 %v1031_v15, 0.0 }
 0x33b   :  { %v4673_v22 = vpop.f32.mrf.mxu0  ;;  %v4690_v49 = vpop.f32.mrf.mxu3 }
 0x33c   :  { %5888 = vst [vmem:[#allocation64_spill] sm:$0xff] %v4673_v22  ;;  %v4678_v41 = vpack.c.bf16 %v1505_v47, %v1503_v30  ;;  %v568_v30 = vadd.f32 %v4549_v14, %v4579_v23  ;;  %v570_v47 = vadd.f32 %v4549_v14, %v4597_v36 }
 0x33d   :  { %v1289_v12 = vpop.f32.mrf.mxu2 }
 0x33e   :  { %5889 = vst [vmem:[#allocation65_spill] sm:$0xff] %v4678_v41  ;;  %v1290_v54 = vadd.f32 %v1289_v12, %v3796_v62  ;;  %v685_v58 = vmax.f32 %v568_v30, 0.0  ;;  %v686_v12 = vmax.f32 %v570_v47, 0.0 }
 0x33f   :  { %v1033_v57 = vpop.f32.mrf.mxu1 }
 0x340   :  { %v1506_v3 = vmax.f32 %v1290_v54, 0.0  ;;  %v1034_v45 = vadd.f32 %v1033_v57, %v3792_v55 }
 0x342   :  { %1072 = vmatmul.bf16.gmra.mxu3 %v4681_v9  ;;  %2416 = vmatmul.bf16.gmra.mxu1 %v3887_v34  ;;  %v4685_v20 = vpack.c.bf16 %v1506_v3, %v1504_v48  ;;  %v1507_v5 = vmax.f32 %v1034_v45, 0.0  ;;  %v4707_v34 = vpack.c.bf16 %v686_v12, %v685_v58 }
 0x343   :  { %2675 = vmatmul.bf16.gmra.mxu2 %v3896_v51  ;;  %v4688_v7 = vpop.f32.mrf.mxu0  ;;  %v4705_v22 = vpop.f32.mrf.mxu3 }
 0x344   :  { %5890 = vst [vmem:[#allocation66_spill] sm:$0xff] %v4688_v7 }
 0x345   :  { %v1292_v17 = vpop.f32.mrf.mxu2 }
 0x346   :  { %2197 = vmatmul.bf16.gmra.mxu0 %v4032_v27  ;;  %v1293_v54 = vadd.f32 %v1292_v17, %v3796_v62 }
 0x347   :  { %v1035_v15 = vpop.f32.mrf.mxu1 }
 0x348   :  { %v1036_v48 = vadd.f32 %v1035_v15, %v3792_v55  ;;  %v1508_v41 = vmax.f32 %v1293_v54, 0.0 }
 0x34a   :  { %v1509_v51 = vmax.f32 %v1036_v48, 0.0  ;;  %v575_v48 = vadd.f32 %v4549_v14, %v4628_v26 }
 0x34b   :  { %v4699_v52 = vpop.f32.mrf.mxu0 }
 0x34c   :  { %5891 = vst [vmem:[#allocation67_spill] sm:$0xff] %v4699_v52  ;;  %v4702_v57 = vpack.c.bf16 %v1509_v51, %v1507_v5  ;;  %v688_v54 = vmax.f32 %v575_v48, 0.0 }
 0x34d   :  { %v1294_v3 = vpop.f32.mrf.mxu2 }
 0x34e   :  { %5892 = vst [vmem:[#allocation68_spill] sm:$0xff] %v4702_v57  ;;  %v1295_v7 = vadd.f32 %v1294_v3, %v3796_v62 }
 0x34f   :  { %v1038_v23 = vpop.f32.mrf.mxu1 }
 0x350   :  { %v1510_v36 = vmax.f32 %v1295_v7, 0.0  ;;  %v1039_v30 = vadd.f32 %v1038_v23, %v3792_v55  ;;  %v573_v7 = vadd.f32 %v4549_v14, %v4614_v56 }
 0x352   :  { %1077 = vmatmul.bf16.gmra.mxu3 %v4707_v34  ;;  %2421 = vmatmul.bf16.gmra.mxu1 %v3904_v8  ;;  %v4711_v45 = vpack.c.bf16 %v1510_v36, %v1508_v41  ;;  %v4723_v41 = vpop.f32.mrf.mxu3  ;;  %v1511_v51 = vmax.f32 %v1039_v30, 0.0  ;;  %v687_v12 = vmax.f32 %v573_v7, 0.0 }
 0x353   :  { %2680 = vmatmul.bf16.gmra.mxu2 %v3913_v25  ;;  %v4714_v17 = vpop.f32.mrf.mxu0 }
 0x354   :  { %5893 = vst [vmem:[#allocation69_spill] sm:$0xff] %v4714_v17  ;;  %v4731_v57 = vpack.c.bf16 %v688_v54, %v687_v12 }
 0x355   :  { %v1297_v15 = vpop.f32.mrf.mxu2 }
 0x356   :  { %2202 = vmatmul.bf16.gmra.mxu0 %v4049_v21  ;;  %v1298_v3 = vadd.f32 %v1297_v15, %v3796_v62 }
 0x357   :  { %v1040_v47 = vpop.f32.mrf.mxu1 }
 0x358   :  { %v1041_v5 = vadd.f32 %v1040_v47, %v3792_v55  ;;  %v1512_v52 = vmax.f32 %v1298_v3, 0.0 }
 0x35a   :  { %v1513_v25 = vmax.f32 %v1041_v5, 0.0  ;;  %v4737_v47 = vpop.f32.mrf.mxu3 }
 0x35b   :  { %v4725_v58 = vpop.f32.mrf.mxu0 }
 0x35c   :  { %5894 = vst [vmem:[#allocation70_spill] sm:$0xff] %v4725_v58  ;;  %v4728_v23 = vpack.c.bf16 %v1513_v25, %v1511_v51  ;;  %v578_v51 = vadd.f32 %v4549_v14, %v4642_v38  ;;  %v580_v25 = vadd.f32 %v4549_v14, %v4657_v31  ;;  %v1699_v31 = vld [vmem:[%s5760_s6] sm:$0x3] }
 0x35d   :  { %v1299_v36 = vpop.f32.mrf.mxu2 }
 0x35e   :  { %5895 = vst [vmem:[#allocation71_spill] sm:$0xff] %v4728_v23  ;;  %v1300_v56 = vadd.f32 %v1299_v36, %v3796_v62  ;;  %v690_v36 = vmax.f32 %v580_v25, 0.0 }
 0x35f   :  { %v1043_v17 = vpop.f32.mrf.mxu1 }
 0x360   :  { %v1514_v26 = vmax.f32 %v1300_v56, 0.0  ;;  %v1044_v48 = vadd.f32 %v1043_v17, %v3792_v55 }
 0x362   :  { %1082 = vmatmul.bf16.gmra.mxu3 %v4731_v57  ;;  %2426 = vmatmul.bf16.gmra.mxu1 %v3921_v42  ;;  %v4735_v30 = vpack.c.bf16 %v1514_v26, %v1512_v52  ;;  %v1515_v12 = vmax.f32 %v1044_v48, 0.0  ;;  %v4754_v26 = vpop.f32.mrf.mxu3 }
 0x363   :  { %2685 = vmatmul.bf16.gmra.mxu2 %v3930_v61  ;;  %v4740_v15 = vpop.f32.mrf.mxu0  ;;  %v689_v61 = vmax.f32 %v578_v51, 0.0  ;;  %v4762_v51 = vperm.slane %v1699_v31, 1 }
 0x364   :  { %5896 = vst [vmem:[#allocation72_spill] sm:$0xff] %v4740_v15 }
 0x365   :  { %v1302_v7 = vpop.f32.mrf.mxu2  ;;  %v4760_v58 = vpack.c.bf16 %v690_v36, %v689_v61 }
 0x366   :  { %2207 = vmatmul.bf16.gmra.mxu0 %v4077_v29  ;;  %v1303_v56 = vadd.f32 %v1302_v7, %v3796_v62 }
 0x367   :  { %v1045_v5 = vpop.f32.mrf.mxu1 }
 0x368   :  { %v1046_v52 = vadd.f32 %v1045_v5, %v3792_v55  ;;  %v1516_v48 = vmax.f32 %v1303_v56, 0.0  ;;  %v583_v56 = vadd.f32 %v4549_v14, %v4675_v18 }
 0x36a   :  { %v1517_v54 = vmax.f32 %v1046_v52, 0.0 }
 0x36b   :  { %v4749_v3 = vpop.f32.mrf.mxu0 }
 0x36c   :  { %5897 = vst [vmem:[#allocation73_spill] sm:$0xff] %v4749_v3  ;;  %v4752_v17 = vpack.c.bf16 %v1517_v54, %v1515_v12 }
 0x36d   :  { %v1304_v15 = vpop.f32.mrf.mxu2 }
 0x36e   :  { %5898 = vst [vmem:[#allocation74_spill] sm:$0xff] %v4752_v17  ;;  %v1305_v38 = vadd.f32 %v1304_v15, %v3796_v62 }
 0x36f   :  { %v2392_v5 = vpop.f32.mrf.mxu1 }
 0x370   :  { %v1518_v52 = vmax.f32 %v1305_v38, 0.0  ;;  %v2393_v25 = vadd.f32 %v2392_v5, %v4762_v51  ;;  %v585_v38 = vadd.f32 %v4549_v14, %v4690_v49 }
 0x372   :  { %1087 = vmatmul.bf16.gmra.mxu3 %v4760_v58  ;;  %2431 = vmatmul.bf16.gmra.mxu1 %v3938_v19  ;;  %v4766_v7 = vpack.c.bf16 %v1518_v52, %v1516_v48  ;;  %v692_v48 = vmax.f32 %v585_v38, 0.0 }
 0x373   :  { %2690 = vmatmul.bf16.gmra.mxu2 %v3947_v39  ;;  %v4769_v15 = vpop.f32.mrf.mxu0  ;;  %v691_v39 = vmax.f32 %v583_v56, 0.0 }
 0x374   :  { %5899 = vst [vmem:[#allocation75_spill] sm:$0xff] %v4769_v15 }
 0x375   :  { %v1048_v12 = vpop.f32.mrf.mxu3 }
 0x376   :  { %v2651_v54 = vpop.f32.mrf.mxu2  ;;  %2212 = vmatmul.bf16.gmra.mxu0 %v4109_v50  ;;  %v1049_v52 = vadd.f32 %v1048_v12, %v3792_v55 }
 0x377   :  { %v4773_v61 = vadd.f32 %v2651_v54, %v2393_v25  ;;  %v2394_v36 = vpop.f32.mrf.mxu1 }
 0x378   :  { %v2395_v5 = vadd.f32 %v2394_v36, %v4762_v51  ;;  %v1519_v23 = vmax.f32 %v1049_v52, 0.0 }
 0x379   :  { %5900 = vst [vmem:[#allocation76_spill] sm:$0xff] %v4773_v61  ;;  %v4786_v61 = vpack.c.bf16 %v692_v48, %v691_v39  ;;  %v588_v39 = vadd.f32 %v4549_v14, %v4705_v22 }
 0x37b   :  { %v4779_v31 = vpop.f32.mrf.mxu0 }
 0x37c   :  { %5901 = vst [vmem:[#allocation77_spill] sm:$0xff] %v4779_v31 }
 0x37d   :  { %v1050_v15 = vpop.f32.mrf.mxu3 }
 0x37e   :  { %v1051_v3 = vadd.f32 %v1050_v15, %v3792_v55  ;;  %v2653_v25 = vpop.f32.mrf.mxu2 }
 0x37f   :  { %v4784_v54 = vadd.f32 %v2653_v25, %v2395_v5  ;;  %v2397_v17 = vpop.f32.mrf.mxu1 }
 0x380   :  { %v1521_v18 = vmax.f32 %v1051_v3, 0.0  ;;  %v2398_v15 = vadd.f32 %v2397_v17, %v4762_v51 }
 0x382   :  { %1092 = vmatmul.bf16.gmra.mxu3 %v4786_v61  ;;  %2436 = vmatmul.bf16.gmra.mxu1 %v3955_v59  ;;  %v4790_v49 = vpack.c.bf16 %v1521_v18, %v1519_v23  ;;  %v590_v23 = vadd.f32 %v4549_v14, %v4723_v41  ;;  %v3291_v41 = vld [vmem:[%s5759_s5 + $0x70] sm:$0xf] }
 0x383   :  { %2695 = vmatmul.bf16.gmra.mxu2 %v3964_v16  ;;  %v4793_v12 = vpop.f32.mrf.mxu0  ;;  %v693_v16 = vmax.f32 %v588_v39, 0.0 }
 0x384   :  { %5902 = vst [vmem:[#allocation78_spill] sm:$0xff] %v4790_v49  ;;  %v694_v52 = vmax.f32 %v590_v23, 0.0 }
 0x385   :  { %5903 = vst [vmem:[#allocation79_spill] sm:$0xff] %v4793_v12  ;;  %v1053_v36 = vpop.f32.mrf.mxu3 }
 0x386   :  { %v2656_v56 = vpop.f32.mrf.mxu2  ;;  %2217 = vmatmul.bf16.gmra.mxu0 %v4149_v37  ;;  %v1054_v5 = vadd.f32 %v1053_v36, %v3792_v55  ;;  %v4810_v49 = vpack.c.bf16 %v694_v52, %v693_v16  ;;  %v3392_v36 = vld [vmem:[%s5759_s5 + $0x74] sm:$0xf0] }
 0x387   :  { %v4797_v38 = vadd.f32 %v2656_v56, %v2398_v15  ;;  %v2399_v3 = vpop.f32.mrf.mxu1  ;;  %v3292_v23 = vor.u32 %v3392_v36, %v3291_v41 }
 0x388   :  { %v2400_v17 = vadd.f32 %v2399_v3, %v4762_v51  ;;  %v1523_v31 = vmax.f32 %v1054_v5, 0.0 }
 0x389   :  { %1865 = vmatpush.bf16.msrb.mxu3 %v3292_v23 }
 0x38b   :  { %v4803_v48 = vpop.f32.mrf.mxu0 }
 0x38c   :  { %5904 = vst [vmem:[#allocation80_spill] sm:$0xff] %v4803_v48 }
 0x38d   :  { %v1055_v25 = vpop.f32.mrf.mxu3 }
 0x38e   :  { %v1056_v18 = vadd.f32 %v1055_v25, %v3792_v55  ;;  %v2658_v15 = vpop.f32.mrf.mxu2 }
 0x38f   :  { %v4808_v56 = vadd.f32 %v2658_v15, %v2400_v17  ;;  %v2402_v12 = vpop.f32.mrf.mxu1 }
 0x390   :  { %v1525_v22 = vmax.f32 %v1056_v18, 0.0  ;;  %v2403_v16 = vadd.f32 %v2402_v12, %v4762_v51  ;;  %v593_v18 = vadd.f32 %v4549_v14, %v4737_v47 }
 0x392   :  { %1097 = vmatmul.bf16.gmra.mxu3 %v4810_v49  ;;  %2441 = vmatmul.bf16.gmra.mxu1 %v3972_v40  ;;  %v4820_v3 = vpack.c.bf16 %v1525_v22, %v1523_v31  ;;  %v595_v31 = vadd.f32 %v4549_v14, %v4754_v26  ;;  %v695_v15 = vmax.f32 %v593_v18, 0.0 }
 0x393   :  { %2700 = vmatmul.bf16.gmra.mxu2 %v3981_v63  ;;  %v4823_v39 = vpop.f32.mrf.mxu0 }
 0x394   :  { %5905 = vst [vmem:[#allocation81_spill] sm:$0xff] %v4820_v3  ;;  %v696_v22 = vmax.f32 %v595_v31, 0.0 }
 0x395   :  { %5906 = vst [vmem:[#allocation82_spill] sm:$0xff] %v4823_v39  ;;  %v1058_v52 = vpop.f32.mrf.mxu3 }
 0x396   :  { %v2661_v5 = vpop.f32.mrf.mxu2  ;;  %2222 = vmatmul.bf16.gmra.mxu0 %v4193_v44  ;;  %v1059_v12 = vadd.f32 %v1058_v52, %v3792_v55  ;;  %v4840_v3 = vpack.c.bf16 %v696_v22, %v695_v15  ;;  %v3283_v22 = vld [vmem:[%s5759_s5 + $0x60] sm:$0xf] }
 0x397   :  { %v4827_v17 = vadd.f32 %v2661_v5, %v2403_v16  ;;  %v2404_v25 = vpop.f32.mrf.mxu1 }
 0x398   :  { %v2405_v41 = vadd.f32 %v2404_v25, %v4762_v51  ;;  %v1527_v48 = vmax.f32 %v1059_v12, 0.0 }
 0x39b   :  { %v4833_v63 = vpop.f32.mrf.mxu0 }
 0x39c   :  { %5907 = vst [vmem:[#allocation83_spill] sm:$0xff] %v4833_v63 }
 0x39d   :  { %v1060_v36 = vpop.f32.mrf.mxu3 }
 0x39e   :  { %v1061_v23 = vadd.f32 %v1060_v36, %v3792_v55  ;;  %v2663_v16 = vpop.f32.mrf.mxu2 }
 0x39f   :  { %v4838_v5 = vadd.f32 %v2663_v16, %v2405_v41  ;;  %v2407_v39 = vpop.f32.mrf.mxu1 }
 0x3a0   :  { %v1529_v47 = vmax.f32 %v1061_v23, 0.0  ;;  %v2408_v52 = vadd.f32 %v2407_v39, %v4762_v51 }
 0x3a2   :  { %1102 = vmatmul.bf16.gmra.mxu3 %v4840_v3  ;;  %2446 = vmatmul.bf16.gmra.mxu1 %v3989_v24  ;;  %v4844_v14 = vpack.c.bf16 %v1529_v47, %v1527_v48  ;;  %v3390_v48 = vld [vmem:[%s5759_s5 + $0x64] sm:$0xf0] }
 0x3a3   :  { %2705 = vmatmul.bf16.gmra.mxu2 %v3998_v46  ;;  %v4847_v26 = vpop.f32.mrf.mxu0  ;;  %v3284_v46 = vor.u32 %v3390_v48, %v3283_v22 }
 0x3a4   :  { %5908 = vst [vmem:[#allocation84_spill] sm:$0xff] %v4844_v14  ;;  %v5923_v14 = vld [vmem:[#allocation24_spill] sm:$0xff] }
 0x3a5   :  { %5909 = vst [vmem:[#allocation85_spill] sm:$0xff] %v4847_v26  ;;  %v1063_v25 = vpop.f32.mrf.mxu3  ;;  %1866 = vmatpush.bf16.msrb.mxu3 %v3284_v46 }
 0x3a6   :  { %v2666_v18 = vpop.f32.mrf.mxu2  ;;  %2227 = vmatmul.bf16.gmra.mxu0 %v4241_v0  ;;  %v1064_v39 = vadd.f32 %v1063_v25, %v3792_v55 }
 0x3a7   :  { %v4851_v31 = vadd.f32 %v2666_v18, %v2408_v52  ;;  %v2409_v15 = vpop.f32.mrf.mxu1 }
 0x3a8   :  { %v2410_v41 = vadd.f32 %v2409_v15, %v4762_v51  ;;  %v1531_v18 = vmax.f32 %v1064_v39, 0.0 }
 0x3ab   :  { %v4859_v12 = vpop.f32.mrf.mxu0 }
 0x3ac   :  { %5910 = vst [vmem:[#allocation86_spill] sm:$0xff] %v4859_v12 }
 0x3ad   :  { %v1065_v36 = vpop.f32.mrf.mxu3 }
 0x3ae   :  { %v1066_v23 = vadd.f32 %v1065_v36, %v3792_v55  ;;  %v2668_v16 = vpop.f32.mrf.mxu2 }
 0x3af   :  { %v4864_v47 = vadd.f32 %v2668_v16, %v2410_v41  ;;  %v2412_v52 = vpop.f32.mrf.mxu1 }
 0x3b0   :  { %v1533_v26 = vmax.f32 %v1066_v23, 0.0  ;;  %v2413_v15 = vadd.f32 %v2412_v52, %v4762_v51 }
 0x3b2   :  { %1306 = vmatmul.bf16.vlgmr.msra.gmra.mxu3 %v4555_v13  ;;  %2451 = vmatmul.bf16.gmra.mxu1 %v4006_v10  ;;  %v4868_v22 = vpack.c.bf16 %v1533_v26, %v1531_v18 }
 0x3b3   :  { %2710 = vmatmul.bf16.gmra.mxu2 %v4015_v33  ;;  %v4871_v25 = vpop.f32.mrf.mxu0 }
 0x3b4   :  { %5911 = vst [vmem:[#allocation87_spill] sm:$0xff] %v4868_v22 }
 0x3b5   :  { %5912 = vst [vmem:[#allocation88_spill] sm:$0xff] %v4871_v25  ;;  %v1068_v48 = vpop.f32.mrf.mxu3 }
 0x3b6   :  { %v2671_v46 = vpop.f32.mrf.mxu2  ;;  %2232 = vmatmul.bf16.gmra.mxu0 %v4265_v4  ;;  %v1069_v13 = vadd.f32 %v1068_v48, %v3792_v55  ;;  %v3388_v48 = vld [vmem:[%s5759_s5 + $0x54] sm:$0xf0] }
 0x3b7   :  { %v4875_v41 = vadd.f32 %v2671_v46, %v2413_v15  ;;  %v2414_v39 = vpop.f32.mrf.mxu1  ;;  %v5914_v15 = vld [vmem:[#allocation9_spill] sm:$0xff]  ;;  %v3275_v46 = vld [vmem:[%s5759_s5 + $0x50] sm:$0xf] }
 0x3b8   :  { %v2415_v26 = vadd.f32 %v2414_v39, %v4762_v51  ;;  %v1535_v25 = vmax.f32 %v1069_v13, 0.0  ;;  %v3276_v13 = vor.u32 %v3388_v48, %v3275_v46 }
 0x3ba   :  { %1867 = vmatpush.bf16.msrb.mxu3 %v3276_v13 }
 0x3bb   :  { %v4877_v36 = vpop.f32.mrf.mxu0 }
 0x3bc   :  { %5913 = vst [vmem:[#allocation89_spill] sm:$0xff] %v4877_v36 }
 0x3bd   :  { %v1070_v23 = vpop.f32.mrf.mxu3 }
 0x3be   :  { %v1071_v33 = vadd.f32 %v1070_v23, %v3792_v55  ;;  %v2673_v16 = vpop.f32.mrf.mxu2 }
 0x3bf   :  { %v4882_v18 = vadd.f32 %v2673_v16, %v2415_v26  ;;  %v2417_v52 = vpop.f32.mrf.mxu1  ;;  %v5917_v16 = vld [vmem:[#allocation21_spill] sm:$0xff] }
 0x3c0   :  { %v1537_v12 = vmax.f32 %v1071_v33, 0.0  ;;  %v2418_v23 = vadd.f32 %v2417_v52, %v4762_v51 }
 0x3c2   :  { %1311 = vmatmul.bf16.gmra.mxu3 %v4581_v60  ;;  %2456 = vmatmul.bf16.gmra.mxu1 %v5914_v15  ;;  %v4892_v39 = vpack.c.bf16 %v1537_v12, %v1535_v25 }
 0x3c3   :  { %2715 = vmatmul.bf16.gmra.mxu2 %v4032_v27  ;;  %v4895_v26 = vpop.f32.mrf.mxu0 }
 0x3c4   :  { %5915 = vst [vmem:[#allocation9_spill] sm:$0xff] %v4892_v39 }
 0x3c5   :  { %5916 = vst [vmem:[#allocation90_spill] sm:$0xff] %v4895_v26  ;;  %v1073_v60 = vpop.f32.mrf.mxu3 }
 0x3c6   :  { %v2676_v33 = vpop.f32.mrf.mxu2  ;;  %2237 = vmatmul.bf16.gmra.mxu0 %v5917_v16  ;;  %v1074_v12 = vadd.f32 %v1073_v60, %v3792_v55 }
 0x3c7   :  { %v4899_v36 = vadd.f32 %v2676_v33, %v2418_v23  ;;  %v2419_v63 = vpop.f32.mrf.mxu1  ;;  %v5920_v23 = vld [vmem:[#allocation10_spill] sm:$0xff] }
 0x3c8   :  { %v2420_v25 = vadd.f32 %v2419_v63, %v4762_v51  ;;  %v1539_v13 = vmax.f32 %v1074_v12, 0.0 }
 0x3cb   :  { %v4901_v22 = vpop.f32.mrf.mxu0 }
 0x3cc   :  { %5918 = vst [vmem:[#allocation21_spill] sm:$0xff] %v4901_v22 }
 0x3cd   :  { %v1075_v27 = vpop.f32.mrf.mxu3 }
 0x3ce   :  { %v1076_v26 = vadd.f32 %v1075_v27, %v3792_v55  ;;  %v2678_v46 = vpop.f32.mrf.mxu2 }
 0x3cf   :  { %v4906_v48 = vadd.f32 %v2678_v46, %v2420_v25  ;;  %v2422_v52 = vpop.f32.mrf.mxu1 }
 0x3d0   :  { %v1541_v39 = vmax.f32 %v1076_v26, 0.0  ;;  %v2423_v63 = vadd.f32 %v2422_v52, %v4762_v51 }
 0x3d1   :  { %5919 = vst [vmem:[#allocation91_spill] sm:$0xff] %v4906_v48  ;;  %v5926_v48 = vld [vmem:[#allocation11_spill] sm:$0xff] }
 0x3d2   :  { %1316 = vmatmul.bf16.gmra.mxu3 %v4605_v11  ;;  %2461 = vmatmul.bf16.gmra.mxu1 %v5920_v23  ;;  %v4910_v33 = vpack.c.bf16 %v1541_v39, %v1539_v13  ;;  %v3267_v11 = vld [vmem:[%s5759_s5 + $0x40] sm:$0xf]  ;;  %v3386_v39 = vld [vmem:[%s5759_s5 + $0x44] sm:$0xf0] }
 0x3d3   :  { %2720 = vmatmul.bf16.gmra.mxu2 %v4049_v21  ;;  %v4913_v60 = vpop.f32.mrf.mxu0  ;;  %v3268_v21 = vor.u32 %v3386_v39, %v3267_v11 }
 0x3d4   :  { %5921 = vst [vmem:[#allocation92_spill] sm:$0xff] %v4910_v33 }
 0x3d5   :  { %5922 = vst [vmem:[#allocation93_spill] sm:$0xff] %v4913_v60  ;;  %v1078_v22 = vpop.f32.mrf.mxu3  ;;  %1868 = vmatpush.bf16.msrb.mxu3 %v3268_v21 }
 0x3d6   :  { %v2681_v27 = vpop.f32.mrf.mxu2  ;;  %2242 = vmatmul.bf16.gmra.mxu0 %v5923_v14  ;;  %v1079_v46 = vadd.f32 %v1078_v22, %v3792_v55 }
 0x3d7   :  { %v4917_v25 = vadd.f32 %v2681_v27, %v2423_v63  ;;  %v2424_v12 = vpop.f32.mrf.mxu1 }
 0x3d8   :  { %v2425_v52 = vadd.f32 %v2424_v12, %v4762_v51 }
 0x3d9   :  { %5924 = vst [vmem:[#allocation24_spill] sm:$0xff] %v4917_v25  ;;  %v1543_v25 = vmax.f32 %v1079_v46, 0.0 }
 0x3db   :  { %v4925_v26 = vpop.f32.mrf.mxu0 }
 0x3dc   :  { %5925 = vst [vmem:[#allocation94_spill] sm:$0xff] %v4925_v26 }
 0x3dd   :  { %v1080_v13 = vpop.f32.mrf.mxu3 }
 0x3de   :  { %v1081_v63 = vadd.f32 %v1080_v13, %v3792_v55  ;;  %v2683_v27 = vpop.f32.mrf.mxu2  ;;  %v5929_v13 = vld [vmem:[#allocation26_spill] sm:$0xff] }
 0x3df   :  { %v4930_v60 = vadd.f32 %v2683_v27, %v2425_v52  ;;  %v2427_v33 = vpop.f32.mrf.mxu1 }
 0x3e0   :  { %v1545_v23 = vmax.f32 %v1081_v63, 0.0  ;;  %v2428_v12 = vadd.f32 %v2427_v33, %v4762_v51 }
 0x3e2   :  { %1321 = vmatmul.bf16.gmra.mxu3 %v4631_v2  ;;  %2466 = vmatmul.bf16.gmra.mxu1 %v5926_v48  ;;  %v4934_v11 = vpack.c.bf16 %v1545_v23, %v1543_v25 }
 0x3e3   :  { %2725 = vmatmul.bf16.gmra.mxu2 %v4077_v29  ;;  %v4937_v22 = vpop.f32.mrf.mxu0 }
 0x3e4   :  { %5927 = vst [vmem:[#allocation11_spill] sm:$0xff] %v4934_v11 }
 0x3e5   :  { %5928 = vst [vmem:[#allocation95_spill] sm:$0xff] %v4937_v22  ;;  %v1083_v39 = vpop.f32.mrf.mxu3 }
 0x3e6   :  { %v2686_v21 = vpop.f32.mrf.mxu2  ;;  %2247 = vmatmul.bf16.gmra.mxu0 %v5929_v13  ;;  %v1084_v2 = vadd.f32 %v1083_v39, %v3792_v55  ;;  %v3384_v39 = vld [vmem:[%s5759_s5 + $0x34] sm:$0xf0] }
 0x3e7   :  { %v4941_v52 = vadd.f32 %v2686_v21, %v2428_v12  ;;  %v2429_v46 = vpop.f32.mrf.mxu1  ;;  %v5932_v12 = vld [vmem:[#allocation12_spill] sm:$0xff]  ;;  %v3259_v21 = vld [vmem:[%s5759_s5 + $0x30] sm:$0xf] }
 0x3e8   :  { %v2430_v23 = vadd.f32 %v2429_v46, %v4762_v51  ;;  %v1547_v26 = vmax.f32 %v1084_v2, 0.0  ;;  %v3260_v2 = vor.u32 %v3384_v39, %v3259_v21 }
 0x3ea   :  { %1869 = vmatpush.bf16.msrb.mxu3 %v3260_v2 }
 0x3eb   :  { %v4943_v63 = vpop.f32.mrf.mxu0 }
 0x3ec   :  { %5930 = vst [vmem:[#allocation26_spill] sm:$0xff] %v4943_v63 }
 0x3ed   :  { %v1085_v25 = vpop.f32.mrf.mxu3 }
 0x3ee   :  { %v1086_v29 = vadd.f32 %v1085_v25, %v3792_v55  ;;  %v2688_v27 = vpop.f32.mrf.mxu2 }
 0x3ef   :  { %v4948_v22 = vadd.f32 %v2688_v27, %v2430_v23  ;;  %v2432_v33 = vpop.f32.mrf.mxu1  ;;  %v5935_v27 = vld [vmem:[#allocation28_spill] sm:$0xff] }
 0x3f0   :  { %v1549_v11 = vmax.f32 %v1086_v29, 0.0  ;;  %v2433_v25 = vadd.f32 %v2432_v33, %v4762_v51 }
 0x3f1   :  { %5931 = vst [vmem:[#allocation96_spill] sm:$0xff] %v4948_v22 }
 0x3f2   :  { %1326 = vmatmul.bf16.gmra.mxu3 %v4655_v32  ;;  %2471 = vmatmul.bf16.gmra.mxu1 %v5932_v12  ;;  %v4958_v46 = vpack.c.bf16 %v1549_v11, %v1547_v26 }
 0x3f3   :  { %2730 = vmatmul.bf16.gmra.mxu2 %v4109_v50  ;;  %v4961_v23 = vpop.f32.mrf.mxu0 }
 0x3f4   :  { %5933 = vst [vmem:[#allocation97_spill] sm:$0xff] %v4958_v46 }
 0x3f5   :  { %5934 = vst [vmem:[#allocation98_spill] sm:$0xff] %v4961_v23  ;;  %v1088_v32 = vpop.f32.mrf.mxu3 }
 0x3f6   :  { %v2691_v29 = vpop.f32.mrf.mxu2  ;;  %2252 = vmatmul.bf16.gmra.mxu0 %v5935_v27  ;;  %v1089_v26 = vadd.f32 %v1088_v32, %v3792_v55 }
 0x3f7   :  { %v4965_v63 = vadd.f32 %v2691_v29, %v2433_v25  ;;  %v2434_v12 = vpop.f32.mrf.mxu1  ;;  %v5939_v25 = vld [vmem:[#allocation15_spill] sm:$0xff] }
 0x3f8   :  { %v2435_v11 = vadd.f32 %v2434_v12, %v4762_v51  ;;  %v1551_v2 = vmax.f32 %v1089_v26, 0.0 }
 0x3f9   :  { %5936 = vst [vmem:[#allocation28_spill] sm:$0xff] %v4965_v63  ;;  %v5942_v63 = vld [vmem:[#allocation30_spill] sm:$0xff] }
 0x3fb   :  { %v4967_v22 = vpop.f32.mrf.mxu0 }
 0x3fc   :  { %5937 = vst [vmem:[#allocation99_spill] sm:$0xff] %v4967_v22 }
 0x3fd   :  { %v1090_v50 = vpop.f32.mrf.mxu3 }
 0x3fe   :  { %v1091_v23 = vadd.f32 %v1090_v50, %v3792_v55  ;;  %v2693_v21 = vpop.f32.mrf.mxu2 }
 0x3ff   :  { %v4972_v39 = vadd.f32 %v2693_v21, %v2435_v11  ;;  %v2437_v33 = vpop.f32.mrf.mxu1 }
 0x400   :  { %v1553_v46 = vmax.f32 %v1091_v23, 0.0  ;;  %v2438_v12 = vadd.f32 %v2437_v33, %v4762_v51 }
 0x401   :  { %5938 = vst [vmem:[#allocation100_spill] sm:$0xff] %v4972_v39  ;;  %v5945_v39 = vld [vmem:[#allocation16_spill] sm:$0xff] }
 0x402   :  { %1331 = vmatmul.bf16.gmra.mxu3 %v4681_v9  ;;  %2476 = vmatmul.bf16.gmra.mxu1 %v5939_v25  ;;  %v4976_v29 = vpack.c.bf16 %v1553_v46, %v1551_v2  ;;  %v3251_v9 = vld [vmem:[%s5759_s5 + $0x20] sm:$0xf]  ;;  %v3382_v46 = vld [vmem:[%s5759_s5 + $0x24] sm:$0xf0] }
 0x403   :  { %2735 = vmatmul.bf16.gmra.mxu2 %v4149_v37  ;;  %v4979_v32 = vpop.f32.mrf.mxu0  ;;  %v3252_v37 = vor.u32 %v3382_v46, %v3251_v9 }
 0x404   :  { %5940 = vst [vmem:[#allocation101_spill] sm:$0xff] %v4976_v29 }
 0x405   :  { %5941 = vst [vmem:[#allocation102_spill] sm:$0xff] %v4979_v32  ;;  %v1093_v22 = vpop.f32.mrf.mxu3  ;;  %1870 = vmatpush.bf16.msrb.mxu3 %v3252_v37 }
 0x406   :  { %v2696_v50 = vpop.f32.mrf.mxu2  ;;  %2257 = vmatmul.bf16.gmra.mxu0 %v5942_v63  ;;  %v1094_v21 = vadd.f32 %v1093_v22, %v3792_v55 }
 0x407   :  { %v4983_v11 = vadd.f32 %v2696_v50, %v2438_v12  ;;  %v2439_v26 = vpop.f32.mrf.mxu1 }
 0x408   :  { %v2440_v33 = vadd.f32 %v2439_v26, %v4762_v51 }
 0x409   :  { %5943 = vst [vmem:[#allocation30_spill] sm:$0xff] %v4983_v11  ;;  %v1555_v11 = vmax.f32 %v1094_v21, 0.0 }
 0x40b   :  { %v4991_v23 = vpop.f32.mrf.mxu0 }
 0x40c   :  { %5944 = vst [vmem:[#allocation103_spill] sm:$0xff] %v4991_v23 }
 0x40d   :  { %v1095_v2 = vpop.f32.mrf.mxu3 }
 0x40e   :  { %v1096_v12 = vadd.f32 %v1095_v2, %v3792_v55  ;;  %v2698_v50 = vpop.f32.mrf.mxu2  ;;  %v5948_v2 = vld [vmem:[#allocation38_spill] sm:$0xff] }
 0x40f   :  { %v4996_v32 = vadd.f32 %v2698_v50, %v2440_v33  ;;  %v2442_v29 = vpop.f32.mrf.mxu1 }
 0x410   :  { %v1557_v25 = vmax.f32 %v1096_v12, 0.0  ;;  %v2443_v26 = vadd.f32 %v2442_v29, %v4762_v51 }
 0x412   :  { %1336 = vmatmul.bf16.gmra.mxu3 %v4707_v34  ;;  %2481 = vmatmul.bf16.gmra.mxu1 %v5945_v39  ;;  %v5000_v9 = vpack.c.bf16 %v1557_v25, %v1555_v11 }
 0x413   :  { %2740 = vmatmul.bf16.gmra.mxu2 %v4193_v44  ;;  %v5003_v22 = vpop.f32.mrf.mxu0 }
 0x414   :  { %5946 = vst [vmem:[#allocation16_spill] sm:$0xff] %v5000_v9 }
 0x415   :  { %5947 = vst [vmem:[#allocation104_spill] sm:$0xff] %v5003_v22  ;;  %v1098_v46 = vpop.f32.mrf.mxu3 }
 0x416   :  { %v2701_v37 = vpop.f32.mrf.mxu2  ;;  %2262 = vmatmul.bf16.gmra.mxu0 %v5948_v2  ;;  %v1099_v34 = vadd.f32 %v1098_v46, %v3792_v55  ;;  %v3380_v46 = vld [vmem:[%s5759_s5 + $0x14] sm:$0xf0] }
 0x417   :  { %v5007_v33 = vadd.f32 %v2701_v37, %v2443_v26  ;;  %v2444_v21 = vpop.f32.mrf.mxu1  ;;  %v5951_v26 = vld [vmem:[#allocation17_spill] sm:$0xff]  ;;  %v3243_v37 = vld [vmem:[%s5759_s5 + $0x10] sm:$0xf] }
 0x418   :  { %v2445_v25 = vadd.f32 %v2444_v21, %v4762_v51  ;;  %v1559_v23 = vmax.f32 %v1099_v34, 0.0  ;;  %v3244_v34 = vor.u32 %v3380_v46, %v3243_v37 }
 0x41a   :  { %1871 = vmatpush.bf16.msrb.mxu3 %v3244_v34 }
 0x41b   :  { %v5009_v12 = vpop.f32.mrf.mxu0 }
 0x41c   :  { %5949 = vst [vmem:[#allocation38_spill] sm:$0xff] %v5009_v12 }
 0x41d   :  { %v1100_v11 = vpop.f32.mrf.mxu3 }
 0x41e   :  { %v1101_v44 = vadd.f32 %v1100_v11, %v3792_v55  ;;  %v2703_v50 = vpop.f32.mrf.mxu2 }
 0x41f   :  { %v5014_v22 = vadd.f32 %v2703_v50, %v2445_v25  ;;  %v2447_v29 = vpop.f32.mrf.mxu1  ;;  %v5954_v50 = vld [vmem:[#allocation46_spill] sm:$0xff] }
 0x420   :  { %v1561_v9 = vmax.f32 %v1101_v44, 0.0  ;;  %v2448_v11 = vadd.f32 %v2447_v29, %v4762_v51 }
 0x421   :  { %5950 = vst [vmem:[#allocation105_spill] sm:$0xff] %v5014_v22 }
 0x422   :  { %1341 = vmatmul.bf16.gmra.mxu3 %v4731_v57  ;;  %2486 = vmatmul.bf16.gmra.mxu1 %v5951_v26  ;;  %v5024_v21 = vpack.c.bf16 %v1561_v9, %v1559_v23 }
 0x423   :  { %2745 = vmatmul.bf16.gmra.mxu2 %v4241_v0  ;;  %v5027_v25 = vpop.f32.mrf.mxu0 }
 0x424   :  { %5952 = vst [vmem:[#allocation106_spill] sm:$0xff] %v5024_v21 }
 0x425   :  { %5953 = vst [vmem:[#allocation107_spill] sm:$0xff] %v5027_v25  ;;  %v1103_v57 = vpop.f32.mrf.mxu3 }
 0x426   :  { %v2706_v44 = vpop.f32.mrf.mxu2  ;;  %2267 = vmatmul.bf16.gmra.mxu0 %v5954_v50  ;;  %v1104_v23 = vadd.f32 %v1103_v57, %v3792_v55 }
 0x427   :  { %v5031_v12 = vadd.f32 %v2706_v44, %v2448_v11  ;;  %v2449_v26 = vpop.f32.mrf.mxu1  ;;  %v5958_v11 = vld [vmem:[#allocation18_spill] sm:$0xff] }
 0x428   :  { %v2450_v9 = vadd.f32 %v2449_v26, %v4762_v51  ;;  %v1563_v34 = vmax.f32 %v1104_v23, 0.0 }
 0x429   :  { %5955 = vst [vmem:[#allocation46_spill] sm:$0xff] %v5031_v12  ;;  %v5965_v12 = vld [vmem:[#allocation22_spill] sm:$0xff] }
 0x42b   :  { %v5033_v22 = vpop.f32.mrf.mxu0 }
 0x42c   :  { %5956 = vst [vmem:[#allocation108_spill] sm:$0xff] %v5033_v22 }
 0x42d   :  { %v1105_v0 = vpop.f32.mrf.mxu3 }
 0x42e   :  { %v1106_v25 = vadd.f32 %v1105_v0, %v3792_v55  ;;  %v2708_v37 = vpop.f32.mrf.mxu2  ;;  %v5961_v0 = vld [vmem:[#allocation48_spill] sm:$0xff] }
 0x42f   :  { %v5038_v46 = vadd.f32 %v2708_v37, %v2450_v9  ;;  %v2452_v29 = vpop.f32.mrf.mxu1 }
 0x430   :  { %v1565_v21 = vmax.f32 %v1106_v25, 0.0  ;;  %v2453_v26 = vadd.f32 %v2452_v29, %v4762_v51  ;;  %v5964_v29 = vld [vmem:[#allocation14_spill] sm:$0xff] }
 0x431   :  { %5957 = vst [vmem:[#allocation109_spill] sm:$0xff] %v5038_v46 }
 0x432   :  { %1346 = vmatmul.bf16.gmra.mxu3 %v4760_v58  ;;  %2491 = vmatmul.bf16.gmra.mxu1 %v5958_v11  ;;  %v5042_v44 = vpack.c.bf16 %v1565_v21, %v1563_v34  ;;  %v3235_v58 = vld [vmem:[%s5759_s5] sm:$0xf]  ;;  %v3378_v21 = vld [vmem:[%s5759_s5 + $0x4] sm:$0xf0] }
 0x433   :  { %2750 = vmatmul.bf16.gmra.mxu2 %v4265_v4  ;;  %v5045_v57 = vpop.f32.mrf.mxu0  ;;  %v3236_v4 = vor.u32 %v3378_v21, %v3235_v58  ;;  %v5966_v58 = vld [vmem:[#allocation19_spill] sm:$0xff]  ;;  %v5968_v21 = vld [vmem:[#allocation32_spill] sm:$0xff] }
 0x434   :  { %5959 = vst [vmem:[#allocation110_spill] sm:$0xff] %v5042_v44 }
 0x435   :  { %5960 = vst [vmem:[#allocation111_spill] sm:$0xff] %v5045_v57  ;;  %v1307_v22 = vpop.f32.mrf.mxu3  ;;  %1872 = vmatpush.bf16.msrb.mxu3 %v3236_v4 }
 0x436   :  { %v2711_v55 = vpop.f32.mrf.mxu2  ;;  %2272 = vmatmul.bf16.gmra.mxu0 %v5961_v0  ;;  %v1308_v37 = vadd.f32 %v1307_v22, %v3796_v62 }
 0x437   :  { %v5049_v9 = vadd.f32 %v2711_v55, %v2453_v26  ;;  %v2454_v23 = vpop.f32.mrf.mxu1 }
 0x438   :  { %v2455_v34 = vadd.f32 %v2454_v23, %v4762_v51  ;;  %v1520_v11 = vmax.f32 %v1308_v37, 0.0  ;;  %v5969_v37 = vld [vmem:[#allocation50_spill] sm:$0xff] }
 0x439   :  { %5962 = vst [vmem:[#allocation48_spill] sm:$0xff] %v5049_v9  ;;  %3426 = vmatpush.bf16.msra.mxu3 %v5964_v29 }
 0x43b   :  { %v5057_v25 = vpop.f32.mrf.mxu0 }
 0x43c   :  { %5963 = vst [vmem:[#allocation112_spill] sm:$0xff] %v5057_v25 }
 0x43d   :  { %v1309_v26 = vpop.f32.mrf.mxu3  ;;  %3427 = vmatpush.bf16.msra.mxu3 %v5965_v12 }
 0x43e   :  { %v1310_v55 = vadd.f32 %v1309_v26, %v3796_v62  ;;  %v2713_v44 = vpop.f32.mrf.mxu2 }
 0x43f   :  { %v5063_v57 = vadd.f32 %v2713_v44, %v2455_v34  ;;  %v2457_v9 = vpop.f32.mrf.mxu1 }
 0x440   :  { %v1522_v46 = vmax.f32 %v1310_v55, 0.0  ;;  %v2458_v44 = vadd.f32 %v2457_v9, %v4762_v51 }
 0x441   :  { %3428 = vmatpush.bf16.msra.mxu3 %v5968_v21 }
 0x442   :  { %1351 = vmatmul.bf16.gmra.mxu3 %v4786_v61  ;;  %2496 = vmatmul.bf16.gmra.mxu1 %v5966_v58  ;;  %v5068_v22 = vpack.c.bf16 %v1522_v46, %v1520_v11  ;;  %v5971_v61 = vld [vmem:[#allocation34_spill] sm:$0xff] }
 0x443   :  { %2755 = vmatmul.bf16.gmra.mxu2 %v5917_v16  ;;  %v5071_v23 = vpop.f32.mrf.mxu0  ;;  %v5973_v16 = vld [vmem:[#allocation36_spill] sm:$0xff] }
 0x444   :  { %5967 = vst [vmem:[#allocation14_spill] sm:$0xff] %v5071_v23 }
 0x445   :  { %v1312_v4 = vpop.f32.mrf.mxu3  ;;  %3429 = vmatpush.bf16.msra.mxu3 %v5971_v61  ;;  %v5976_v61 = vld [vmem:[#allocation23_spill] sm:$0xff] }
 0x446   :  { %v2716_v29 = vpop.f32.mrf.mxu2  ;;  %2277 = vmatmul.bf16.gmra.mxu0 %v5969_v37  ;;  %v1313_v46 = vadd.f32 %v1312_v4, %v3796_v62 }
 0x447   :  { %v5076_v34 = vadd.f32 %v2716_v29, %v2458_v44  ;;  %v2459_v12 = vpop.f32.mrf.mxu1 }
 0x448   :  { %v2460_v11 = vadd.f32 %v2459_v12, %v4762_v51  ;;  %v1524_v44 = vmax.f32 %v1313_v46, 0.0 }
 0x449   :  { %5970 = vst [vmem:[#allocation22_spill] sm:$0xff] %v5076_v34  ;;  %3430 = vmatpush.bf16.msra.mxu3 %v5973_v16  ;;  %v5975_v34 = vld [vmem:[#allocation39_spill] sm:$0xff]  ;;  %v5978_v16 = vld [vmem:[#allocation41_spill] sm:$0xff] }
 0x44b   :  { %v5079_v26 = vpop.f32.mrf.mxu0 }
 0x44c   :  { %5972 = vst [vmem:[#allocation19_spill] sm:$0xff] %v5079_v26 }
 0x44d   :  { %v1314_v55 = vpop.f32.mrf.mxu3  ;;  %3431 = vmatpush.bf16.msra.mxu3 %v5975_v34 }
 0x44e   :  { %v1315_v9 = vadd.f32 %v1314_v55, %v3796_v62  ;;  %v2718_v21 = vpop.f32.mrf.mxu2 }
 0x44f   :  { %v5085_v23 = vadd.f32 %v2718_v21, %v2460_v11  ;;  %v2462_v25 = vpop.f32.mrf.mxu1 }
 0x450   :  { %v1526_v29 = vmax.f32 %v1315_v9, 0.0  ;;  %v2463_v11 = vadd.f32 %v2462_v25, %v4762_v51 }
 0x451   :  { %5974 = vst [vmem:[#allocation32_spill] sm:$0xff] %v5085_v23  ;;  %3432 = vmatpush.bf16.msra.mxu3 %v5978_v16 }
 0x452   :  { %1356 = vmatmul.bf16.gmra.mxu3 %v4810_v49  ;;  %2501 = vmatmul.bf16.gmra.mxu1 %v5976_v61  ;;  %v5090_v4 = vpack.c.bf16 %v1526_v29, %v1524_v44  ;;  %v5979_v49 = vld [vmem:[#allocation44_spill] sm:$0xff] }
 0x453   :  { %2760 = vmatmul.bf16.gmra.mxu2 %v5923_v14  ;;  %v5093_v12 = vpop.f32.mrf.mxu0 }
 0x454   :  { %5977 = vst [vmem:[#allocation50_spill] sm:$0xff] %v5093_v12 }
 0x455   :  { %v1317_v55 = vpop.f32.mrf.mxu3  ;;  %3433 = vmatpush.bf16.msra.mxu3 %v5979_v49 }
 0x456   :  { %v2721_v21 = vpop.f32.mrf.mxu2  ;;  %2282 = vmatmul.bf16.gmra.mxu0 %v4585_v43  ;;  %v1318_v44 = vadd.f32 %v1317_v55, %v3796_v62 }
 0x457   :  { %v5098_v46 = vadd.f32 %v2721_v21, %v2463_v11  ;;  %v2464_v34 = vpop.f32.mrf.mxu1  ;;  %v5982_v11 = vld [vmem:[#allocation25_spill] sm:$0xff] }
 0x458   :  { %v2465_v14 = vadd.f32 %v2464_v34, %v4762_v51  ;;  %v1528_v61 = vmax.f32 %v1318_v44, 0.0 }
 0x45b   :  { %v5101_v9 = vpop.f32.mrf.mxu0 }
 0x45c   :  { %5980 = vst [vmem:[#allocation34_spill] sm:$0xff] %v5101_v9 }
 0x45d   :  { %v1319_v29 = vpop.f32.mrf.mxu3 }
 0x45e   :  { %v1320_v16 = vadd.f32 %v1319_v29, %v3796_v62  ;;  %v2723_v12 = vpop.f32.mrf.mxu2 }
 0x45f   :  { %v5106_v25 = vadd.f32 %v2723_v12, %v2465_v14  ;;  %v2467_v26 = vpop.f32.mrf.mxu1 }
 0x460   :  { %v1530_v23 = vmax.f32 %v1320_v16, 0.0  ;;  %v2468_v34 = vadd.f32 %v2467_v26, %v4762_v51 }
 0x461   :  { %5981 = vst [vmem:[#allocation36_spill] sm:$0xff] %v5106_v25  ;;  %v5986_v25 = vld [vmem:[#allocation5_spill] sm:$0xff] }
 0x462   :  { %1361 = vmatmul.bf16.gmra.mxu3 %v4840_v3  ;;  %2506 = vmatmul.bf16.gmra.mxu1 %v5982_v11  ;;  %v5110_v21 = vpack.c.bf16 %v1530_v23, %v1528_v61 }
 0x463   :  { %2765 = vmatmul.bf16.gmra.mxu2 %v5929_v13  ;;  %v5113_v55 = vpop.f32.mrf.mxu0 }
 0x464   :  { %5983 = vst [vmem:[#allocation39_spill] sm:$0xff] %v5113_v55 }
 0x465   :  { %v1322_v49 = vpop.f32.mrf.mxu3 }
 0x466   :  { %v2726_v29 = vpop.f32.mrf.mxu2  ;;  %2287 = vmatmul.bf16.gmra.mxu0 %v4609_v53  ;;  %v1323_v14 = vadd.f32 %v1322_v49, %v3796_v62  ;;  %v5988_v49 = vld [vmem:[#allocation13_spill] sm:$0xff] }
 0x467   :  { %v5117_v12 = vadd.f32 %v2726_v29, %v2468_v34  ;;  %v2469_v44 = vpop.f32.mrf.mxu1  ;;  %v5987_v34 = vld [vmem:[#allocation27_spill] sm:$0xff] }
 0x468   :  { %v2470_v3 = vadd.f32 %v2469_v44, %v4762_v51  ;;  %v1532_v9 = vmax.f32 %v1323_v14, 0.0 }
 0x46b   :  { %v5121_v23 = vpop.f32.mrf.mxu0 }
 0x46c   :  { %5984 = vst [vmem:[#allocation41_spill] sm:$0xff] %v5121_v23 }
 0x46d   :  { %v1324_v16 = vpop.f32.mrf.mxu3 }
 0x46e   :  { %v1325_v13 = vadd.f32 %v1324_v16, %v3796_v62  ;;  %v2728_v61 = vpop.f32.mrf.mxu2 }
 0x46f   :  { %v5124_v55 = vadd.f32 %v2728_v61, %v2470_v3  ;;  %v2472_v26 = vpop.f32.mrf.mxu1  ;;  %v5992_v61 = vld [vmem:[#allocation31_spill] sm:$0xff] }
 0x470   :  { %v1534_v11 = vmax.f32 %v1325_v13, 0.0  ;;  %v2473_v44 = vadd.f32 %v2472_v26, %v4762_v51  ;;  %v5990_v13 = vld [vmem:[#allocation20_spill] sm:$0xff] }
 0x471   :  { %5985 = vst [vmem:[#allocation44_spill] sm:$0xff] %v5124_v55 }
 0x472   :  { %1873 = vmatmul.bf16.vlgmr.msrb.gmra.mxu3 %v5986_v25  ;;  %2511 = vmatmul.bf16.gmra.mxu1 %v5987_v34  ;;  %v5128_v29 = vpack.c.bf16 %v1534_v11, %v1532_v9 }
 0x473   :  { %2770 = vmatmul.bf16.gmra.mxu2 %v5935_v27  ;;  %3434 = vmatpush.bf16.msrb.mxu3 %v5988_v49  ;;  %v5137_v25 = vpop.f32.mrf.mxu0 }
 0x474   :  { %5991 = vst [vmem:[#allocation13_spill] sm:$0xff] %v5137_v25 }
 0x475   :  { %v1327_v23 = vpop.f32.mrf.mxu3 }
 0x476   :  { %v2731_v16 = vpop.f32.mrf.mxu2  ;;  %2292 = vmatmul.bf16.gmra.mxu0 %v4635_v28  ;;  %v1328_v9 = vadd.f32 %v1327_v23, %v3796_v62 }
 0x477   :  { %v5134_v3 = vadd.f32 %v2731_v16, %v2473_v44  ;;  %v2474_v14 = vpop.f32.mrf.mxu1  ;;  %3435 = vmatpush.bf16.msrb.mxu3 %v5990_v13  ;;  %v5994_v44 = vld [vmem:[#allocation35_spill] sm:$0xff] }
 0x478   :  { %v2475_v27 = vadd.f32 %v2474_v14, %v4762_v51  ;;  %v1536_v16 = vmax.f32 %v1328_v9, 0.0  ;;  %v5997_v14 = vld [vmem:[#allocation37_spill] sm:$0xff] }
 0x479   :  { %5989 = vst [vmem:[#allocation5_spill] sm:$0xff] %v5134_v3 }
 0x47b   :  { %3436 = vmatpush.bf16.msrb.mxu3 %v5992_v61  ;;  %v5146_v13 = vpop.f32.mrf.mxu0  ;;  %v5996_v61 = vld [vmem:[#allocation29_spill] sm:$0xff] }
 0x47c   :  { %5995 = vst [vmem:[#allocation31_spill] sm:$0xff] %v5146_v13 }
 0x47d   :  { %v1329_v11 = vpop.f32.mrf.mxu3 }
 0x47e   :  { %v1330_v26 = vadd.f32 %v1329_v11, %v3796_v62  ;;  %v2733_v49 = vpop.f32.mrf.mxu2 }
 0x47f   :  { %v5143_v34 = vadd.f32 %v2733_v49, %v2475_v27  ;;  %v2477_v55 = vpop.f32.mrf.mxu1  ;;  %3437 = vmatpush.bf16.msrb.mxu3 %v5994_v44  ;;  %v5999_v44 = vld [vmem:[#allocation40_spill] sm:$0xff] }
 0x480   :  { %v1538_v3 = vmax.f32 %v1330_v26, 0.0  ;;  %v2478_v27 = vadd.f32 %v2477_v55, %v4762_v51 }
 0x481   :  { %5993 = vst [vmem:[#allocation20_spill] sm:$0xff] %v5143_v34  ;;  %v6009_v34 = vld [vmem:[#allocation7_spill] sm:$0xff] }
 0x482   :  { %1878 = vmatmul.bf16.gmra.mxu3 %v3819_v35  ;;  %2516 = vmatmul.bf16.gmra.mxu1 %v5996_v61  ;;  %v5150_v23 = vpack.c.bf16 %v1538_v3, %v1536_v16  ;;  %v6000_v35 = vld [vmem:[#allocation42_spill] sm:$0xff] }
 0x483   :  { %2775 = vmatmul.bf16.gmra.mxu2 %v5942_v63  ;;  %3438 = vmatpush.bf16.msrb.mxu3 %v5997_v14  ;;  %v5160_v13 = vpop.f32.mrf.mxu0 }
 0x484   :  { %6001 = vst [vmem:[#allocation37_spill] sm:$0xff] %v5160_v13 }
 0x485   :  { %v1332_v11 = vpop.f32.mrf.mxu3 }
 0x486   :  { %v2736_v49 = vpop.f32.mrf.mxu2  ;;  %2297 = vmatmul.bf16.gmra.mxu0 %v4661_v6  ;;  %v1333_v3 = vadd.f32 %v1332_v11, %v3796_v62 }
 0x487   :  { %v5156_v9 = vadd.f32 %v2736_v49, %v2478_v27  ;;  %v2479_v26 = vpop.f32.mrf.mxu1  ;;  %3439 = vmatpush.bf16.msrb.mxu3 %v5999_v44  ;;  %v6003_v27 = vld [vmem:[#allocation45_spill] sm:$0xff]  ;;  %v6004_v44 = vld [vmem:[#allocation6_spill] sm:$0xff] }
 0x488   :  { %v2480_v63 = vadd.f32 %v2479_v26, %v4762_v51  ;;  %v1540_v49 = vmax.f32 %v1333_v3, 0.0 }
 0x489   :  { %5998 = vst [vmem:[#allocation35_spill] sm:$0xff] %v5156_v9 }
 0x48b   :  { %3440 = vmatpush.bf16.msrb.mxu3 %v6000_v35  ;;  %v6005_v35 = vld [vmem:[#allocation33_spill] sm:$0xff] }
 0x48d   :  { %v1334_v16 = vpop.f32.mrf.mxu3 }
 0x48e   :  { %v1335_v55 = vadd.f32 %v1334_v16, %v3796_v62  ;;  %v2738_v14 = vpop.f32.mrf.mxu2  ;;  %v5174_v16 = vpop.f32.mrf.mxu0 }
 0x48f   :  { %v5165_v25 = vadd.f32 %v2738_v14, %v2480_v63  ;;  %v2482_v61 = vpop.f32.mrf.mxu1  ;;  %3441 = vmatpush.bf16.msrb.mxu3 %v6003_v27  ;;  %6006 = vst [vmem:[#allocation42_spill] sm:$0xff] %v5174_v16 }
 0x490   :  { %v1542_v9 = vmax.f32 %v1335_v55, 0.0  ;;  %v2483_v11 = vadd.f32 %v2482_v61, %v4762_v51 }
 0x491   :  { %6002 = vst [vmem:[#allocation40_spill] sm:$0xff] %v5165_v25 }
 0x492   :  { %1883 = vmatmul.bf16.gmra.mxu3 %v6004_v44  ;;  %2521 = vmatmul.bf16.gmra.mxu1 %v6005_v35  ;;  %v5170_v13 = vpack.c.bf16 %v1542_v9, %v1540_v49 }
 0x493   :  { %2780 = vmatmul.bf16.gmra.mxu2 %v5948_v2 }
 0x495   :  { %v1337_v26 = vpop.f32.mrf.mxu3 }
 0x496   :  { %v2741_v63 = vpop.f32.mrf.mxu2  ;;  %2302 = vmatmul.bf16.gmra.mxu0 %v4685_v20  ;;  %v1338_v55 = vadd.f32 %v1337_v26, %v3796_v62  ;;  %v5184_v35 = vpop.f32.mrf.mxu0 }
 0x497   :  { %v5177_v14 = vadd.f32 %v2741_v63, %v2483_v11  ;;  %v2484_v3 = vpop.f32.mrf.mxu1  ;;  %6008 = vst [vmem:[#allocation6_spill] sm:$0xff] %v5184_v35  ;;  %v6010_v11 = vld [vmem:[#allocation43_spill] sm:$0xff] }
 0x498   :  { %v2485_v27 = vadd.f32 %v2484_v3, %v4762_v51  ;;  %v1544_v16 = vmax.f32 %v1338_v55, 0.0 }
 0x49d   :  { %v1339_v44 = vpop.f32.mrf.mxu3 }
 0x49e   :  { %v1340_v9 = vadd.f32 %v1339_v44, %v3796_v62  ;;  %v2743_v49 = vpop.f32.mrf.mxu2  ;;  %v5195_v35 = vpop.f32.mrf.mxu0 }
 0x49f   :  { %v5182_v2 = vadd.f32 %v2743_v49, %v2485_v27  ;;  %v2487_v61 = vpop.f32.mrf.mxu1  ;;  %6012 = vst [vmem:[#allocation113_spill] sm:$0xff] %v5195_v35 }
 0x4a0   :  { %v1546_v25 = vmax.f32 %v1340_v9, 0.0  ;;  %v2488_v26 = vadd.f32 %v2487_v61, %v4762_v51 }
 0x4a1   :  { %6007 = vst [vmem:[#allocation45_spill] sm:$0xff] %v5182_v2 }
 0x4a2   :  { %1888 = vmatmul.bf16.gmra.mxu3 %v6009_v34  ;;  %2526 = vmatmul.bf16.gmra.mxu1 %v6010_v11  ;;  %v5188_v63 = vpack.c.bf16 %v1546_v25, %v1544_v16 }
 0x4a3   :  { %2785 = vmatmul.bf16.gmra.mxu2 %v5954_v50 }
 0x4a5   :  { %v1342_v3 = vpop.f32.mrf.mxu3 }
 0x4a6   :  { %v2746_v44 = vpop.f32.mrf.mxu2  ;;  %2307 = vmatmul.bf16.gmra.mxu0 %v4711_v45  ;;  %v1343_v55 = vadd.f32 %v1342_v3, %v3796_v62  ;;  %v5207_v3 = vpop.f32.mrf.mxu0 }
 0x4a7   :  { %v5193_v27 = vadd.f32 %v2746_v44, %v2488_v26  ;;  %v2489_v49 = vpop.f32.mrf.mxu1  ;;  %v6014_v26 = vld [vmem:[#allocation47_spill] sm:$0xff]  ;;  %6015 = vst [vmem:[#allocation115_spill] sm:$0xff] %v5207_v3 }
 0x4a8   :  { %v2490_v34 = vadd.f32 %v2489_v49, %v4762_v51  ;;  %v1548_v11 = vmax.f32 %v1343_v55, 0.0 }
 0x4a9   :  { %6011 = vst [vmem:[#allocation7_spill] sm:$0xff] %v5193_v27  ;;  %v6019_v27 = vld [vmem:[#allocation8_spill] sm:$0xff] }
 0x4ad   :  { %v1344_v9 = vpop.f32.mrf.mxu3 }
 0x4ae   :  { %v1345_v25 = vadd.f32 %v1344_v9, %v3796_v62  ;;  %v2748_v16 = vpop.f32.mrf.mxu2 }
 0x4af   :  { %v5200_v50 = vadd.f32 %v2748_v16, %v2490_v34  ;;  %v2492_v61 = vpop.f32.mrf.mxu1 }
 0x4b0   :  { %v1550_v2 = vmax.f32 %v1345_v25, 0.0  ;;  %v2493_v49 = vadd.f32 %v2492_v61, %v4762_v51 }
 0x4b1   :  { %6013 = vst [vmem:[#allocation114_spill] sm:$0xff] %v5200_v50 }
 0x4b2   :  { %1893 = vmatmul.bf16.gmra.mxu3 %v3870_v1  ;;  %2531 = vmatmul.bf16.gmra.mxu1 %v6014_v26  ;;  %v5204_v44 = vpack.c.bf16 %v1550_v2, %v1548_v11  ;;  %v5215_v2 = vpop.f32.mrf.mxu0 }
 0x4b3   :  { %2790 = vmatmul.bf16.gmra.mxu2 %v5961_v0  ;;  %6017 = vst [vmem:[#allocation117_spill] sm:$0xff] %v5215_v2 }
 0x4b5   :  { %v1347_v35 = vpop.f32.mrf.mxu3 }
 0x4b6   :  { %v2751_v9 = vpop.f32.mrf.mxu2  ;;  %2312 = vmatmul.bf16.gmra.mxu0 %v4735_v30  ;;  %v1348_v25 = vadd.f32 %v1347_v35, %v3796_v62 }
 0x4b7   :  { %v5211_v34 = vadd.f32 %v2751_v9, %v2493_v49  ;;  %v2494_v55 = vpop.f32.mrf.mxu1  ;;  %v6020_v49 = vld [vmem:[#allocation49_spill] sm:$0xff] }
 0x4b8   :  { %v2495_v1 = vadd.f32 %v2494_v55, %v4762_v51  ;;  %v1552_v26 = vmax.f32 %v1348_v25, 0.0 }
 0x4b9   :  { %6016 = vst [vmem:[#allocation116_spill] sm:$0xff] %v5211_v34 }
 0x4bd   :  { %v1349_v16 = vpop.f32.mrf.mxu3 }
 0x4be   :  { %v1350_v0 = vadd.f32 %v1349_v16, %v3796_v62  ;;  %v2753_v11 = vpop.f32.mrf.mxu2 }
 0x4bf   :  { %v5218_v3 = vadd.f32 %v2753_v11, %v2495_v1  ;;  %v2497_v61 = vpop.f32.mrf.mxu1  ;;  %v5229_v11 = vpop.f32.mrf.mxu0 }
 0x4c0   :  { %v1554_v50 = vmax.f32 %v1350_v0, 0.0  ;;  %v2498_v35 = vadd.f32 %v2497_v61, %v4762_v51  ;;  %6021 = vst [vmem:[#allocation8_spill] sm:$0xff] %v5229_v11 }
 0x4c1   :  { %6018 = vst [vmem:[#allocation118_spill] sm:$0xff] %v5218_v3 }
 0x4c2   :  { %1898 = vmatmul.bf16.gmra.mxu3 %v6019_v27  ;;  %2536 = vmatmul.bf16.gmra.mxu1 %v6020_v49  ;;  %v5222_v9 = vpack.c.bf16 %v1554_v50, %v1552_v26 }
 0x4c3   :  { %2795 = vmatmul.bf16.gmra.mxu2 %v5969_v37 }
 0x4c5   :  { %v1352_v55 = vpop.f32.mrf.mxu3 }
 0x4c6   :  { %v2756_v2 = vpop.f32.mrf.mxu2  ;;  %2317 = vmatmul.bf16.gmra.mxu0 %v4766_v7  ;;  %v1353_v25 = vadd.f32 %v1352_v55, %v3796_v62 }
 0x4c7   :  { %v5227_v16 = vadd.f32 %v2756_v2, %v2498_v35  ;;  %v2499_v1 = vpop.f32.mrf.mxu1  ;;  %v5236_v34 = vpop.f32.mrf.mxu0  ;;  %v6023_v2 = vld [vmem:[#allocation53_spill] sm:$0xff] }
 0x4c8   :  { %v2500_v27 = vadd.f32 %v2499_v1, %v4762_v51  ;;  %v1556_v49 = vmax.f32 %v1353_v25, 0.0  ;;  %6022 = vst [vmem:[#allocation119_spill] sm:$0xff] %v5236_v34 }
 0x4cd   :  { %v1354_v0 = vpop.f32.mrf.mxu3 }
 0x4ce   :  { %v1355_v50 = vadd.f32 %v1354_v0, %v3796_v62  ;;  %v2758_v26 = vpop.f32.mrf.mxu2 }
 0x4cf   :  { %v5234_v37 = vadd.f32 %v2758_v26, %v2500_v27  ;;  %v2502_v61 = vpop.f32.mrf.mxu1 }
 0x4d0   :  { %v1558_v3 = vmax.f32 %v1355_v50, 0.0  ;;  %v2503_v55 = vadd.f32 %v2502_v61, %v4762_v51  ;;  %v5247_v50 = vpop.f32.mrf.mxu0 }
 0x4d1   :  { %6025 = vst [vmem:[#allocation121_spill] sm:$0xff] %v5247_v50 }
 0x4d2   :  { %1903 = vmatmul.bf16.gmra.mxu3 %v3904_v8  ;;  %2541 = vmatmul.bf16.gmra.mxu1 %v6023_v2  ;;  %v5240_v35 = vpack.c.bf16 %v1558_v3, %v1556_v49 }
 0x4d3   :  { %2800 = vmatmul.bf16.gmra.mxu2 %v4585_v43 }
 0x4d5   :  { %v1357_v1 = vpop.f32.mrf.mxu3 }
 0x4d6   :  { %v2761_v0 = vpop.f32.mrf.mxu2  ;;  %2322 = vmatmul.bf16.gmra.mxu0 %v5068_v22  ;;  %v1358_v26 = vadd.f32 %v1357_v1, %v3796_v62 }
 0x4d7   :  { %v5245_v27 = vadd.f32 %v2761_v0, %v2503_v55  ;;  %v2504_v25 = vpop.f32.mrf.mxu1  ;;  %v6027_v55 = vld [vmem:[#allocation56_spill] sm:$0xff] }
 0x4d8   :  { %v2505_v8 = vadd.f32 %v2504_v25, %v4762_v51  ;;  %v1560_v11 = vmax.f32 %v1358_v26, 0.0  ;;  %v5260_v50 = vpop.f32.mrf.mxu0 }
 0x4d9   :  { %6024 = vst [vmem:[#allocation120_spill] sm:$0xff] %v5245_v27  ;;  %v6036_v27 = vld [vmem:[#allocation52_spill] sm:$0xff] }
 0x4da   :  { %6028 = vst [vmem:[#allocation123_spill] sm:$0xff] %v5260_v50 }
 0x4dd   :  { %v1359_v34 = vpop.f32.mrf.mxu3 }
 0x4de   :  { %v1360_v3 = vadd.f32 %v1359_v34, %v3796_v62  ;;  %v2763_v49 = vpop.f32.mrf.mxu2 }
 0x4df   :  { %v5252_v43 = vadd.f32 %v2763_v49, %v2505_v8  ;;  %v2507_v61 = vpop.f32.mrf.mxu1 }
 0x4e0   :  { %v1562_v2 = vmax.f32 %v1360_v3, 0.0  ;;  %v2508_v1 = vadd.f32 %v2507_v61, %v4762_v51 }
 0x4e1   :  { %6026 = vst [vmem:[#allocation122_spill] sm:$0xff] %v5252_v43 }
 0x4e2   :  { %1908 = vmatmul.bf16.gmra.mxu3 %v3921_v42  ;;  %2546 = vmatmul.bf16.gmra.mxu1 %v6027_v55  ;;  %v5256_v0 = vpack.c.bf16 %v1562_v2, %v1560_v11  ;;  %v5270_v55 = vpop.f32.mrf.mxu0 }
 0x4e3   :  { %2805 = vmatmul.bf16.gmra.mxu2 %v4609_v53  ;;  %6031 = vst [vmem:[#allocation126_spill] sm:$0xff] %v5270_v55 }
 0x4e5   :  { %v1362_v25 = vpop.f32.mrf.mxu3 }
 0x4e6   :  { %v2766_v34 = vpop.f32.mrf.mxu2  ;;  %2327 = vmatmul.bf16.gmra.mxu0 %v5090_v4  ;;  %v1363_v3 = vadd.f32 %v1362_v25, %v3796_v62  ;;  %v3448_v25 = vld [vmem:[%s5760_s6] sm:$0x3]  ;;  %s3475_s6 = smov [#allocation2]  }
 0x4e7   :  { %v5263_v8 = vadd.f32 %v2766_v34, %v2508_v1  ;;  %v2509_v26 = vpop.f32.mrf.mxu1  ;;  %v6032_v1 = vld [vmem:[#allocation59_spill] sm:$0xff]  ;;  %v5277_v34 = vperm.slane %v3448_v25, 0  ;;  %v6035_v25 = vld [vmem:[#allocation76_spill] sm:$0xff]  ;;  %s3105_s18 = sshll.u32 %s3475_s6, 4  ;;  %s3106_s18 = int_to_ptr.vmem [resolvable:$true] %s3105_s18 }
 0x4e8   :  { %v2510_v42 = vadd.f32 %v2509_v26, %v4762_v51  ;;  %v1564_v50 = vmax.f32 %v1363_v3, 0.0 }
 0x4e9   :  { %6029 = vst [vmem:[#allocation124_spill] sm:$0xff] %v5263_v8 }
 0x4ed   :  { %v1364_v49 = vpop.f32.mrf.mxu3 }
 0x4ee   :  { %v1365_v11 = vadd.f32 %v1364_v49, %v3796_v62  ;;  %v2768_v2 = vpop.f32.mrf.mxu2 }
 0x4ef   :  { %v5268_v53 = vadd.f32 %v2768_v2, %v2510_v42  ;;  %v2512_v61 = vpop.f32.mrf.mxu1  ;;  %v6034_v2 = vld [vmem:[#allocation51_spill] sm:$0xff] }
 0x4f0   :  { %v1566_v43 = vmax.f32 %v1365_v11, 0.0  ;;  %v2513_v62 = vadd.f32 %v2512_v61, %v4762_v51 }
 0x4f1   :  { %6030 = vst [vmem:[#allocation125_spill] sm:$0xff] %v5268_v53 }
 0x4f2   :  { %1913 = vmatmul.bf16.gmra.mxu3 %v3938_v19  ;;  %2551 = vmatmul.bf16.gmra.mxu1 %v6032_v1  ;;  %v5279_v26 = vpack.c.bf16 %v1566_v43, %v1564_v50  ;;  %v5288_v1 = vpop.f32.mrf.mxu0 }
 0x4f3   :  { %2810 = vmatmul.bf16.gmra.mxu2 %v4635_v28 }
 0x4f4   :  { %6033 = vst [vmem:[#allocation127_spill] sm:$0xff] %v5279_v26 }
 0x4f5   :  { %v1874_v42 = vpop.f32.mrf.mxu3 }
 0x4f6   :  { %v1875_v3 = vadd.f32 %v1874_v42, %v5277_v34  ;;  %v2771_v49 = vpop.f32.mrf.mxu2  ;;  %2332 = vmatmul.bf16.gmra.mxu0 %v5110_v21 }
 0x4f7   :  { %v5285_v19 = vadd.f32 %v2771_v49, %v2513_v62  ;;  %v2514_v11 = vpop.f32.mrf.mxu1 }
 0x4f8   :  { %v2134_v55 = vadd.f32 %v6034_v2, %v1875_v3  ;;  %v2515_v28 = vadd.f32 %v2514_v11, %v4762_v51  ;;  %v6037_v3 = vld [vmem:[#allocation62_spill] sm:$0xff] }
 0x4fa   :  { %v2901_v50 = vpack.c.bf16 %v6035_v25, %v2134_v55  ;;  %v5300_v55 = vpop.f32.mrf.mxu0 }
 0x4fb   :  { %6038 = vst [vmem:[#allocation51_spill] sm:$0xff] %v5300_v55  ;;  %v6040_v55 = vld [vmem:[#allocation55_spill] sm:$0xff] }
 0x4fc   :  { %3001 = vst [vmem:[#allocation2] sm:$0xff] %v2901_v50  ;;  %v6039_v50 = vld [vmem:[#allocation54_spill] sm:$0xff] }
 0x4fd   :  { %v1876_v43 = vpop.f32.mrf.mxu3 }
 0x4fe   :  { %v1877_v61 = vadd.f32 %v1876_v43, %v5277_v34  ;;  %v2773_v53 = vpop.f32.mrf.mxu2 }
 0x4ff   :  { %v5293_v42 = vadd.f32 %v2773_v53, %v2515_v28  ;;  %v2517_v8 = vpop.f32.mrf.mxu1 }
 0x500   :  { %v2136_v62 = vadd.f32 %v6036_v27, %v1877_v61  ;;  %v2518_v11 = vadd.f32 %v2517_v8, %v4762_v51 }
 0x502   :  { %v2902_v49 = vpack.c.bf16 %v4784_v54, %v2136_v62  ;;  %1918 = vmatmul.bf16.gmra.mxu3 %v3955_v59  ;;  %2556 = vmatmul.bf16.gmra.mxu1 %v6037_v3  ;;  %v5310_v61 = vpop.f32.mrf.mxu0 }
 0x503   :  { %2815 = vmatmul.bf16.gmra.mxu2 %v4661_v6 }
 0x504   :  { %3002 = vst [vmem:[#allocation2 + $0x8] sm:$0xff] %v2902_v49 }
 0x505   :  { %v1879_v2 = vpop.f32.mrf.mxu3 }
 0x506   :  { %v1880_v53 = vadd.f32 %v1879_v2, %v5277_v34  ;;  %v2776_v25 = vpop.f32.mrf.mxu2  ;;  %2337 = vmatmul.bf16.gmra.mxu0 %v5128_v29 }
 0x507   :  { %v5305_v27 = vadd.f32 %v2776_v25, %v2518_v11  ;;  %v2519_v54 = vpop.f32.mrf.mxu1 }
 0x508   :  { %v2139_v59 = vadd.f32 %v6039_v50, %v1880_v53  ;;  %v2520_v6 = vadd.f32 %v2519_v54, %v4762_v51  ;;  %v6041_v53 = vld [vmem:[#allocation65_spill] sm:$0xff] }
 0x50a   :  { %v2903_v28 = vpack.c.bf16 %v4797_v38, %v2139_v59 }
 0x50c   :  { %3003 = vst [vmem:[#allocation2 + $0x10] sm:$0xff] %v2903_v28 }
 0x50d   :  { %v1881_v43 = vpop.f32.mrf.mxu3 }
 0x50e   :  { %v1882_v8 = vadd.f32 %v1881_v43, %v5277_v34  ;;  %v2778_v62 = vpop.f32.mrf.mxu2 }
 0x50f   :  { %v5313_v49 = vadd.f32 %v2778_v62, %v2520_v6  ;;  %v2522_v2 = vpop.f32.mrf.mxu1  ;;  %v5325_v6 = vpop.f32.mrf.mxu0 }
 0x510   :  { %v2141_v11 = vadd.f32 %v6040_v55, %v1882_v8  ;;  %v2523_v38 = vadd.f32 %v2522_v2, %v4762_v51  ;;  %6042 = vst [vmem:[#allocation76_spill] sm:$0xff] %v5325_v6 }
 0x512   :  { %v2904_v25 = vpack.c.bf16 %v4808_v56, %v2141_v11  ;;  %1923 = vmatmul.bf16.gmra.mxu3 %v3972_v40  ;;  %2561 = vmatmul.bf16.gmra.mxu1 %v6041_v53  ;;  %v6043_v56 = vld [vmem:[#allocation57_spill] sm:$0xff] }
 0x513   :  { %2820 = vmatmul.bf16.gmra.mxu2 %v4685_v20 }
 0x514   :  { %3004 = vst [vmem:[#allocation2 + $0x18] sm:$0xff] %v2904_v25 }
 0x515   :  { %v1884_v54 = vpop.f32.mrf.mxu3 }
 0x516   :  { %v1885_v50 = vadd.f32 %v1884_v54, %v5277_v34  ;;  %v2781_v59 = vpop.f32.mrf.mxu2  ;;  %2342 = vmatmul.bf16.gmra.mxu0 %v5150_v23  ;;  %v6044_v54 = vld [vmem:[#allocation58_spill] sm:$0xff] }
 0x517   :  { %v5323_v28 = vadd.f32 %v2781_v59, %v2523_v38  ;;  %v2524_v55 = vpop.f32.mrf.mxu1  ;;  %v5334_v59 = vpop.f32.mrf.mxu0 }
 0x518   :  { %v2144_v40 = vadd.f32 %v6043_v56, %v1885_v50  ;;  %v2525_v20 = vadd.f32 %v2524_v55, %v4762_v51  ;;  %6045 = vst [vmem:[#allocation52_spill] sm:$0xff] %v5334_v59  ;;  %v6046_v50 = vld [vmem:[#allocation68_spill] sm:$0xff] }
 0x519   :  { %v6073_v59 = vld [vmem:[#allocation12_spill] sm:$0xff] }
 0x51a   :  { %v2905_v43 = vpack.c.bf16 %v4827_v17, %v2144_v40 }
 0x51c   :  { %3005 = vst [vmem:[#allocation2 + $0x20] sm:$0xff] %v2905_v43 }
 0x51d   :  { %v1886_v8 = vpop.f32.mrf.mxu3 }
 0x51e   :  { %v1887_v62 = vadd.f32 %v1886_v8, %v5277_v34  ;;  %v2783_v2 = vpop.f32.mrf.mxu2  ;;  %v6047_v8 = vld [vmem:[#allocation60_spill] sm:$0xff] }
 0x51f   :  { %v5331_v11 = vadd.f32 %v2783_v2, %v2525_v20  ;;  %v2527_v25 = vpop.f32.mrf.mxu1 }
 0x520   :  { %v2146_v38 = vadd.f32 %v6044_v54, %v1887_v62  ;;  %v2528_v17 = vadd.f32 %v2527_v25, %v4762_v51  ;;  %v5347_v62 = vpop.f32.mrf.mxu0 }
 0x521   :  { %6048 = vst [vmem:[#allocation62_spill] sm:$0xff] %v5347_v62  ;;  %v6060_v62 = vld [vmem:[#allocation10_spill] sm:$0xff] }
 0x522   :  { %v2906_v6 = vpack.c.bf16 %v4838_v5, %v2146_v38  ;;  %1928 = vmatmul.bf16.gmra.mxu3 %v3989_v24  ;;  %2566 = vmatmul.bf16.gmra.mxu1 %v6046_v50 }
 0x523   :  { %2825 = vmatmul.bf16.gmra.mxu2 %v4711_v45 }
 0x524   :  { %3006 = vst [vmem:[#allocation2 + $0x28] sm:$0xff] %v2906_v6 }
 0x525   :  { %v1889_v55 = vpop.f32.mrf.mxu3 }
 0x526   :  { %v1890_v56 = vadd.f32 %v1889_v55, %v5277_v34  ;;  %v2786_v40 = vpop.f32.mrf.mxu2  ;;  %2347 = vmatmul.bf16.gmra.mxu0 %v5170_v13  ;;  %v6049_v55 = vld [vmem:[#allocation61_spill] sm:$0xff] }
 0x527   :  { %v5343_v43 = vadd.f32 %v2786_v40, %v2528_v17  ;;  %v2529_v20 = vpop.f32.mrf.mxu1 }
 0x528   :  { %v2149_v5 = vadd.f32 %v6047_v8, %v1890_v56  ;;  %v2530_v45 = vadd.f32 %v2529_v20, %v4762_v51  ;;  %v6050_v56 = vld [vmem:[#allocation71_spill] sm:$0xff]  ;;  %v5359_v8 = vpop.f32.mrf.mxu0 }
 0x529   :  { %6051 = vst [vmem:[#allocation54_spill] sm:$0xff] %v5359_v8  ;;  %v6054_v8 = vld [vmem:[#allocation64_spill] sm:$0xff] }
 0x52a   :  { %v2907_v24 = vpack.c.bf16 %v4851_v31, %v2149_v5 }
 0x52c   :  { %3007 = vst [vmem:[#allocation2 + $0x30] sm:$0xff] %v2907_v24 }
 0x52d   :  { %v1891_v6 = vpop.f32.mrf.mxu3 }
 0x52e   :  { %v1892_v2 = vadd.f32 %v1891_v6, %v5277_v34  ;;  %v2788_v25 = vpop.f32.mrf.mxu2  ;;  %v6052_v6 = vld [vmem:[#allocation63_spill] sm:$0xff] }
 0x52f   :  { %v5351_v54 = vadd.f32 %v2788_v25, %v2530_v45  ;;  %v2532_v38 = vpop.f32.mrf.mxu1 }
 0x530   :  { %v2151_v17 = vadd.f32 %v6049_v55, %v1892_v2  ;;  %v2533_v31 = vadd.f32 %v2532_v38, %v4762_v51 }
 0x532   :  { %v2908_v40 = vpack.c.bf16 %v4864_v47, %v2151_v17  ;;  %1933 = vmatmul.bf16.gmra.mxu3 %v4006_v10  ;;  %2571 = vmatmul.bf16.gmra.mxu1 %v6050_v56 }
 0x533   :  { %2830 = vmatmul.bf16.gmra.mxu2 %v4735_v30 }
 0x534   :  { %3008 = vst [vmem:[#allocation2 + $0x38] sm:$0xff] %v2908_v40 }
 0x535   :  { %v1894_v20 = vpop.f32.mrf.mxu3 }
 0x536   :  { %v1895_v5 = vadd.f32 %v1894_v20, %v5277_v34  ;;  %v2791_v24 = vpop.f32.mrf.mxu2  ;;  %2352 = vmatmul.bf16.gmra.mxu0 %v5188_v63  ;;  %v5371_v20 = vpop.f32.mrf.mxu0 }
 0x537   :  { %v5363_v45 = vadd.f32 %v2791_v24, %v2533_v31  ;;  %v2534_v47 = vpop.f32.mrf.mxu1  ;;  %6053 = vst [vmem:[#allocation55_spill] sm:$0xff] %v5371_v20 }
 0x538   :  { %v2154_v10 = vadd.f32 %v6052_v6, %v1895_v5  ;;  %v2535_v30 = vadd.f32 %v2534_v47, %v4762_v51  ;;  %v6055_v5 = vld [vmem:[#allocation74_spill] sm:$0xff] }
 0x53a   :  { %v2909_v2 = vpack.c.bf16 %v4875_v41, %v2154_v10 }
 0x53c   :  { %3009 = vst [vmem:[#allocation2 + $0x40] sm:$0xff] %v2909_v2 }
 0x53d   :  { %v1896_v25 = vpop.f32.mrf.mxu3 }
 0x53e   :  { %v1897_v38 = vadd.f32 %v1896_v25, %v5277_v34  ;;  %v2793_v55 = vpop.f32.mrf.mxu2  ;;  %v5384_v25 = vpop.f32.mrf.mxu0 }
 0x53f   :  { %v5369_v17 = vadd.f32 %v2793_v55, %v2535_v30  ;;  %v2537_v40 = vpop.f32.mrf.mxu1  ;;  %v6056_v30 = vld [vmem:[#allocation66_spill] sm:$0xff]  ;;  %6057 = vst [vmem:[#allocation65_spill] sm:$0xff] %v5384_v25 }
 0x540   :  { %v2156_v31 = vadd.f32 %v6054_v8, %v1897_v38  ;;  %v2538_v41 = vadd.f32 %v2537_v40, %v4762_v51  ;;  %v6066_v25 = vld [vmem:[#allocation70_spill] sm:$0xff] }
 0x542   :  { %v2910_v24 = vpack.c.bf16 %v4882_v18, %v2156_v31  ;;  %1938 = vmatmul.bf16.gmra.mxu3 %v5914_v15  ;;  %2576 = vmatmul.bf16.gmra.mxu1 %v6055_v5 }
 0x543   :  { %2835 = vmatmul.bf16.gmra.mxu2 %v4766_v7 }
 0x544   :  { %3010 = vst [vmem:[#allocation2 + $0x48] sm:$0xff] %v2910_v24 }
 0x545   :  { %v1899_v47 = vpop.f32.mrf.mxu3 }
 0x546   :  { %v1900_v6 = vadd.f32 %v1899_v47, %v5277_v34  ;;  %v2796_v10 = vpop.f32.mrf.mxu2  ;;  %2357 = vmatmul.bf16.gmra.mxu0 %v5204_v44  ;;  %v6058_v47 = vld [vmem:[#allocation67_spill] sm:$0xff] }
 0x547   :  { %v5381_v2 = vadd.f32 %v2796_v10, %v2538_v41  ;;  %v2539_v8 = vpop.f32.mrf.mxu1  ;;  %v6059_v10 = vld [vmem:[#allocation91_spill] sm:$0xff] }
 0x548   :  { %v2159_v18 = vadd.f32 %v6056_v30, %v1900_v6  ;;  %v2540_v7 = vadd.f32 %v2539_v8, %v4762_v51  ;;  %v6061_v6 = vld [vmem:[#allocation78_spill] sm:$0xff] }
 0x54a   :  { %v2911_v15 = vpack.c.bf16 %v4899_v36, %v2159_v18  ;;  %v5396_v36 = vpop.f32.mrf.mxu0 }
 0x54b   :  { %6062 = vst [vmem:[#allocation57_spill] sm:$0xff] %v5396_v36 }
 0x54c   :  { %3011 = vst [vmem:[#allocation2 + $0x50] sm:$0xff] %v2911_v15 }
 0x54d   :  { %v1901_v38 = vpop.f32.mrf.mxu3 }
 0x54e   :  { %v1902_v55 = vadd.f32 %v1901_v38, %v5277_v34  ;;  %v2798_v40 = vpop.f32.mrf.mxu2 }
 0x54f   :  { %v5389_v31 = vadd.f32 %v2798_v40, %v2540_v7  ;;  %v2542_v24 = vpop.f32.mrf.mxu1  ;;  %v6064_v40 = vld [vmem:[#allocation24_spill] sm:$0xff] }
 0x550   :  { %v2161_v41 = vadd.f32 %v6058_v47, %v1902_v55  ;;  %v2543_v8 = vadd.f32 %v2542_v24, %v4762_v51  ;;  %v6063_v55 = vld [vmem:[#allocation69_spill] sm:$0xff] }
 0x552   :  { %v2912_v20 = vpack.c.bf16 %v6059_v10, %v2161_v41  ;;  %1943 = vmatmul.bf16.gmra.mxu3 %v6060_v62  ;;  %2581 = vmatmul.bf16.gmra.mxu1 %v6061_v6 }
 0x553   :  { %2840 = vmatmul.bf16.gmra.mxu2 %v5068_v22 }
 0x554   :  { %3012 = vst [vmem:[#allocation2 + $0x58] sm:$0xff] %v2912_v20  ;;  %v5406_v20 = vpop.f32.mrf.mxu0 }
 0x555   :  { %v1904_v30 = vpop.f32.mrf.mxu3  ;;  %6065 = vst [vmem:[#allocation58_spill] sm:$0xff] %v5406_v20  ;;  %v6072_v20 = vld [vmem:[#allocation96_spill] sm:$0xff] }
 0x556   :  { %v1905_v18 = vadd.f32 %v1904_v30, %v5277_v34  ;;  %v2801_v15 = vpop.f32.mrf.mxu2  ;;  %2362 = vmatmul.bf16.gmra.mxu0 %v5222_v9 }
 0x557   :  { %v5401_v7 = vadd.f32 %v2801_v15, %v2543_v8  ;;  %v2544_v38 = vpop.f32.mrf.mxu1 }
 0x558   :  { %v2164_v62 = vadd.f32 %v6063_v55, %v1905_v18  ;;  %v2545_v22 = vadd.f32 %v2544_v38, %v4762_v51  ;;  %v6067_v18 = vld [vmem:[#allocation81_spill] sm:$0xff] }
 0x55a   :  { %v2913_v47 = vpack.c.bf16 %v6064_v40, %v2164_v62 }
 0x55c   :  { %3013 = vst [vmem:[#allocation2 + $0x60] sm:$0xff] %v2913_v47 }
 0x55d   :  { %v1906_v41 = vpop.f32.mrf.mxu3 }
 0x55e   :  { %v1907_v24 = vadd.f32 %v1906_v41, %v5277_v34  ;;  %v2803_v10 = vpop.f32.mrf.mxu2 }
 0x55f   :  { %v5409_v30 = vadd.f32 %v2803_v10, %v2545_v22  ;;  %v2547_v36 = vpop.f32.mrf.mxu1  ;;  %v5421_v22 = vpop.f32.mrf.mxu0 }
 0x560   :  { %v2166_v8 = vadd.f32 %v6066_v25, %v1907_v24  ;;  %v2548_v38 = vadd.f32 %v2547_v36, %v4762_v51  ;;  %6068 = vst [vmem:[#allocation68_spill] sm:$0xff] %v5421_v22 }
 0x562   :  { %v2914_v15 = vpack.c.bf16 %v4930_v60, %v2166_v8  ;;  %1948 = vmatmul.bf16.gmra.mxu3 %v5926_v48  ;;  %2586 = vmatmul.bf16.gmra.mxu1 %v6067_v18  ;;  %v6069_v60 = vld [vmem:[#allocation72_spill] sm:$0xff] }
 0x563   :  { %2845 = vmatmul.bf16.gmra.mxu2 %v5090_v4 }
 0x564   :  { %3014 = vst [vmem:[#allocation2 + $0x68] sm:$0xff] %v2914_v15 }
 0x565   :  { %v1909_v55 = vpop.f32.mrf.mxu3 }
 0x566   :  { %v1910_v62 = vadd.f32 %v1909_v55, %v5277_v34  ;;  %v2806_v40 = vpop.f32.mrf.mxu2  ;;  %2367 = vmatmul.bf16.gmra.mxu0 %v5240_v35  ;;  %v6070_v55 = vld [vmem:[#allocation73_spill] sm:$0xff] }
 0x567   :  { %v5419_v47 = vadd.f32 %v2806_v40, %v2548_v38  ;;  %v2549_v25 = vpop.f32.mrf.mxu1  ;;  %v5430_v40 = vpop.f32.mrf.mxu0 }
 0x568   :  { %v2169_v48 = vadd.f32 %v6069_v60, %v1910_v62  ;;  %v2550_v4 = vadd.f32 %v2549_v25, %v4762_v51  ;;  %6071 = vst [vmem:[#allocation60_spill] sm:$0xff] %v5430_v40  ;;  %v6074_v62 = vld [vmem:[#allocation84_spill] sm:$0xff]  ;;  %v6079_v40 = vld [vmem:[#allocation77_spill] sm:$0xff] }
 0x56a   :  { %v2915_v41 = vpack.c.bf16 %v4941_v52, %v2169_v48 }
 0x56c   :  { %3015 = vst [vmem:[#allocation2 + $0x70] sm:$0xff] %v2915_v41 }
 0x56d   :  { %v1911_v24 = vpop.f32.mrf.mxu3 }
 0x56e   :  { %v1912_v36 = vadd.f32 %v1911_v24, %v5277_v34  ;;  %v2808_v10 = vpop.f32.mrf.mxu2  ;;  %v6076_v24 = vld [vmem:[#allocation75_spill] sm:$0xff] }
 0x56f   :  { %v5427_v8 = vadd.f32 %v2808_v10, %v2550_v4  ;;  %v2552_v15 = vpop.f32.mrf.mxu1  ;;  %v5443_v10 = vpop.f32.mrf.mxu0 }
 0x570   :  { %v2171_v38 = vadd.f32 %v6070_v55, %v1912_v36  ;;  %v2553_v52 = vadd.f32 %v2552_v15, %v4762_v51  ;;  %v6077_v36 = vld [vmem:[#allocation28_spill] sm:$0xff]  ;;  %6078 = vst [vmem:[#allocation71_spill] sm:$0xff] %v5443_v10 }
 0x572   :  { %v2916_v22 = vpack.c.bf16 %v6072_v20, %v2171_v38  ;;  %1953 = vmatmul.bf16.gmra.mxu3 %v6073_v59  ;;  %2591 = vmatmul.bf16.gmra.mxu1 %v6074_v62  ;;  %v6081_v62 = vld [vmem:[#allocation15_spill] sm:$0xff] }
 0x573   :  { %2850 = vmatmul.bf16.gmra.mxu2 %v5110_v21 }
 0x574   :  { %3016 = vst [vmem:[#allocation2 + $0x78] sm:$0xff] %v2916_v22 }
 0x575   :  { %v1914_v25 = vpop.f32.mrf.mxu3 }
 0x576   :  { %v1915_v60 = vadd.f32 %v1914_v25, %v5277_v34  ;;  %v2811_v48 = vpop.f32.mrf.mxu2  ;;  %2372 = vmatmul.bf16.gmra.mxu0 %v5256_v0 }
 0x577   :  { %v5439_v41 = vadd.f32 %v2811_v48, %v2553_v52  ;;  %v2554_v4 = vpop.f32.mrf.mxu1  ;;  %v6080_v48 = vld [vmem:[#allocation100_spill] sm:$0xff] }
 0x578   :  { %v2174_v20 = vadd.f32 %v6076_v24, %v1915_v60  ;;  %v2555_v21 = vadd.f32 %v2554_v4, %v4762_v51  ;;  %v6082_v60 = vld [vmem:[#allocation87_spill] sm:$0xff] }
 0x579   :  { %6075 = vst [vmem:[#allocation61_spill] sm:$0xff] %v5439_v41 }
 0x57a   :  { %v2917_v59 = vpack.c.bf16 %v6077_v36, %v2174_v20  ;;  %v5455_v20 = vpop.f32.mrf.mxu0 }
 0x57b   :  { %6083 = vst [vmem:[#allocation63_spill] sm:$0xff] %v5455_v20  ;;  %v6086_v20 = vld [vmem:[#allocation80_spill] sm:$0xff] }
 0x57c   :  { %3017 = vst [vmem:[#allocation2 + $0x80] sm:$0xff] %v2917_v59 }
 0x57d   :  { %v1916_v22 = vpop.f32.mrf.mxu3 }
 0x57e   :  { %v1917_v15 = vadd.f32 %v1916_v22, %v5277_v34  ;;  %v2813_v55 = vpop.f32.mrf.mxu2  ;;  %v6084_v22 = vld [vmem:[#allocation79_spill] sm:$0xff] }
 0x57f   :  { %v5447_v38 = vadd.f32 %v2813_v55, %v2555_v21  ;;  %v2557_v25 = vpop.f32.mrf.mxu1 }
 0x580   :  { %v2176_v52 = vadd.f32 %v6079_v40, %v1917_v15  ;;  %v2558_v4 = vadd.f32 %v2557_v25, %v4762_v51  ;;  %v6085_v15 = vld [vmem:[#allocation30_spill] sm:$0xff] }
 0x582   :  { %v2918_v41 = vpack.c.bf16 %v6080_v48, %v2176_v52  ;;  %1958 = vmatmul.bf16.gmra.mxu3 %v6081_v62  ;;  %2596 = vmatmul.bf16.gmra.mxu1 %v6082_v60 }
 0x583   :  { %2855 = vmatmul.bf16.gmra.mxu2 %v5128_v29 }
 0x584   :  { %3018 = vst [vmem:[#allocation2 + $0x88] sm:$0xff] %v2918_v41 }
 0x585   :  { %v1919_v24 = vpop.f32.mrf.mxu3 }
 0x586   :  { %v1920_v36 = vadd.f32 %v1919_v24, %v5277_v34  ;;  %v2816_v59 = vpop.f32.mrf.mxu2  ;;  %2377 = vmatmul.bf16.gmra.mxu0 %v5279_v26  ;;  %v6092_v26 = vld [vmem:[#allocation92_spill] sm:$0xff] }
 0x587   :  { %v5459_v40 = vadd.f32 %v2816_v59, %v2558_v4  ;;  %v2559_v21 = vpop.f32.mrf.mxu1  ;;  %v6087_v59 = vld [vmem:[#allocation9_spill] sm:$0xff] }
 0x588   :  { %v2179_v62 = vadd.f32 %v6084_v22, %v1920_v36  ;;  %v2560_v29 = vadd.f32 %v2559_v21, %v4762_v51 }
 0x58a   :  { %v2919_v55 = vpack.c.bf16 %v6085_v15, %v2179_v62 }
 0x58c   :  { %3019 = vst [vmem:[#allocation2 + $0x90] sm:$0xff] %v2919_v55 }
 0x58d   :  { %v1921_v41 = vpop.f32.mrf.mxu3 }
 0x58e   :  { %v1922_v25 = vadd.f32 %v1921_v41, %v5277_v34  ;;  %v2818_v52 = vpop.f32.mrf.mxu2 }
 0x58f   :  { %v5465_v48 = vadd.f32 %v2818_v52, %v2560_v29  ;;  %v2562_v24 = vpop.f32.mrf.mxu1  ;;  %v6088_v29 = vld [vmem:[#allocation82_spill] sm:$0xff] }
 0x590   :  { %v2181_v10 = vadd.f32 %v6086_v20, %v1922_v25  ;;  %v2563_v36 = vadd.f32 %v2562_v24, %v4762_v51  ;;  %v6089_v24 = vld [vmem:[#allocation83_spill] sm:$0xff] }
 0x592   :  { %v2920_v4 = vpack.c.bf16 %v4996_v32, %v2181_v10  ;;  %1963 = vmatmul.bf16.gmra.mxu3 %v5945_v39  ;;  %2601 = vmatmul.bf16.gmra.mxu1 %v6087_v59 }
 0x593   :  { %2860 = vmatmul.bf16.gmra.mxu2 %v5150_v23 }
 0x594   :  { %3020 = vst [vmem:[#allocation2 + $0x98] sm:$0xff] %v2920_v4 }
 0x595   :  { %v1924_v21 = vpop.f32.mrf.mxu3 }
 0x596   :  { %v1925_v22 = vadd.f32 %v1924_v21, %v5277_v34  ;;  %v2821_v62 = vpop.f32.mrf.mxu2  ;;  %v6090_v21 = vld [vmem:[#allocation105_spill] sm:$0xff] }
 0x597   :  { %v5474_v15 = vadd.f32 %v2821_v62, %v2563_v36  ;;  %v2564_v55 = vpop.f32.mrf.mxu1  ;;  %v6091_v62 = vld [vmem:[#allocation17_spill] sm:$0xff] }
 0x598   :  { %v2184_v20 = vadd.f32 %v6088_v29, %v1925_v22  ;;  %v2565_v39 = vadd.f32 %v2564_v55, %v4762_v51 }
 0x59a   :  { %v2921_v32 = vpack.c.bf16 %v5007_v33, %v2184_v20 }
 0x59c   :  { %3021 = vst [vmem:[#allocation2 + $0xa0] sm:$0xff] %v2921_v32 }
 0x59d   :  { %v1926_v10 = vpop.f32.mrf.mxu3 }
 0x59e   :  { %v1927_v23 = vadd.f32 %v1926_v10, %v5277_v34  ;;  %v2823_v41 = vpop.f32.mrf.mxu2 }
 0x59f   :  { %v5480_v25 = vadd.f32 %v2823_v41, %v2565_v39  ;;  %v2567_v52 = vpop.f32.mrf.mxu1  ;;  %v6094_v39 = vld [vmem:[#allocation85_spill] sm:$0xff] }
 0x5a0   :  { %v2186_v4 = vadd.f32 %v6089_v24, %v1927_v23  ;;  %v2568_v33 = vadd.f32 %v2567_v52, %v4762_v51  ;;  %v6095_v23 = vld [vmem:[#allocation46_spill] sm:$0xff] }
 0x5a1   :  { %v6096_v52 = vld [vmem:[#allocation86_spill] sm:$0xff] }
 0x5a2   :  { %v2922_v36 = vpack.c.bf16 %v6090_v21, %v2186_v4  ;;  %1968 = vmatmul.bf16.gmra.mxu3 %v6091_v62  ;;  %2606 = vmatmul.bf16.gmra.mxu1 %v6092_v26  ;;  %v6097_v26 = vld [vmem:[#allocation109_spill] sm:$0xff] }
 0x5a3   :  { %2865 = vmatmul.bf16.gmra.mxu2 %v5170_v13 }
 0x5a4   :  { %3022 = vst [vmem:[#allocation2 + $0xa8] sm:$0xff] %v2922_v36 }
 0x5a5   :  { %v1929_v22 = vpop.f32.mrf.mxu3 }
 0x5a6   :  { %v1930_v55 = vadd.f32 %v1929_v22, %v5277_v34  ;;  %v2826_v29 = vpop.f32.mrf.mxu2 }
 0x5a7   :  { %v5489_v20 = vadd.f32 %v2826_v29, %v2568_v33  ;;  %v2569_v32 = vpop.f32.mrf.mxu1  ;;  %v6098_v29 = vld [vmem:[#allocation18_spill] sm:$0xff] }
 0x5a8   :  { %v2189_v10 = vadd.f32 %v6094_v39, %v1930_v55  ;;  %v2570_v24 = vadd.f32 %v2569_v32, %v4762_v51 }
 0x5a9   :  { %6093 = vst [vmem:[#allocation64_spill] sm:$0xff] %v5489_v20  ;;  %v6099_v20 = vld [vmem:[#allocation11_spill] sm:$0xff] }
 0x5aa   :  { %v2923_v41 = vpack.c.bf16 %v6095_v23, %v2189_v10 }
 0x5ac   :  { %3023 = vst [vmem:[#allocation2 + $0xb0] sm:$0xff] %v2923_v41  ;;  %v6100_v41 = vld [vmem:[#allocation88_spill] sm:$0xff] }
 0x5ad   :  { %v1931_v4 = vpop.f32.mrf.mxu3 }
 0x5ae   :  { %v1932_v13 = vadd.f32 %v1931_v4, %v5277_v34  ;;  %v2828_v21 = vpop.f32.mrf.mxu2  ;;  %v6101_v4 = vld [vmem:[#allocation48_spill] sm:$0xff] }
 0x5af   :  { %v5495_v36 = vadd.f32 %v2828_v21, %v2570_v24  ;;  %v2572_v22 = vpop.f32.mrf.mxu1 }
 0x5b0   :  { %v2191_v62 = vadd.f32 %v6096_v52, %v1932_v13  ;;  %v2573_v55 = vadd.f32 %v2572_v22, %v4762_v51  ;;  %v6102_v22 = vld [vmem:[#allocation89_spill] sm:$0xff] }
 0x5b2   :  { %v2924_v33 = vpack.c.bf16 %v6097_v26, %v2191_v62  ;;  %1973 = vmatmul.bf16.gmra.mxu3 %v6098_v29  ;;  %2611 = vmatmul.bf16.gmra.mxu1 %v6099_v20 }
 0x5b3   :  { %2870 = vmatmul.bf16.gmra.mxu2 %v5188_v63 }
 0x5b4   :  { %3024 = vst [vmem:[#allocation2 + $0xb8] sm:$0xff] %v2924_v33 }
 0x5b5   :  { %v1934_v32 = vpop.f32.mrf.mxu3 }
 0x5b6   :  { %v1935_v39 = vadd.f32 %v1934_v32, %v5277_v34  ;;  %v2831_v10 = vpop.f32.mrf.mxu2 }
 0x5b7   :  { %v5504_v23 = vadd.f32 %v2831_v10, %v2573_v55  ;;  %v2574_v26 = vpop.f32.mrf.mxu1  ;;  %v6103_v55 = vld [vmem:[#allocation97_spill] sm:$0xff] }
 0x5b8   :  { %v2194_v24 = vadd.f32 %v6100_v41, %v1935_v39  ;;  %v2575_v21 = vadd.f32 %v2574_v26, %v4762_v51  ;;  %v6104_v41 = vld [vmem:[#allocation90_spill] sm:$0xff] }
 0x5ba   :  { %v2925_v13 = vpack.c.bf16 %v6101_v4, %v2194_v24  ;;  %v6105_v4 = vld [vmem:[#allocation22_spill] sm:$0xff] }
 0x5bc   :  { %3025 = vst [vmem:[#allocation2 + $0xc0] sm:$0xff] %v2925_v13 }
 0x5bd   :  { %v1936_v52 = vpop.f32.mrf.mxu3 }
 0x5be   :  { %v1937_v63 = vadd.f32 %v1936_v52, %v5277_v34  ;;  %v2833_v62 = vpop.f32.mrf.mxu2  ;;  %v6106_v52 = vld [vmem:[#allocation21_spill] sm:$0xff] }
 0x5bf   :  { %v5510_v33 = vadd.f32 %v2833_v62, %v2575_v21  ;;  %v6108_v62 = vld [vmem:[#allocation23_spill] sm:$0xff] }
 0x5c0   :  { %v2196_v29 = vadd.f32 %v6102_v22, %v1937_v63  ;;  %v6107_v63 = vld [vmem:[#allocation32_spill] sm:$0xff]  ;;  %v6109_v22 = vld [vmem:[#allocation101_spill] sm:$0xff] }
 0x5c2   :  { %v2926_v32 = vpack.c.bf16 %v5063_v57, %v2196_v29  ;;  %1978 = vmatmul.bf16.gmra.mxu3 %v5966_v58  ;;  %2616 = vmatmul.bf16.gmra.mxu1 %v6103_v55 }
 0x5c3   :  { %2875 = vmatmul.bf16.gmra.mxu2 %v5204_v44 }
 0x5c4   :  { %3026 = vst [vmem:[#allocation2 + $0xc8] sm:$0xff] %v2926_v32  ;;  %v6110_v32 = vld [vmem:[#allocation93_spill] sm:$0xff] }
 0x5c5   :  { %v1939_v39 = vpop.f32.mrf.mxu3 }
 0x5c6   :  { %v1940_v10 = vadd.f32 %v1939_v39, %v5277_v34 }
 0x5c8   :  { %v2199_v24 = vadd.f32 %v6104_v41, %v1940_v10 }
 0x5ca   :  { %v2927_v13 = vpack.c.bf16 %v6105_v4, %v2199_v24  ;;  %v6111_v4 = vld [vmem:[#allocation94_spill] sm:$0xff] }
 0x5cc   :  { %3027 = vst [vmem:[#allocation2 + $0xd0] sm:$0xff] %v2927_v13 }
 0x5cd   :  { %v1941_v26 = vpop.f32.mrf.mxu3 }
 0x5ce   :  { %v1942_v21 = vadd.f32 %v1941_v26, %v5277_v34  ;;  %v6112_v26 = vld [vmem:[#allocation36_spill] sm:$0xff] }
 0x5d0   :  { %v2201_v57 = vadd.f32 %v6106_v52, %v1942_v21  ;;  %v6113_v52 = vld [vmem:[#allocation25_spill] sm:$0xff] }
 0x5d2   :  { %v2928_v58 = vpack.c.bf16 %v6107_v63, %v2201_v57  ;;  %1983 = vmatmul.bf16.gmra.mxu3 %v6108_v62  ;;  %2621 = vmatmul.bf16.gmra.mxu1 %v6109_v22  ;;  %v6114_v57 = vld [vmem:[#allocation16_spill] sm:$0xff] }
 0x5d3   :  { %2880 = vmatmul.bf16.gmra.mxu2 %v5222_v9 }
 0x5d4   :  { %3028 = vst [vmem:[#allocation2 + $0xd8] sm:$0xff] %v2928_v58  ;;  %v6115_v58 = vld [vmem:[#allocation95_spill] sm:$0xff] }
 0x5d5   :  { %v1944_v44 = vpop.f32.mrf.mxu3 }
 0x5d6   :  { %v1945_v29 = vadd.f32 %v1944_v44, %v5277_v34 }
 0x5d8   :  { %v2204_v39 = vadd.f32 %v6110_v32, %v1945_v29  ;;  %v6116_v32 = vld [vmem:[#allocation26_spill] sm:$0xff] }
 0x5da   :  { %v2929_v10 = vpack.c.bf16 %v5098_v46, %v2204_v39 }
 0x5dc   :  { %3029 = vst [vmem:[#allocation2 + $0xe0] sm:$0xff] %v2929_v10  ;;  %v6117_v10 = vld [vmem:[#allocation44_spill] sm:$0xff] }
 0x5dd   :  { %v1946_v41 = vpop.f32.mrf.mxu3 }
 0x5de   :  { %v1947_v24 = vadd.f32 %v1946_v41, %v5277_v34 }
 0x5e0   :  { %v2206_v13 = vadd.f32 %v6111_v4, %v1947_v24  ;;  %v6118_v24 = vld [vmem:[#allocation27_spill] sm:$0xff]  ;;  %v6119_v4 = vld [vmem:[#allocation106_spill] sm:$0xff] }
 0x5e2   :  { %v2930_v21 = vpack.c.bf16 %v6112_v26, %v2206_v13  ;;  %1988 = vmatmul.bf16.gmra.mxu3 %v6113_v52  ;;  %2626 = vmatmul.bf16.gmra.mxu1 %v6114_v57  ;;  %v6120_v26 = vld [vmem:[#allocation98_spill] sm:$0xff] }
 0x5e3   :  { %2885 = vmatmul.bf16.gmra.mxu2 %v5240_v35 }
 0x5e4   :  { %3030 = vst [vmem:[#allocation2 + $0xe8] sm:$0xff] %v2930_v21  ;;  %v6121_v21 = vld [vmem:[#allocation5_spill] sm:$0xff] }
 0x5e5   :  { %v1949_v9 = vpop.f32.mrf.mxu3 }
 0x5e6   :  { %v1950_v63 = vadd.f32 %v1949_v9, %v5277_v34 }
 0x5e8   :  { %v2209_v46 = vadd.f32 %v6115_v58, %v1950_v63  ;;  %v6122_v58 = vld [vmem:[#allocation99_spill] sm:$0xff] }
 0x5ea   :  { %v2931_v62 = vpack.c.bf16 %v5117_v12, %v2209_v46 }
 0x5ec   :  { %3031 = vst [vmem:[#allocation2 + $0xf0] sm:$0xff] %v2931_v62  ;;  %v6123_v62 = vld [vmem:[#allocation20_spill] sm:$0xff] }
 0x5ed   :  { %v1951_v44 = vpop.f32.mrf.mxu3 }
 0x5ee   :  { %v1952_v29 = vadd.f32 %v1951_v44, %v5277_v34 }
 0x5f0   :  { %v2211_v39 = vadd.f32 %v6116_v32, %v1952_v29  ;;  %v6124_v29 = vld [vmem:[#allocation29_spill] sm:$0xff] }
 0x5f2   :  { %v2932_v41 = vpack.c.bf16 %v6117_v10, %v2211_v39  ;;  %1993 = vmatmul.bf16.gmra.mxu3 %v6118_v24  ;;  %2631 = vmatmul.bf16.gmra.mxu1 %v6119_v4  ;;  %v6125_v39 = vld [vmem:[#allocation102_spill] sm:$0xff] }
 0x5f3   :  { %2890 = vmatmul.bf16.gmra.mxu2 %v5256_v0 }
 0x5f4   :  { %3032 = vst [vmem:[#allocation2 + $0xf8] sm:$0xff] %v2932_v41  ;;  %v6126_v41 = vld [vmem:[#allocation35_spill] sm:$0xff] }
 0x5f5   :  { %v1954_v35 = vpop.f32.mrf.mxu3 }
 0x5f6   :  { %v1955_v13 = vadd.f32 %v1954_v35, %v5277_v34 }
 0x5f8   :  { %v2214_v12 = vadd.f32 %v6120_v26, %v1955_v13  ;;  %v6127_v26 = vld [vmem:[#allocation103_spill] sm:$0xff] }
 0x5fa   :  { %v2933_v52 = vpack.c.bf16 %v6121_v21, %v2214_v12  ;;  %v6128_v21 = vld [vmem:[#allocation40_spill] sm:$0xff] }
 0x5fc   :  { %3033 = vst [vmem:[#allocation2 + $0x100] sm:$0xff] %v2933_v52 }
 0x5fd   :  { %v1956_v9 = vpop.f32.mrf.mxu3 }
 0x5fe   :  { %v1957_v63 = vadd.f32 %v1956_v9, %v5277_v34  ;;  %v6129_v9 = vld [vmem:[#allocation33_spill] sm:$0xff] }
 0x600   :  { %v2216_v46 = vadd.f32 %v6122_v58, %v1957_v63 }
 0x602   :  { %v2934_v44 = vpack.c.bf16 %v6123_v62, %v2216_v46  ;;  %1998 = vmatmul.bf16.gmra.mxu3 %v6124_v29  ;;  %v6130_v46 = vld [vmem:[#allocation104_spill] sm:$0xff] }
 0x604   :  { %3034 = vst [vmem:[#allocation2 + $0x108] sm:$0xff] %v2934_v44 }
 0x605   :  { %v1959_v0 = vpop.f32.mrf.mxu3 }
 0x606   :  { %v1960_v32 = vadd.f32 %v1959_v0, %v5277_v34 }
 0x608   :  { %v2219_v10 = vadd.f32 %v6125_v39, %v1960_v32  ;;  %v6131_v32 = vld [vmem:[#allocation38_spill] sm:$0xff] }
 0x60a   :  { %v2935_v24 = vpack.c.bf16 %v6126_v41, %v2219_v10  ;;  %v6132_v10 = vld [vmem:[#allocation45_spill] sm:$0xff] }
 0x60c   :  { %3035 = vst [vmem:[#allocation2 + $0x110] sm:$0xff] %v2935_v24  ;;  %v6133_v24 = vld [vmem:[#allocation43_spill] sm:$0xff] }
 0x60d   :  { %v1961_v35 = vpop.f32.mrf.mxu3 }
 0x60e   :  { %v1962_v13 = vadd.f32 %v1961_v35, %v5277_v34 }
 0x610   :  { %v2221_v12 = vadd.f32 %v6127_v26, %v1962_v13  ;;  %v6134_v26 = vld [vmem:[#allocation107_spill] sm:$0xff] }
 0x612   :  { %v2936_v52 = vpack.c.bf16 %v6128_v21, %v2221_v12  ;;  %2003 = vmatmul.bf16.gmra.mxu3 %v6129_v9  ;;  %v6135_v21 = vld [vmem:[#allocation7_spill] sm:$0xff] }
 0x614   :  { %3036 = vst [vmem:[#allocation2 + $0x118] sm:$0xff] %v2936_v52 }
 0x615   :  { %v1964_v63 = vpop.f32.mrf.mxu3 }
 0x616   :  { %v1965_v58 = vadd.f32 %v1964_v63, %v5277_v34  ;;  %v6136_v63 = vld [vmem:[#allocation108_spill] sm:$0xff] }
 0x618   :  { %v2224_v62 = vadd.f32 %v6130_v46, %v1965_v58  ;;  %v6137_v46 = vld [vmem:[#allocation114_spill] sm:$0xff] }
 0x61a   :  { %v2937_v44 = vpack.c.bf16 %v5177_v14, %v2224_v62 }
 0x61c   :  { %3037 = vst [vmem:[#allocation2 + $0x120] sm:$0xff] %v2937_v44  ;;  %v6138_v44 = vld [vmem:[#allocation47_spill] sm:$0xff] }
 0x61d   :  { %v1966_v29 = vpop.f32.mrf.mxu3 }
 0x61e   :  { %v1967_v0 = vadd.f32 %v1966_v29, %v5277_v34 }
 0x620   :  { %v2226_v39 = vadd.f32 %v6131_v32, %v1967_v0  ;;  %v6139_v32 = vld [vmem:[#allocation111_spill] sm:$0xff] }
 0x622   :  { %v2938_v41 = vpack.c.bf16 %v6132_v10, %v2226_v39  ;;  %2008 = vmatmul.bf16.gmra.mxu3 %v6133_v24  ;;  %v6140_v10 = vld [vmem:[#allocation116_spill] sm:$0xff] }
 0x624   :  { %3038 = vst [vmem:[#allocation2 + $0x128] sm:$0xff] %v2938_v41 }
 0x625   :  { %v1969_v35 = vpop.f32.mrf.mxu3 }
 0x626   :  { %v1970_v13 = vadd.f32 %v1969_v35, %v5277_v34 }
 0x628   :  { %v2229_v12 = vadd.f32 %v6134_v26, %v1970_v13  ;;  %v6141_v13 = vld [vmem:[#allocation112_spill] sm:$0xff] }
 0x62a   :  { %v2939_v52 = vpack.c.bf16 %v6135_v21, %v2229_v12  ;;  %v6142_v12 = vld [vmem:[#allocation118_spill] sm:$0xff] }
 0x62c   :  { %3039 = vst [vmem:[#allocation2 + $0x130] sm:$0xff] %v2939_v52  ;;  %v6143_v52 = vld [vmem:[#allocation49_spill] sm:$0xff] }
 0x62d   :  { %v1971_v14 = vpop.f32.mrf.mxu3 }
 0x62e   :  { %v1972_v9 = vadd.f32 %v1971_v14, %v5277_v34 }
 0x630   :  { %v2231_v58 = vadd.f32 %v6136_v63, %v1972_v9  ;;  %v6144_v63 = vld [vmem:[#allocation14_spill] sm:$0xff] }
 0x632   :  { %v2940_v62 = vpack.c.bf16 %v6137_v46, %v2231_v58  ;;  %2013 = vmatmul.bf16.gmra.mxu3 %v6138_v44 }
 0x634   :  { %3040 = vst [vmem:[#allocation2 + $0x138] sm:$0xff] %v2940_v62 }
 0x635   :  { %v1974_v29 = vpop.f32.mrf.mxu3 }
 0x636   :  { %v1975_v0 = vadd.f32 %v1974_v29, %v5277_v34  ;;  %v6145_v29 = vld [vmem:[#allocation19_spill] sm:$0xff] }
 0x638   :  { %v2234_v39 = vadd.f32 %v6139_v32, %v1975_v0 }
 0x63a   :  { %v2941_v41 = vpack.c.bf16 %v6140_v10, %v2234_v39  ;;  %v6146_v39 = vld [vmem:[#allocation53_spill] sm:$0xff] }
 0x63c   :  { %3041 = vst [vmem:[#allocation2 + $0x140] sm:$0xff] %v2941_v41 }
 0x63d   :  { %v1976_v24 = vpop.f32.mrf.mxu3 }
 0x63e   :  { %v1977_v35 = vadd.f32 %v1976_v24, %v5277_v34  ;;  %v6147_v24 = vld [vmem:[#allocation50_spill] sm:$0xff] }
 0x640   :  { %v2236_v26 = vadd.f32 %v6141_v13, %v1977_v35  ;;  %v6148_v13 = vld [vmem:[#allocation120_spill] sm:$0xff] }
 0x642   :  { %v2942_v21 = vpack.c.bf16 %v6142_v12, %v2236_v26  ;;  %2018 = vmatmul.bf16.gmra.mxu3 %v6143_v52 }
 0x644   :  { %3042 = vst [vmem:[#allocation2 + $0x148] sm:$0xff] %v2942_v21  ;;  %v6149_v21 = vld [vmem:[#allocation34_spill] sm:$0xff] }
 0x645   :  { %v1979_v14 = vpop.f32.mrf.mxu3 }
 0x646   :  { %v1980_v9 = vadd.f32 %v1979_v14, %v5277_v34  ;;  %v6150_v14 = vld [vmem:[#allocation122_spill] sm:$0xff] }
 0x648   :  { %v2239_v58 = vadd.f32 %v6144_v63, %v1980_v9  ;;  %v6151_v63 = vld [vmem:[#allocation56_spill] sm:$0xff] }
 0x64a   :  { %v2943_v46 = vpack.c.bf16 %v5227_v16, %v2239_v58 }
 0x64c   :  { %3043 = vst [vmem:[#allocation2 + $0x150] sm:$0xff] %v2943_v46  ;;  %v6152_v46 = vld [vmem:[#allocation39_spill] sm:$0xff] }
 0x64d   :  { %v1981_v62 = vpop.f32.mrf.mxu3 }
 0x64e   :  { %v1982_v44 = vadd.f32 %v1981_v62, %v5277_v34 }
 0x650   :  { %v2241_v0 = vadd.f32 %v6145_v29, %v1982_v44  ;;  %v6153_v44 = vld [vmem:[#allocation124_spill] sm:$0xff] }
 0x652   :  { %v2944_v32 = vpack.c.bf16 %v5234_v37, %v2241_v0  ;;  %2023 = vmatmul.bf16.gmra.mxu3 %v6146_v39  ;;  %v6154_v39 = vld [vmem:[#allocation41_spill] sm:$0xff] }
 0x654   :  { %3044 = vst [vmem:[#allocation2 + $0x158] sm:$0xff] %v2944_v32 }
 0x655   :  { %v1984_v10 = vpop.f32.mrf.mxu3 }
 0x656   :  { %v1985_v41 = vadd.f32 %v1984_v10, %v5277_v34 }
 0x658   :  { %v2244_v35 = vadd.f32 %v6147_v24, %v1985_v41  ;;  %v6155_v41 = vld [vmem:[#allocation125_spill] sm:$0xff] }
 0x65a   :  { %v2945_v26 = vpack.c.bf16 %v6148_v13, %v2244_v35  ;;  %v6156_v35 = vld [vmem:[#allocation59_spill] sm:$0xff] }
 0x65c   :  { %3045 = vst [vmem:[#allocation2 + $0x160] sm:$0xff] %v2945_v26 }
 0x65d   :  { %v1986_v16 = vpop.f32.mrf.mxu3 }
 0x65e   :  { %v1987_v12 = vadd.f32 %v1986_v16, %v5277_v34  ;;  %v6157_v16 = vld [vmem:[#allocation13_spill] sm:$0xff] }
 0x660   :  { %v2246_v52 = vadd.f32 %v6149_v21, %v1987_v12 }
 0x662   :  { %v2946_v9 = vpack.c.bf16 %v6150_v14, %v2246_v52  ;;  %2028 = vmatmul.bf16.gmra.mxu3 %v6151_v63 }
 0x664   :  { %3046 = vst [vmem:[#allocation2 + $0x168] sm:$0xff] %v2946_v9  ;;  %v6158_v9 = vld [vmem:[#allocation31_spill] sm:$0xff] }
 0x665   :  { %v1989_v37 = vpop.f32.mrf.mxu3 }
 0x666   :  { %v1990_v58 = vadd.f32 %v1989_v37, %v5277_v34 }
 0x668   :  { %v2249_v62 = vadd.f32 %v6152_v46, %v1990_v58 }
 0x66a   :  { %v2947_v29 = vpack.c.bf16 %v6153_v44, %v2249_v62  ;;  %v6159_v62 = vld [vmem:[#allocation37_spill] sm:$0xff] }
 0x66c   :  { %3047 = vst [vmem:[#allocation2 + $0x170] sm:$0xff] %v2947_v29 }
 0x66d   :  { %v1991_v0 = vpop.f32.mrf.mxu3 }
 0x66e   :  { %v1992_v32 = vadd.f32 %v1991_v0, %v5277_v34 }
 0x670   :  { %v2251_v10 = vadd.f32 %v6154_v39, %v1992_v32  ;;  %v6160_v32 = vld [vmem:[#allocation42_spill] sm:$0xff] }
 0x672   :  { %v2948_v24 = vpack.c.bf16 %v6155_v41, %v2251_v10  ;;  %2033 = vmatmul.bf16.gmra.mxu3 %v6156_v35  ;;  %v6161_v41 = vld [vmem:[#allocation6_spill] sm:$0xff] }
 0x674   :  { %3048 = vst [vmem:[#allocation2 + $0x178] sm:$0xff] %v2948_v24 }
 0x675   :  { %v1994_v13 = vpop.f32.mrf.mxu3 }
 0x676   :  { %v1995_v26 = vadd.f32 %v1994_v13, %v5277_v34 }
 0x678   :  { %v2254_v12 = vadd.f32 %v6157_v16, %v1995_v26  ;;  %v6162_v26 = vld [vmem:[#allocation113_spill] sm:$0xff] }
 0x67a   :  { %v2949_v21 = vpack.c.bf16 %v5285_v19, %v2254_v12 }
 0x67c   :  { %3049 = vst [vmem:[#allocation2 + $0x180] sm:$0xff] %v2949_v21  ;;  %v6163_v21 = vld [vmem:[#allocation115_spill] sm:$0xff] }
 0x67d   :  { %v1996_v52 = vpop.f32.mrf.mxu3 }
 0x67e   :  { %v1997_v14 = vadd.f32 %v1996_v52, %v5277_v34 }
 0x680   :  { %v2256_v63 = vadd.f32 %v6158_v9, %v1997_v14 }
 0x682   :  { %v2950_v37 = vpack.c.bf16 %v5293_v42, %v2256_v63  ;;  %2038 = vmatmul.bf16.gmra.mxu3 %v6037_v3  ;;  %v6164_v63 = vld [vmem:[#allocation117_spill] sm:$0xff] }
 0x684   :  { %3050 = vst [vmem:[#allocation2 + $0x188] sm:$0xff] %v2950_v37 }
 0x685   :  { %v1999_v58 = vpop.f32.mrf.mxu3 }
 0x686   :  { %v2000_v46 = vadd.f32 %v1999_v58, %v5277_v34 }
 0x688   :  { %v2259_v44 = vadd.f32 %v6159_v62, %v2000_v46  ;;  %v6165_v46 = vld [vmem:[#allocation8_spill] sm:$0xff] }
 0x68a   :  { %v2951_v29 = vpack.c.bf16 %v5305_v27, %v2259_v44 }
 0x68c   :  { %3051 = vst [vmem:[#allocation2 + $0x190] sm:$0xff] %v2951_v29 }
 0x68d   :  { %v2001_v19 = vpop.f32.mrf.mxu3 }
 0x68e   :  { %v2002_v0 = vadd.f32 %v2001_v19, %v5277_v34  ;;  %v6166_v19 = vld [vmem:[#allocation119_spill] sm:$0xff] }
 0x690   :  { %v2261_v39 = vadd.f32 %v6160_v32, %v2002_v0 }
 0x692   :  { %v2952_v10 = vpack.c.bf16 %v5313_v49, %v2261_v39  ;;  %2043 = vmatmul.bf16.gmra.mxu3 %v6041_v53  ;;  %v6167_v39 = vld [vmem:[#allocation121_spill] sm:$0xff] }
 0x694   :  { %3052 = vst [vmem:[#allocation2 + $0x198] sm:$0xff] %v2952_v10 }
 0x695   :  { %v2004_v42 = vpop.f32.mrf.mxu3 }
 0x696   :  { %v2005_v3 = vadd.f32 %v2004_v42, %v5277_v34 }
 0x698   :  { %v2264_v24 = vadd.f32 %v6161_v41, %v2005_v3  ;;  %v6168_v41 = vld [vmem:[#allocation123_spill] sm:$0xff] }
 0x69a   :  { %v2953_v35 = vpack.c.bf16 %v5323_v28, %v2264_v24 }
 0x69c   :  { %3053 = vst [vmem:[#allocation2 + $0x1a0] sm:$0xff] %v2953_v35 }
 0x69d   :  { %v2006_v27 = vpop.f32.mrf.mxu3 }
 0x69e   :  { %v2007_v13 = vadd.f32 %v2006_v27, %v5277_v34  ;;  %v6169_v27 = vld [vmem:[#allocation126_spill] sm:$0xff] }
 0x6a0   :  { %v2266_v16 = vadd.f32 %v6162_v26, %v2007_v13 }
 0x6a2   :  { %v2954_v12 = vpack.c.bf16 %v5331_v11, %v2266_v16  ;;  %2048 = vmatmul.bf16.gmra.mxu3 %v6046_v50 }
 0x6a4   :  { %3054 = vst [vmem:[#allocation2 + $0x1a8] sm:$0xff] %v2954_v12 }
 0x6a5   :  { %v2009_v49 = vpop.f32.mrf.mxu3 }
 0x6a6   :  { %v2010_v53 = vadd.f32 %v2009_v49, %v5277_v34 }
 0x6a8   :  { %v2269_v52 = vadd.f32 %v6163_v21, %v2010_v53  ;;  %v6170_v53 = vld [vmem:[#allocation51_spill] sm:$0xff] }
 0x6aa   :  { %v2955_v14 = vpack.c.bf16 %v5343_v43, %v2269_v52 }
 0x6ac   :  { %3055 = vst [vmem:[#allocation2 + $0x1b0] sm:$0xff] %v2955_v14 }
 0x6ad   :  { %v2011_v28 = vpop.f32.mrf.mxu3 }
 0x6ae   :  { %v2012_v9 = vadd.f32 %v2011_v28, %v5277_v34 }
 0x6b0   :  { %v2271_v37 = vadd.f32 %v6164_v63, %v2012_v9  ;;  %v6171_v9 = vld [vmem:[#allocation84_spill] sm:$0xff] }
 0x6b1   :  { %v6172_v63 = vld [vmem:[#allocation76_spill] sm:$0xff] }
 0x6b2   :  { %v2956_v58 = vpack.c.bf16 %v5351_v54, %v2271_v37  ;;  %2053 = vmatmul.bf16.gmra.mxu3 %v6050_v56 }
 0x6b4   :  { %3056 = vst [vmem:[#allocation2 + $0x1b8] sm:$0xff] %v2956_v58  ;;  %v6173_v58 = vld [vmem:[#allocation61_spill] sm:$0xff] }
 0x6b5   :  { %v2014_v11 = vpop.f32.mrf.mxu3 }
 0x6b6   :  { %v2015_v50 = vadd.f32 %v2014_v11, %v5277_v34 }
 0x6b8   :  { %v2274_v62 = vadd.f32 %v6165_v46, %v2015_v50  ;;  %v6174_v46 = vld [vmem:[#allocation52_spill] sm:$0xff] }
 0x6ba   :  { %v2957_v44 = vpack.c.bf16 %v5363_v45, %v2274_v62 }
 0x6bc   :  { %3057 = vst [vmem:[#allocation2 + $0x1c0] sm:$0xff] %v2957_v44 }
 0x6bd   :  { %v2016_v43 = vpop.f32.mrf.mxu3 }
 0x6be   :  { %v2017_v29 = vadd.f32 %v2016_v43, %v5277_v34  ;;  %v6175_v43 = vld [vmem:[#allocation62_spill] sm:$0xff] }
 0x6c0   :  { %v2276_v0 = vadd.f32 %v6166_v19, %v2017_v29 }
 0x6c2   :  { %v2958_v32 = vpack.c.bf16 %v5369_v17, %v2276_v0  ;;  %2058 = vmatmul.bf16.gmra.mxu3 %v6055_v5 }
 0x6c4   :  { %3058 = vst [vmem:[#allocation2 + $0x1c8] sm:$0xff] %v2958_v32 }
 0x6c5   :  { %v2019_v54 = vpop.f32.mrf.mxu3 }
 0x6c6   :  { %v2020_v56 = vadd.f32 %v2019_v54, %v5277_v34  ;;  %v6176_v54 = vld [vmem:[#allocation54_spill] sm:$0xff] }
 0x6c8   :  { %v2279_v10 = vadd.f32 %v6167_v39, %v2020_v56 }
 0x6ca   :  { %v2959_v42 = vpack.c.bf16 %v5381_v2, %v2279_v10 }
 0x6cc   :  { %3059 = vst [vmem:[#allocation2 + $0x1d0] sm:$0xff] %v2959_v42  ;;  %v2836_v42 = vpop.f32.mrf.mxu2 }
 0x6cd   :  { %v2021_v45 = vpop.f32.mrf.mxu3 }
 0x6ce   :  { %v2022_v3 = vadd.f32 %v2021_v45, %v5277_v34  ;;  %v6177_v45 = vld [vmem:[#allocation55_spill] sm:$0xff] }
 0x6d0   :  { %v2281_v24 = vadd.f32 %v6168_v41, %v2022_v3 }
 0x6d2   :  { %v2960_v35 = vpack.c.bf16 %v5389_v31, %v2281_v24  ;;  %2063 = vmatmul.bf16.gmra.mxu3 %v6061_v6 }
 0x6d4   :  { %3060 = vst [vmem:[#allocation2 + $0x1d8] sm:$0xff] %v2960_v35 }
 0x6d5   :  { %v2024_v17 = vpop.f32.mrf.mxu3 }
 0x6d6   :  { %v2025_v5 = vadd.f32 %v2024_v17, %v5277_v34  ;;  %v6178_v17 = vld [vmem:[#allocation65_spill] sm:$0xff] }
 0x6d8   :  { %v2284_v13 = vadd.f32 %v6169_v27, %v2025_v5  ;;  %v6179_v27 = vld [vmem:[#allocation92_spill] sm:$0xff] }
 0x6da   :  { %v2961_v26 = vpack.c.bf16 %v5401_v7, %v2284_v13 }
 0x6dc   :  { %3061 = vst [vmem:[#allocation2 + $0x1e0] sm:$0xff] %v2961_v26 }
 0x6dd   :  { %v2026_v2 = vpop.f32.mrf.mxu3 }
 0x6de   :  { %v2027_v16 = vadd.f32 %v2026_v2, %v5277_v34  ;;  %v6180_v2 = vld [vmem:[#allocation57_spill] sm:$0xff] }
 0x6e0   :  { %v2286_v12 = vadd.f32 %v5288_v1, %v2027_v16 }
 0x6e2   :  { %v2962_v49 = vpack.c.bf16 %v5409_v30, %v2286_v12  ;;  %2068 = vmatmul.bf16.gmra.mxu3 %v6067_v18 }
 0x6e4   :  { %3062 = vst [vmem:[#allocation2 + $0x1e8] sm:$0xff] %v2962_v49 }
 0x6e5   :  { %v2029_v31 = vpop.f32.mrf.mxu3 }
 0x6e6   :  { %v2030_v6 = vadd.f32 %v2029_v31, %v5277_v34 }
 0x6e8   :  { %v2289_v21 = vadd.f32 %v6170_v53, %v2030_v6  ;;  %v2323_v6 = vpop.f32.mrf.mxu0 }
 0x6ea   :  { %v2963_v52 = vpack.c.bf16 %v5419_v47, %v2289_v21 }
 0x6ec   :  { %3063 = vst [vmem:[#allocation2 + $0x1f0] sm:$0xff] %v2963_v52  ;;  %v6182_v52 = vld [vmem:[#allocation58_spill] sm:$0xff] }
 0x6ed   :  { %v2031_v7 = vpop.f32.mrf.mxu3 }
 0x6ee   :  { %v2032_v14 = vadd.f32 %v2031_v7, %v5277_v34 }
 0x6f0   :  { %v2291_v28 = vadd.f32 %v5310_v61, %v2032_v14 }
 0x6f2   :  { %v2964_v1 = vpack.c.bf16 %v5427_v8, %v2291_v28  ;;  %2073 = vmatmul.bf16.gmra.mxu3 %v6171_v9 }
 0x6f4   :  { %3064 = vst [vmem:[#allocation2 + $0x1f8] sm:$0xff] %v2964_v1 }
 0x6f5   :  { %v2034_v30 = vpop.f32.mrf.mxu3 }
 0x6f6   :  { %v2035_v18 = vadd.f32 %v2034_v30, %v5277_v34  ;;  %v2325_v30 = vpop.f32.mrf.mxu0 }
 0x6f8   :  { %v2294_v37 = vadd.f32 %v6172_v63, %v2035_v18  ;;  %v6183_v18 = vld [vmem:[#allocation68_spill] sm:$0xff] }
 0x6fa   :  { %v2965_v11 = vpack.c.bf16 %v6173_v58, %v2294_v37 }
 0x6fc   :  { %3065 = vst [vmem:[#allocation2 + $0x200] sm:$0xff] %v2965_v11 }
 0x6fd   :  { %v2036_v47 = vpop.f32.mrf.mxu3 }
 0x6fe   :  { %v2037_v50 = vadd.f32 %v2036_v47, %v5277_v34 }
 0x700   :  { %v2296_v62 = vadd.f32 %v6174_v46, %v2037_v50 }
 0x702   :  { %v2966_v61 = vpack.c.bf16 %v5447_v38, %v2296_v62  ;;  %2078 = vmatmul.bf16.gmra.mxu3 %v6082_v60  ;;  %v2577_v38 = vpop.f32.mrf.mxu1 }
 0x704   :  { %3066 = vst [vmem:[#allocation2 + $0x208] sm:$0xff] %v2966_v61 }
 0x705   :  { %v2039_v8 = vpop.f32.mrf.mxu3 }
 0x706   :  { %v2040_v44 = vadd.f32 %v2039_v8, %v5277_v34  ;;  %v2578_v8 = vadd.f32 %v2577_v38, %v4762_v51 }
 0x708   :  { %v2299_v29 = vadd.f32 %v6175_v43, %v2040_v44  ;;  %v2837_v43 = vadd.f32 %v2836_v42, %v2578_v8 }
 0x70a   :  { %v2967_v19 = vpack.c.bf16 %v5459_v40, %v2299_v29  ;;  %v2579_v35 = vpop.f32.mrf.mxu1  ;;  %v6185_v29 = vld [vmem:[#allocation71_spill] sm:$0xff] }
 0x70c   :  { %3067 = vst [vmem:[#allocation2 + $0x210] sm:$0xff] %v2967_v19 }
 0x70d   :  { %v2041_v0 = vpop.f32.mrf.mxu3 }
 0x70e   :  { %v2042_v32 = vadd.f32 %v2041_v0, %v5277_v34 }
 0x710   :  { %v2301_v56 = vadd.f32 %v6176_v54, %v2042_v32 }
 0x712   :  { %v2968_v39 = vpack.c.bf16 %v5465_v48, %v2301_v56  ;;  %2083 = vmatmul.bf16.gmra.mxu3 %v6087_v59  ;;  %v2838_v48 = vpop.f32.mrf.mxu2  ;;  %v2582_v12 = vpop.f32.mrf.mxu1 }
 0x714   :  { %3068 = vst [vmem:[#allocation2 + $0x218] sm:$0xff] %v2968_v39  ;;  %v2580_v39 = vadd.f32 %v2579_v35, %v4762_v51 }
 0x715   :  { %v2044_v60 = vpop.f32.mrf.mxu3 }
 0x716   :  { %v2045_v10 = vadd.f32 %v2044_v60, %v5277_v34  ;;  %v6186_v60 = vld [vmem:[#allocation63_spill] sm:$0xff] }
 0x718   :  { %v2304_v3 = vadd.f32 %v6177_v45, %v2045_v10 }
 0x71a   :  { %v2969_v40 = vpack.c.bf16 %v5474_v15, %v2304_v3  ;;  %v6181_v15 = vld [vmem:[#allocation64_spill] sm:$0xff]  ;;  %v2841_v31 = vpop.f32.mrf.mxu2  ;;  %v2584_v14 = vpop.f32.mrf.mxu1 }
 0x71c   :  { %3069 = vst [vmem:[#allocation2 + $0x220] sm:$0xff] %v2969_v40 }
 0x71d   :  { %v2046_v41 = vpop.f32.mrf.mxu3 }
 0x71e   :  { %v2047_v24 = vadd.f32 %v2046_v41, %v5277_v34  ;;  %v2583_v41 = vadd.f32 %v2582_v12, %v4762_v51 }
 0x720   :  { %v2306_v5 = vadd.f32 %v6178_v17, %v2047_v24  ;;  %v2842_v17 = vadd.f32 %v2841_v31, %v2583_v41 }
 0x722   :  { %v2970_v59 = vpack.c.bf16 %v5480_v25, %v2306_v5  ;;  %2088 = vmatmul.bf16.gmra.mxu3 %v6179_v27  ;;  %v2843_v28 = vpop.f32.mrf.mxu2  ;;  %v2587_v58 = vpop.f32.mrf.mxu1 }
 0x723   :  { %v2588_v31 = vadd.f32 %v2587_v58, %v4762_v51 }
 0x724   :  { %3070 = vst [vmem:[#allocation2 + $0x228] sm:$0xff] %v2970_v59 }
 0x725   :  { %v2049_v13 = vpop.f32.mrf.mxu3 }
 0x726   :  { %v2050_v26 = vadd.f32 %v2049_v13, %v5277_v34  ;;  %v2585_v13 = vadd.f32 %v2584_v14, %v4762_v51 }
 0x728   :  { %v2309_v16 = vadd.f32 %v6180_v2, %v2050_v26  ;;  %v2844_v2 = vadd.f32 %v2843_v28, %v2585_v13 }
 0x72a   :  { %v2971_v49 = vpack.c.bf16 %v6181_v15, %v2309_v16  ;;  %v2846_v50 = vpop.f32.mrf.mxu2 }
 0x72c   :  { %3071 = vst [vmem:[#allocation2 + $0x230] sm:$0xff] %v2971_v49 }
 0x72d   :  { %v2051_v53 = vpop.f32.mrf.mxu3 }
 0x72e   :  { %v2052_v21 = vadd.f32 %v2051_v53, %v5277_v34 }
 0x730   :  { %v2311_v7 = vadd.f32 %v6182_v52, %v2052_v21  ;;  %v2847_v21 = vadd.f32 %v2846_v50, %v2588_v31 }
 0x732   :  { %v2972_v25 = vpack.c.bf16 %v5495_v36, %v2311_v7  ;;  %2093 = vmatmul.bf16.gmra.mxu3 %v6099_v20  ;;  %v6184_v36 = vld [vmem:[#allocation60_spill] sm:$0xff]  ;;  %v2328_v20 = vpop.f32.mrf.mxu0  ;;  %v2848_v0 = vpop.f32.mrf.mxu2 }
 0x734   :  { %3072 = vst [vmem:[#allocation2 + $0x238] sm:$0xff] %v2972_v25 }
 0x735   :  { %v2054_v1 = vpop.f32.mrf.mxu3 }
 0x736   :  { %v2055_v9 = vadd.f32 %v2054_v1, %v5277_v34 }
 0x738   :  { %v2314_v63 = vadd.f32 %v6183_v18, %v2055_v9 }
 0x73a   :  { %v2973_v37 = vpack.c.bf16 %v5504_v23, %v2314_v63  ;;  %v2589_v23 = vpop.f32.mrf.mxu1  ;;  %v2330_v54 = vpop.f32.mrf.mxu0 }
 0x73b   :  { %v2851_v3 = vpop.f32.mrf.mxu2  ;;  %v2590_v28 = vadd.f32 %v2589_v23, %v4762_v51 }
 0x73c   :  { %3073 = vst [vmem:[#allocation2 + $0x240] sm:$0xff] %v2973_v37 }
 0x73d   :  { %v2056_v11 = vpop.f32.mrf.mxu3 }
 0x73e   :  { %v2057_v47 = vadd.f32 %v2056_v11, %v5277_v34 }
 0x740   :  { %v2316_v46 = vadd.f32 %v6184_v36, %v2057_v47 }
 0x742   :  { %v2974_v62 = vpack.c.bf16 %v5510_v33, %v2316_v46  ;;  %2098 = vmatmul.bf16.gmra.mxu3 %v6103_v55  ;;  %v2839_v55 = vadd.f32 %v2838_v48, %v2580_v39  ;;  %v2592_v45 = vpop.f32.mrf.mxu1  ;;  %v2333_v42 = vpop.f32.mrf.mxu0 }
 0x743   :  { %v2853_v48 = vpop.f32.mrf.mxu2  ;;  %v2593_v11 = vadd.f32 %v2592_v45, %v4762_v51 }
 0x744   :  { %3074 = vst [vmem:[#allocation2 + $0x248] sm:$0xff] %v2974_v62 }
 0x745   :  { %v2059_v61 = vpop.f32.mrf.mxu3  ;;  %v2852_v50 = vadd.f32 %v2851_v3, %v2593_v11 }
 0x746   :  { %v2060_v44 = vadd.f32 %v2059_v61, %v5277_v34 }
 0x748   :  { %v2319_v19 = vadd.f32 %v6185_v29, %v2060_v44 }
 0x74a   :  { %v2975_v32 = vpack.c.bf16 %v2837_v43, %v2319_v19  ;;  %v2594_v59 = vpop.f32.mrf.mxu1  ;;  %v6187_v19 = vld [vmem:[#allocation110_spill] sm:$0xff] }
 0x74b   :  { %v2856_v53 = vpop.f32.mrf.mxu2  ;;  %v2595_v44 = vadd.f32 %v2594_v59, %v4762_v51 }
 0x74c   :  { %3075 = vst [vmem:[#allocation2 + $0x250] sm:$0xff] %v2975_v32 }
 0x74d   :  { %v2061_v56 = vpop.f32.mrf.mxu3 }
 0x74e   :  { %v2062_v33 = vadd.f32 %v2061_v56, %v5277_v34 }
 0x750   :  { %v2321_v10 = vadd.f32 %v6186_v60, %v2062_v33 }
 0x752   :  { %v2976_v38 = vpack.c.bf16 %v2839_v55, %v2321_v10  ;;  %2103 = vmatmul.bf16.gmra.mxu3 %v6109_v22  ;;  %v2335_v22 = vpop.f32.mrf.mxu0  ;;  %v2597_v12 = vpop.f32.mrf.mxu1 }
 0x753   :  { %v2858_v18 = vpop.f32.mrf.mxu2  ;;  %v2598_v56 = vadd.f32 %v2597_v12, %v4762_v51 }
 0x754   :  { %3076 = vst [vmem:[#allocation2 + $0x258] sm:$0xff] %v2976_v38 }
 0x755   :  { %v2064_v40 = vpop.f32.mrf.mxu3  ;;  %v2857_v55 = vadd.f32 %v2856_v53, %v2598_v56 }
 0x756   :  { %v2065_v24 = vadd.f32 %v2064_v40, %v5277_v34 }
 0x758   :  { %v2324_v5 = vadd.f32 %v2323_v6, %v2065_v24 }
 0x75a   :  { %v2977_v35 = vpack.c.bf16 %v2842_v17, %v2324_v5  ;;  %v2338_v7 = vpop.f32.mrf.mxu0  ;;  %v2599_v9 = vpop.f32.mrf.mxu1 }
 0x75b   :  { %v2861_v62 = vpop.f32.mrf.mxu2  ;;  %v2600_v3 = vadd.f32 %v2599_v9, %v4762_v51 }
 0x75c   :  { %3077 = vst [vmem:[#allocation2 + $0x260] sm:$0xff] %v2977_v35 }
 0x75d   :  { %v2066_v27 = vpop.f32.mrf.mxu3  ;;  %v2859_v41 = vadd.f32 %v2858_v18, %v2600_v3 }
 0x75e   :  { %v2067_v26 = vadd.f32 %v2066_v27, %v5277_v34 }
 0x760   :  { %v2326_v16 = vadd.f32 %v2325_v30, %v2067_v26 }
 0x762   :  { %v2978_v15 = vpack.c.bf16 %v2844_v2, %v2326_v16  ;;  %2108 = vmatmul.bf16.gmra.mxu3 %v6114_v57  ;;  %v2849_v57 = vadd.f32 %v2848_v0, %v2590_v28  ;;  %v2340_v37 = vpop.f32.mrf.mxu0  ;;  %v2602_v46 = vpop.f32.mrf.mxu1 }
 0x763   :  { %v2863_v32 = vpop.f32.mrf.mxu2  ;;  %v2603_v59 = vadd.f32 %v2602_v46, %v4762_v51 }
 0x764   :  { %3078 = vst [vmem:[#allocation2 + $0x268] sm:$0xff] %v2978_v15 }
 0x765   :  { %v2069_v49 = vpop.f32.mrf.mxu3  ;;  %v2862_v13 = vadd.f32 %v2861_v62, %v2603_v59 }
 0x766   :  { %v2070_v6 = vadd.f32 %v2069_v49, %v5277_v34 }
 0x768   :  { %v2329_v52 = vadd.f32 %v2328_v20, %v2070_v6 }
 0x76a   :  { %v2979_v25 = vpack.c.bf16 %v2847_v21, %v2329_v52  ;;  %v2343_v61 = vpop.f32.mrf.mxu0  ;;  %v2604_v0 = vpop.f32.mrf.mxu1  ;;  %v6188_v52 = vld [vmem:[#allocation127_spill] sm:$0xff] }
 0x76b   :  { %v2866_v40 = vpop.f32.mrf.mxu2  ;;  %v2605_v12 = vadd.f32 %v2604_v0, %v4762_v51 }
 0x76c   :  { %3079 = vst [vmem:[#allocation2 + $0x270] sm:$0xff] %v2979_v25 }
 0x76d   :  { %v2071_v14 = vpop.f32.mrf.mxu3  ;;  %v2864_v31 = vadd.f32 %v2863_v32, %v2605_v12 }
 0x76e   :  { %v2072_v1 = vadd.f32 %v2071_v14, %v5277_v34 }
 0x770   :  { %v2331_v30 = vadd.f32 %v2330_v54, %v2072_v1 }
 0x772   :  { %v2980_v63 = vpack.c.bf16 %v2849_v57, %v2331_v30  ;;  %2113 = vmatmul.bf16.gmra.mxu3 %v6119_v4  ;;  %v2854_v4 = vadd.f32 %v2853_v48, %v2595_v44  ;;  %v2345_v33 = vpop.f32.mrf.mxu0  ;;  %v2607_v45 = vpop.f32.mrf.mxu1 }
 0x773   :  { %v2608_v28 = vadd.f32 %v2607_v45, %v4762_v51 }
 0x774   :  { %3080 = vst [vmem:[#allocation2 + $0x278] sm:$0xff] %v2980_v63 }
 0x775   :  { %v2074_v58 = vpop.f32.mrf.mxu3  ;;  %v2867_v9 = vadd.f32 %v2866_v40, %v2608_v28 }
 0x776   :  { %v2075_v47 = vadd.f32 %v2074_v58, %v5277_v34 }
 0x778   :  { %v2334_v36 = vadd.f32 %v2333_v42, %v2075_v47 }
 0x77a   :  { %v2981_v20 = vpack.c.bf16 %v2852_v50, %v2334_v36  ;;  %v2348_v17 = vpop.f32.mrf.mxu0  ;;  %v2609_v27 = vpop.f32.mrf.mxu1 }
 0x77b   :  { %v2610_v58 = vadd.f32 %v2609_v27, %v4762_v51 }
 0x77c   :  { %3081 = vst [vmem:[#allocation2 + $0x280] sm:$0xff] %v2981_v20 }
 0x77d   :  { %v2076_v8 = vpop.f32.mrf.mxu3 }
 0x77e   :  { %v2077_v23 = vadd.f32 %v2076_v8, %v5277_v34 }
 0x780   :  { %v2336_v43 = vadd.f32 %v2335_v22, %v2077_v23  ;;  %v2868_v22 = vpop.f32.mrf.mxu2 }
 0x781   :  { %v2869_v50 = vadd.f32 %v2868_v22, %v2610_v58 }
 0x782   :  { %v2982_v29 = vpack.c.bf16 %v2854_v4, %v2336_v43  ;;  %2118 = vmatmul.bf16.gmra.mxu3 %v6187_v19  ;;  %v2350_v16 = vpop.f32.mrf.mxu0  ;;  %v2612_v53 = vpop.f32.mrf.mxu1 }
 0x784   :  { %3082 = vst [vmem:[#allocation2 + $0x288] sm:$0xff] %v2982_v29 }
 0x785   :  { %v2079_v54 = vpop.f32.mrf.mxu3 }
 0x786   :  { %v2080_v39 = vadd.f32 %v2079_v54, %v5277_v34 }
 0x788   :  { %v2339_v60 = vadd.f32 %v2338_v7, %v2080_v39  ;;  %v2871_v7 = vpop.f32.mrf.mxu2 }
 0x78a   :  { %v2983_v10 = vpack.c.bf16 %v2857_v55, %v2339_v60  ;;  %v2353_v25 = vpop.f32.mrf.mxu0  ;;  %v2614_v18 = vpop.f32.mrf.mxu1 }
 0x78b   :  { %v2615_v0 = vadd.f32 %v2614_v18, %v4762_v51 }
 0x78c   :  { %3083 = vst [vmem:[#allocation2 + $0x290] sm:$0xff] %v2983_v10 }
 0x78d   :  { %v2081_v38 = vpop.f32.mrf.mxu3 }
 0x78e   :  { %v2082_v42 = vadd.f32 %v2081_v38, %v5277_v34 }
 0x790   :  { %v2341_v24 = vadd.f32 %v2340_v37, %v2082_v42  ;;  %v2873_v63 = vpop.f32.mrf.mxu2 }
 0x791   :  { %v2874_v56 = vadd.f32 %v2873_v63, %v2615_v0 }
 0x792   :  { %v2984_v5 = vpack.c.bf16 %v2859_v41, %v2341_v24  ;;  %2636 = vmatmul.bf16.vlgmr.msra.gmra.mxu3 %v6187_v19  ;;  %v2355_v47 = vpop.f32.mrf.mxu0  ;;  %v2617_v20 = vpop.f32.mrf.mxu1 }
 0x793   :  { %v2618_v45 = vadd.f32 %v2617_v20, %v4762_v51 }
 0x794   :  { %3084 = vst [vmem:[#allocation2 + $0x298] sm:$0xff] %v2984_v5 }
 0x795   :  { %v2084_v35 = vpop.f32.mrf.mxu3 }
 0x796   :  { %v2085_v48 = vadd.f32 %v2084_v35, %v5277_v34 }
 0x798   :  { %v2344_v26 = vadd.f32 %v2343_v61, %v2085_v48  ;;  %v2613_v61 = vadd.f32 %v2612_v53, %v4762_v51  ;;  %v2876_v44 = vpop.f32.mrf.mxu2 }
 0x799   :  { %v2877_v3 = vadd.f32 %v2876_v44, %v2618_v45 }
 0x79a   :  { %v2985_v2 = vpack.c.bf16 %v2862_v13, %v2344_v26  ;;  %v2872_v23 = vadd.f32 %v2871_v7, %v2613_v61  ;;  %v2358_v43 = vpop.f32.mrf.mxu0  ;;  %v2619_v54 = vpop.f32.mrf.mxu1 }
 0x79b   :  { %v2620_v35 = vadd.f32 %v2619_v54, %v4762_v51 }
 0x79c   :  { %3085 = vst [vmem:[#allocation2 + $0x2a0] sm:$0xff] %v2985_v2 }
 0x79d   :  { %v2086_v15 = vpop.f32.mrf.mxu3 }
 0x79e   :  { %v2087_v49 = vadd.f32 %v2086_v15, %v5277_v34 }
 0x7a0   :  { %v2346_v6 = vadd.f32 %v2345_v33, %v2087_v49  ;;  %v2878_v33 = vpop.f32.mrf.mxu2 }
 0x7a1   :  { %v2879_v48 = vadd.f32 %v2878_v33, %v2620_v35 }
 0x7a2   :  { %v2986_v21 = vpack.c.bf16 %v2864_v31, %v2346_v6  ;;  %2895 = vmatmul.bf16.vlgmr.msrb.gmra.mxu3 %v6188_v52  ;;  %v2360_v60 = vpop.f32.mrf.mxu0  ;;  %v2622_v40 = vpop.f32.mrf.mxu1 }
 0x7a4   :  { %3086 = vst [vmem:[#allocation2 + $0x2a8] sm:$0xff] %v2986_v21 }
 0x7a5   :  { %v2089_v14 = vpop.f32.mrf.mxu3 }
 0x7a6   :  { %v2090_v1 = vadd.f32 %v2089_v14, %v5277_v34 }
 0x7a8   :  { %v2349_v57 = vadd.f32 %v2348_v17, %v2090_v1  ;;  %v2881_v24 = vpop.f32.mrf.mxu2 }
 0x7aa   :  { %v2987_v30 = vpack.c.bf16 %v2867_v9, %v2349_v57  ;;  %v2363_v17 = vpop.f32.mrf.mxu0  ;;  %v2624_v26 = vpop.f32.mrf.mxu1 }
 0x7ab   :  { %v2625_v52 = vadd.f32 %v2624_v26, %v4762_v51 }
 0x7ac   :  { %3087 = vst [vmem:[#allocation2 + $0x2b0] sm:$0xff] %v2987_v30 }
 0x7ad   :  { %v2091_v37 = vpop.f32.mrf.mxu3 }
 0x7ae   :  { %v2092_v11 = vadd.f32 %v2091_v37, %v5277_v34 }
 0x7b0   :  { %v2351_v36 = vadd.f32 %v2350_v16, %v2092_v11  ;;  %v2883_v22 = vpop.f32.mrf.mxu2  ;;  %v2623_v16 = vadd.f32 %v2622_v40, %v4762_v51 }
 0x7b1   :  { %v2884_v14 = vadd.f32 %v2883_v22, %v2625_v52 }
 0x7b2   :  { %v2988_v46 = vpack.c.bf16 %v2869_v50, %v2351_v36  ;;  %v2365_v12 = vpop.f32.mrf.mxu0  ;;  %v2882_v49 = vadd.f32 %v2881_v24, %v2623_v16  ;;  %v2627_v53 = vpop.f32.mrf.mxu1 }
 0x7b3   :  { %v2628_v30 = vadd.f32 %v2627_v53, %v4762_v51 }
 0x7b4   :  { %3088 = vst [vmem:[#allocation2 + $0x2b8] sm:$0xff] %v2988_v46 }
 0x7b5   :  { %v2094_v62 = vpop.f32.mrf.mxu3 }
 0x7b6   :  { %v2095_v8 = vadd.f32 %v2094_v62, %v5277_v34 }
 0x7b8   :  { %v2354_v4 = vadd.f32 %v2353_v25, %v2095_v8  ;;  %v2886_v25 = vpop.f32.mrf.mxu2 }
 0x7b9   :  { %v2887_v37 = vadd.f32 %v2886_v25, %v2628_v30 }
 0x7ba   :  { %v2989_v29 = vpack.c.bf16 %v2872_v23, %v2354_v4  ;;  %v2368_v1 = vpop.f32.mrf.mxu0  ;;  %v2629_v63 = vpop.f32.mrf.mxu1 }
 0x7bb   :  { %v2630_v46 = vadd.f32 %v2629_v63, %v4762_v51 }
 0x7bc   :  { %3089 = vst [vmem:[#allocation2 + $0x2c0] sm:$0xff] %v2989_v29 }
 0x7bd   :  { %v2096_v19 = vpop.f32.mrf.mxu3 }
 0x7be   :  { %v2097_v32 = vadd.f32 %v2096_v19, %v5277_v34 }
 0x7c0   :  { %v2356_v39 = vadd.f32 %v2355_v47, %v2097_v32  ;;  %v2888_v11 = vpop.f32.mrf.mxu2 }
 0x7c1   :  { %v2889_v62 = vadd.f32 %v2888_v11, %v2630_v46 }
 0x7c2   :  { %v2990_v55 = vpack.c.bf16 %v2874_v56, %v2356_v39  ;;  %v2370_v50 = vpop.f32.mrf.mxu0  ;;  %v2632_v8 = vpop.f32.mrf.mxu1 }
 0x7c3   :  { %v2633_v29 = vadd.f32 %v2632_v8, %v4762_v51 }
 0x7c4   :  { %3090 = vst [vmem:[#allocation2 + $0x2c8] sm:$0xff] %v2990_v55 }
 0x7c5   :  { %v2099_v10 = vpop.f32.mrf.mxu3 }
 0x7c6   :  { %v2100_v38 = vadd.f32 %v2099_v10, %v5277_v34 }
 0x7c8   :  { %v2359_v42 = vadd.f32 %v2358_v43, %v2100_v38  ;;  %v2891_v23 = vpop.f32.mrf.mxu2 }
 0x7c9   :  { %v2892_v0 = vadd.f32 %v2891_v23, %v2633_v29 }
 0x7ca   :  { %v2991_v41 = vpack.c.bf16 %v2877_v3, %v2359_v42  ;;  %v2373_v4 = vpop.f32.mrf.mxu0  ;;  %v2634_v56 = vpop.f32.mrf.mxu1 }
 0x7cb   :  { %v2635_v55 = vadd.f32 %v2634_v56, %v4762_v51 }
 0x7cc   :  { %3091 = vst [vmem:[#allocation2 + $0x2d0] sm:$0xff] %v2991_v41 }
 0x7cd   :  { %v2101_v5 = vpop.f32.mrf.mxu3 }
 0x7ce   :  { %v2102_v59 = vadd.f32 %v2101_v5, %v5277_v34 }
 0x7d0   :  { %v2361_v27 = vadd.f32 %v2360_v60, %v2102_v59  ;;  %v2893_v39 = vpop.f32.mrf.mxu2 }
 0x7d1   :  { %v2894_v45 = vadd.f32 %v2893_v39, %v2635_v55 }
 0x7d2   :  { %v2992_v13 = vpack.c.bf16 %v2879_v48, %v2361_v27  ;;  %v2375_v10 = vpop.f32.mrf.mxu0 }
 0x7d4   :  { %3092 = vst [vmem:[#allocation2 + $0x2d8] sm:$0xff] %v2992_v13 }
 0x7d5   :  { %v2104_v2 = vpop.f32.mrf.mxu3 }
 0x7d6   :  { %v2105_v15 = vadd.f32 %v2104_v2, %v5277_v34 }
 0x7d8   :  { %v2364_v31 = vadd.f32 %v2363_v17, %v2105_v15 }
 0x7da   :  { %v2993_v6 = vpack.c.bf16 %v2882_v49, %v2364_v31  ;;  %v2378_v5 = vpop.f32.mrf.mxu0 }
 0x7dc   :  { %3093 = vst [vmem:[#allocation2 + $0x2e0] sm:$0xff] %v2993_v6 }
 0x7dd   :  { %v2106_v21 = vpop.f32.mrf.mxu3 }
 0x7de   :  { %v2107_v7 = vadd.f32 %v2106_v21, %v5277_v34 }
 0x7e0   :  { %v2366_v28 = vadd.f32 %v2365_v12, %v2107_v7 }
 0x7e2   :  { %v2994_v9 = vpack.c.bf16 %v2884_v14, %v2366_v28  ;;  %v2380_v2 = vpop.f32.mrf.mxu0 }
 0x7e4   :  { %3094 = vst [vmem:[#allocation2 + $0x2e8] sm:$0xff] %v2994_v9 }
 0x7e5   :  { %v2109_v57 = vpop.f32.mrf.mxu3 }
 0x7e6   :  { %v2110_v18 = vadd.f32 %v2109_v57, %v5277_v34 }
 0x7e8   :  { %v2369_v58 = vadd.f32 %v2368_v1, %v2110_v18 }
 0x7ea   :  { %v2995_v47 = vpack.c.bf16 %v2887_v37, %v2369_v58 }
 0x7ec   :  { %3095 = vst [vmem:[#allocation2 + $0x2f0] sm:$0xff] %v2995_v47 }
 0x7ed   :  { %v2111_v36 = vpop.f32.mrf.mxu3 }
 0x7ee   :  { %v2112_v20 = vadd.f32 %v2111_v36, %v5277_v34 }
 0x7f0   :  { %v2371_v61 = vadd.f32 %v2370_v50, %v2112_v20 }
 0x7f2   :  { %v2996_v44 = vpack.c.bf16 %v2889_v62, %v2371_v61 }
 0x7f4   :  { %3096 = vst [vmem:[#allocation2 + $0x2f8] sm:$0xff] %v2996_v44 }
 0x7f5   :  { %v2114_v43 = vpop.f32.mrf.mxu3 }
 0x7f6   :  { %v2115_v19 = vadd.f32 %v2114_v43, %v5277_v34 }
 0x7f8   :  { %v2374_v32 = vadd.f32 %v2373_v4, %v2115_v19 }
 0x7fa   :  { %v2997_v54 = vpack.c.bf16 %v2892_v0, %v2374_v32 }
 0x7fc   :  { %3097 = vst [vmem:[#allocation2 + $0x300] sm:$0xff] %v2997_v54 }
 0x7fd   :  { %v2116_v33 = vpop.f32.mrf.mxu3 }
 0x7fe   :  { %v2117_v60 = vadd.f32 %v2116_v33, %v5277_v34 }
 0x800   :  { %v2376_v38 = vadd.f32 %v2375_v10, %v2117_v60 }
 0x802   :  { %v2998_v3 = vpack.c.bf16 %v2894_v45, %v2376_v38 }
 0x804   :  { %3098 = vst [vmem:[#allocation2 + $0x308] sm:$0xff] %v2998_v3 }
 0x805   :  { %v2119_v42 = vpop.f32.mrf.mxu3 }
 0x806   :  { %v2120_v17 = vadd.f32 %v2119_v42, %v5277_v34 }
 0x808   :  { %v2379_v48 = vadd.f32 %v2378_v5, %v2120_v17 }
 0x80d   :  { %v2121_v40 = vpop.f32.mrf.mxu3 }
 0x80e   :  { %v2122_v26 = vadd.f32 %v2121_v40, %v5277_v34 }
 0x810   :  { %v2381_v15 = vadd.f32 %v2380_v2, %v2122_v26 }
 0x815   :  { %v2637_v41 = vpop.f32.mrf.mxu3 }
 0x816   :  { %v2638_v35 = vadd.f32 %v2637_v41, %v4762_v51 }
 0x81d   :  { %v2639_v24 = vpop.f32.mrf.mxu3 }
 0x81e   :  { %v2640_v22 = vadd.f32 %v2639_v24, %v4762_v51 }
 0x825   :  { %v2896_v59 = vpop.f32.mrf.mxu3 }
 0x826   :  { %v2897_v27 = vadd.f32 %v2896_v59, %v2638_v35 }
 0x828   :  { %v2999_v13 = vpack.c.bf16 %v2897_v27, %v2379_v48 }
 0x82a   :  { %3099 = vst [vmem:[#allocation2 + $0x310] sm:$0xff] %v2999_v13 }
 0x82d   :  { %v2898_v16 = vpop.f32.mrf.mxu3 }
 0x82e   :  { %v2899_v12 = vadd.f32 %v2898_v16, %v2640_v22 }
 0x830   :  { %v3000_v49 = vpack.c.bf16 %v2899_v12, %v2381_v15 }
 0x832   :  { %3100 = vst [vmem:[#allocation2 + $0x318] sm:$0xff] %v3000_v49 }
 0x833   :  { %3113 = dma.vmem_to_hbm [thread:$0]  %s3106_s18, 12800, %s3108_s20, [#allocation3], %s3476_s0, %s3476_s0, %s3477_s21  }
 0x834   :  { %3473 = dma.done.wait [#allocation3], 12800  }
 0x835   :  { %3474 = vsyncadd [#allocation3], 4294954496 }
 0x836   :  { %3118 = vsyncpa [#allocation3], 1 }

</bundles_post_ra>
